<compile_context>
chip_gen: v7x
topology: tpu7x:2x2x1
jax: 0.10.0
libtpu: 0.0.40
codegen_flags: <defaults>
</compile_context>

<pallas_src>
import functools
import math

import numpy as np

import jax
import jax.numpy as jnp
from jax import lax
from jax.experimental import pallas as pl
from jax.experimental.pallas import tpu as pltpu


def _physical_vmem_bytes():
    try:
        cap = int(pltpu.get_tpu_info().vmem_capacity_bytes)
        if cap > 0:
            return cap
    except Exception:
        pass
    return 64 * 1024 * 1024  # conservative (v7x per-core); v5e/v6e have 128 MiB


def _divisors(n):
    return [d for d in range(1, n + 1) if n % d == 0]


def _downsample_kernel(x_ref, up_ref, dn_ref, w_ref, b_ref, o_ref, *scratch,
                       row_axis, cout_axis, compute_dtype):
    """4x4 / stride-2 / pad-1 conv for one (batch, row-block, C_out-tile) cell.

    x_ref : (1, THO, 2, WO, 2*C_in)  stride-2-exposed row block of the frame
    up_ref: (1, 1, 1, WO, 2*C_in)    parity-1 super-row above the block (halo)
    dn_ref: (1, 1, 1, WO, 2*C_in)    parity-0 super-row below the block (halo)
    w_ref : (16*C_in, TCO)           fused taps, row = (kh*4 + kw)*C_in + ci
    b_ref : (1, TCO)                 bias tile (f32)
    o_ref : (1, THO*WO, TCO)         output tokens (lane-dense last dim)
    scratch (optional): (THO*WO, 16*C_in) VMEM cache of the fused operand,
        reused across the C_out-tile axis while the frame block is resident.
    """
    tho, wo = x_ref.shape[1], x_ref.shape[3]
    c2 = x_ref.shape[4]
    c_in = c2 // 2
    m = tho * wo
    cdt = compute_dtype

    r = pl.program_id(row_axis)
    is_top = r == 0
    is_bot = r == pl.num_programs(row_axis) - 1

    # Column id of every flattened token, for the horizontal padding masks.
    ow_id = lax.broadcasted_iota(jnp.int32, (m, 1), 0) % wo
    left_ok = ow_id >= 1           # kw == 0 reads input column 2*ow - 1
    right_ok = ow_id <= wo - 2     # kw == 3 reads input column 2*ow + 2

    def build_operand():
        # Parity planes of the resident row block, cast once to the MXU dtype.
        p0 = x_ref[0, :, 0, :, :].astype(cdt)   # even input rows  (kh = 1, 3)
        p1 = x_ref[0, :, 1, :, :].astype(cdt)   # odd  input rows  (kh = 0, 2)

        # Halo super-rows; at the global image boundary they are conv padding.
        zrow = jnp.zeros((1, wo, c2), cdt)
        up = jnp.where(is_top, zrow, up_ref[0, :, 0, :, :].astype(cdt))
        dn = jnp.where(is_bot, zrow, dn_ref[0, :, 0, :, :].astype(cdt))

        # Row-adjusted planes for the four kernel rows kh = 0..3:
        #   kh=0 -> odd rows shifted up one super-row   (uses the up halo)
        #   kh=1 -> even rows, kh=2 -> odd rows          (no shift)
        #   kh=3 -> even rows shifted down one super-row (uses the down halo)
        if tho > 1:
            rk0 = jnp.concatenate([up, p1[:tho - 1]], axis=0)
            rk3 = jnp.concatenate([p0[1:], dn], axis=0)
        else:
            rk0, rk3 = up, dn
        planes = (rk0.reshape(m, c2), p0.reshape(m, c2),
                  p1.reshape(m, c2), rk3.reshape(m, c2))

        def taps(rk):
            f0 = rk[:, :c_in]      # even input columns (kw = 1, 3)
            f1 = rk[:, c_in:]      # odd  input columns (kw = 0, 2)
            if m > 1:
                # kw=0: column 2*ow-1 -> odd plane shifted down one token.
                t0 = jnp.concatenate([f1[:1], f1[:m - 1]], axis=0)
                # kw=3: column 2*ow+2 -> even plane shifted up one token.
                t3 = jnp.concatenate([f0[1:], f0[m - 1:]], axis=0)
            else:
                t0, t3 = f1, f0
            t0 = jnp.where(left_ok, t0, jnp.zeros_like(t0))
            t3 = jnp.where(right_ok, t3, jnp.zeros_like(t3))
            return jnp.concatenate([t0, f0, f1, t3], axis=1)

        # One fused (m, 16*C_in) operand -> a single K = 16*C_in MXU matmul and
        # a single pass over the f32 result (vs 16 accumulator RMW passes).
        return jnp.concatenate([taps(p) for p in planes], axis=1)

    if scratch:
        # Frame block is resident across the C_out-tile axis: build the fused
        # operand once (first C_out tile) and reuse it for the remaining tiles.
        op_ref, = scratch

        @pl.when(pl.program_id(cout_axis) == 0)
        def _():
            op_ref[...] = build_operand()

        operand = op_ref[...]
    else:
        operand = build_operand()

    acc = jnp.dot(operand, w_ref[...], preferred_element_type=jnp.float32)
    acc = acc + b_ref[...].astype(jnp.float32)
    o_ref[0, :, :] = acc.astype(o_ref.dtype)


def downsample_forward(x, weight, bias, img_size=(128, 128), *,
                       compute_dtype=jnp.bfloat16, c_out_tile=None,
                       row_block=None, weight_resident=None,
                       cache_operand=None):
    """Downsample.forward: tokens (B, H*W, C_in) -> (B, (H/2)*(W/2), C_out).

    x:      (B, L, C_in) tokens, L == H*W
    weight: (C_out, C_in, 4, 4)  torch Conv2d weight layout (OIHW)
    bias:   (C_out,)
    """
    B, L, c_in = x.shape
    H, W = img_size
    if H * W != L:
        raise ValueError(f"img_size {img_size} inconsistent with L={L}")
    if H % 2 or W % 2:
        raise ValueError("H and W must be even for the stride-2 downsample")
    c_out, c_in_w, kh_w, kw_w = weight.shape
    if (c_in_w, kh_w, kw_w) != (c_in, 4, 4):
        raise ValueError("weight must be (C_out, C_in, 4, 4)")
    ho, wo = H // 2, W // 2
    m_full = ho * wo

    cdt = np.dtype(compute_dtype)
    in_item = np.dtype(x.dtype).itemsize
    out_dtype = x.dtype
    out_item = np.dtype(out_dtype).itemsize
    vmem_cap = _physical_vmem_bytes()

    # ---- output-channel tile: lane-dense and wide enough for the 256-wide MXU.
    if c_out_tile is None:
        if c_out % 256 == 0:
            c_out_tile = 256
        elif c_out % 128 == 0:
            c_out_tile = 128
        else:
            c_out_tile = c_out   # correct, but masked / non-lane-dense stores
    if c_out % c_out_tile:
        raise ValueError("c_out_tile must divide C_out")
    tco = c_out_tile
    n_j = c_out // tco

    # ---- row tiling: bound the resident frame block, the fused operand and
    # the f32 matmul result so everything double-buffers inside VMEM.
    x_tok = 4 * c_in * in_item                 # frame-block bytes per token
    op_tok = 16 * c_in * cdt.itemsize          # fused MXU operand per token
    acc_tok = tco * 4                          # f32 matmul result per token
    budget = min(8 << 20, vmem_cap // 8)
    max_m = max(wo, budget // max(x_tok, op_tok, acc_tok))
    if row_block is None:
        valid = [t for t in _divisors(ho) if t == ho or (t * wo) % 8 == 0]
        fitting = [t for t in valid if t * wo <= max_m]
        row_block = max(fitting) if fitting else min(valid)
    tho = row_block
    if ho % tho or (tho != ho and (tho * wo) % 8):
        raise ValueError("row_block must divide H//2 and yield token blocks "
                         "that are a multiple of 8 (or cover the full frame)")
    n_r = ho // tho
    m = tho * wo

    # ---- grid order: keep the larger streamed operand resident.
    x_blk_bytes = m * x_tok + 2 * (2 * wo * c_in * in_item)   # block + halos
    w_blk_bytes = 16 * c_in * tco * cdt.itemsize
    if weight_resident is None:
        weight_resident = w_blk_bytes > x_blk_bytes

    if weight_resident:
        # grid = (C_out tiles, batch, row blocks): the weight tile's index map
        # ignores (b, r) so it is DMA'd once per j while the (smaller) frame
        # streams.  Megacore split on j keeps weight traffic per core halved.
        grid = (n_j, B, n_r)
        cout_axis, row_axis = 0, 2
        dims = ("parallel", "arbitrary", "arbitrary")

        def gidx(j, b, r):
            return b, r, j
    else:
        # grid = (batch, row blocks, C_out tiles): the frame block's index map
        # ignores j so each row block crosses HBM exactly once per batch elem.
        # Batch / row axes are the megacore-parallel ones (no frame duplication).
        grid = (B, n_r, n_j)
        row_axis, cout_axis = 1, 2
        dims = ("parallel", "parallel", "arbitrary")

        def gidx(b, r, j):
            return b, r, j

    def x_map(*g):
        b, r, _ = gidx(*g)
        return (b, r, 0, 0, 0)

    def up_map(*g):
        b, r, _ = gidx(*g)
        return (b, jnp.maximum(r * tho - 1, 0), 1, 0, 0)

    def dn_map(*g):
        b, r, _ = gidx(*g)
        return (b, jnp.minimum((r + 1) * tho, ho - 1), 0, 0, 0)

    def w_map(*g):
        _, _, j = gidx(*g)
        return (0, j)

    def o_map(*g):
        b, r, j = gidx(*g)
        return (b, r, j)

    # ---- fused-operand caching across the (resident-frame) C_out-tile axis.
    op_bytes = m * 16 * c_in * cdt.itemsize
    if cache_operand is None:
        cache_operand = (not weight_resident) and n_j > 1 and op_bytes <= vmem_cap // 4
    if weight_resident:
        cache_operand = False
    scratch_shapes = [pltpu.VMEM((m, 16 * c_in), cdt)] if cache_operand else []

    # ---- host-side prep (all free / tiny one-time transforms).
    xr = x.reshape(B, ho, 2, wo, 2 * c_in)          # contiguity-preserving
    w_fused = jnp.transpose(weight, (2, 3, 1, 0)).reshape(16 * c_in, c_out)
    w_fused = w_fused.astype(cdt)                   # MXU dtype (bf16 default)
    b2 = bias.reshape(1, c_out).astype(jnp.float32)

    # ---- VMEM limit derived from the actual blocks, clamped to physical VMEM.
    o_blk_bytes = m * tco * out_item
    temps = op_bytes + m * tco * 4 + 4 * m * 2 * c_in * cdt.itemsize
    need = 2 * (x_blk_bytes + w_blk_bytes + o_blk_bytes + tco * 4) + temps
    if cache_operand:
        need += op_bytes
    vmem_limit = max(32 << 20, min(int(need * 1.5) + (4 << 20),
                                   int(vmem_cap * 0.9)))

    cost = pl.CostEstimate(
        flops=2 * B * m_full * 16 * c_in * c_out,
        transcendentals=0,
        bytes_accessed=int(B * L * c_in * in_item
                           + 16 * c_in * c_out * cdt.itemsize
                           + c_out * 4 + B * m_full * c_out * out_item),
    )

    kernel = functools.partial(_downsample_kernel, row_axis=row_axis,
                               cout_axis=cout_axis, compute_dtype=cdt)

    return pl.pallas_call(
        kernel,
        out_shape=jax.ShapeDtypeStruct((B, m_full, c_out), out_dtype),
        grid_spec=pltpu.PrefetchScalarGridSpec(
            num_scalar_prefetch=0,
            grid=grid,
            in_specs=[
                pl.BlockSpec((1, tho, 2, wo, 2 * c_in), x_map),
                pl.BlockSpec((1, 1, 1, wo, 2 * c_in), up_map),
                pl.BlockSpec((1, 1, 1, wo, 2 * c_in), dn_map),
                pl.BlockSpec((16 * c_in, tco), w_map),
                pl.BlockSpec((1, tco), w_map),
            ],
            out_specs=pl.BlockSpec((1, m, tco), o_map),
            scratch_shapes=scratch_shapes,
        ),
        compiler_params=pltpu.CompilerParams(
            dimension_semantics=dims,
            vmem_limit_bytes=vmem_limit,
        ),
        cost_estimate=cost,
    )(xr, xr, xr, w_fused, b2)


def _reference(x, weight, bias, H, W, compute_dtype=jnp.float32):
    """Pure-JAX Conv2d(C_in, C_out, k=4, s=2, p=1) reference (NCHW, like torch)."""
    B, L, c_in = x.shape
    x_nchw = jnp.transpose(x, (0, 2, 1)).reshape(B, c_in, H, W)
    y = lax.conv_general_dilated(
        x_nchw.astype(compute_dtype), weight.astype(compute_dtype),
        window_strides=(2, 2), padding=((1, 1), (1, 1)),
        dimension_numbers=("NCHW", "OIHW", "NCHW"),
        preferred_element_type=jnp.float32,
        precision=lax.Precision.HIGHEST)
    y = y + bias.astype(jnp.float32).reshape(1, -1, 1, 1)
    B_, c_out, ho, wo = y.shape
    return jnp.transpose(y.reshape(B_, c_out, ho * wo), (0, 2, 1)).astype(x.dtype)


if __name__ == "__main__":
    B, H, W = 2, 16, 16
    C_IN, C_OUT = 128, 256
    L = H * W

    key = jax.random.PRNGKey(0)
    kx, kwt, kb = jax.random.split(key, 3)
    x = jax.random.normal(kx, (B, L, C_IN), dtype=jnp.float32)

    # nn.Conv2d(C_IN, C_OUT, 4, stride=2, padding=1) parameters (torch layout).
    fan_in = C_IN * 4 * 4
    bound = 1.0 / math.sqrt(fan_in)
    w = jax.random.uniform(kwt, (C_OUT, C_IN, 4, 4), jnp.float32, -bound, bound)
    b = jax.random.uniform(kb, (C_OUT,), jnp.float32, -bound, bound)

    out_shape = (B, (H // 2) * (W // 2), C_OUT)

    # 1) f32 MXU path, whole frame resident across the C_out axis.
    ref32 = _reference(x, w, b, H, W, compute_dtype=jnp.float32)
    out32 = jax.block_until_ready(
        downsample_forward(x, w, b, img_size=(H, W),
                           compute_dtype=jnp.float32, weight_resident=False))
    assert out32.shape == out_shape
    assert jnp.allclose(out32, ref32, atol=2e-2, rtol=2e-2), "f32 path mismatch"

    # 2) default bf16 MXU path, row-tiled (exercises the halo exchange) with
    #    the grid order (weight-resident here) picked automatically.
    ref16 = _reference(x, w, b, H, W, compute_dtype=jnp.bfloat16)
    out16 = jax.block_until_ready(
        downsample_forward(x, w, b, img_size=(H, W), row_block=2))
    assert out16.shape == out_shape
    assert jnp.allclose(out16, ref16, atol=2e-2, rtol=2e-2), "bf16 path mismatch"

    # 3) multiple C_out tiles with the fused operand cached in VMEM scratch.
    out_c = jax.block_until_ready(
        downsample_forward(x, w, b, img_size=(H, W),
                           c_out_tile=128, weight_resident=False))
    assert out_c.shape == out_shape
    assert jnp.allclose(out_c, ref16, atol=2e-2, rtol=2e-2), "cached-operand mismatch"

    print("KERNEL_OK")
</pallas_src>

<mosaic_0001>
module attributes {stable_mosaic.version = 11 : i64} {
  func.func @_downsample_kernel(%arg0: i32, %arg1: i32, %arg2: i32, %arg3: memref<1x8x2x8x256xf32, #tpu.memory_space<vmem>>, %arg4: memref<1x1x1x8x256xf32, #tpu.memory_space<vmem>>, %arg5: memref<1x1x1x8x256xf32, #tpu.memory_space<vmem>>, %arg6: memref<2048x256xf32, #tpu.memory_space<vmem>>, %arg7: memref<1x256xf32, #tpu.memory_space<vmem>>, %arg8: memref<1x64x256xf32, #tpu.memory_space<vmem>>) attributes {dimension_semantics = [#tpu.dimension_semantics<parallel>, #tpu.dimension_semantics<parallel>, #tpu.dimension_semantics<arbitrary>], iteration_bounds = array<i64: 2, 1, 1>, scalar_prefetch = 0 : i64, scratch_operands = 0 : i64, tpu.core_type = #tpu.core_type<tc>, window_params = [{transform_indices = @transform_0, window_bounds = array<i64: 1, 8, 2, 8, 256>}, {transform_indices = @transform_1, window_bounds = array<i64: 1, 1, 1, 8, 256>}, {transform_indices = @transform_2, window_bounds = array<i64: 1, 1, 1, 8, 256>}, {transform_indices = @transform_3, window_bounds = array<i64: 2048, 256>}, {transform_indices = @transform_4, window_bounds = array<i64: 1, 256>}, {transform_indices = @transform_5, window_bounds = array<i64: 1, 64, 256>}]} {
    %c0_i32 = arith.constant 0 : i32
    %0 = arith.cmpi eq, %arg1, %c0_i32 : i32
    %c0_i32_0 = arith.constant 0 : i32
    %1 = arith.cmpi eq, %arg1, %c0_i32_0 : i32
    %2 = tpu.iota {dimensions = array<i32: 0>} : vector<64x1xi32>
    %c8_i32 = arith.constant 8 : i32
    %c0_i32_1 = arith.constant 0 : i32
    %3 = arith.cmpi eq, %c8_i32, %c0_i32_1 : i32
    %c1_i32 = arith.constant 1 : i32
    %4 = arith.select %3, %c1_i32, %c8_i32 : i32
    %5 = vector.broadcast %4 : i32 to vector<64x1xi32>
    %6 = arith.remsi %2, %5 : vector<64x1xi32>
    %c0_i32_2 = arith.constant 0 : i32
    %7 = vector.broadcast %c0_i32_2 : i32 to vector<64x1xi32>
    %8 = arith.cmpi ne, %6, %7 : vector<64x1xi32>
    %c0_i32_3 = arith.constant 0 : i32
    %9 = vector.broadcast %c0_i32_3 : i32 to vector<64x1xi32>
    %10 = arith.cmpi slt, %6, %9 : vector<64x1xi32>
    %c0_i32_4 = arith.constant 0 : i32
    %11 = arith.cmpi slt, %4, %c0_i32_4 : i32
    %12 = vector.broadcast %11 : i1 to vector<64x1xi1>
    %13 = vector.broadcast %12 : vector<64x1xi1> to vector<64x1xi1>
    %14 = arith.xori %10, %13 : vector<64x1xi1>
    %15 = arith.andi %14, %8 : vector<64x1xi1>
    %16 = vector.broadcast %4 : i32 to vector<64x1xi32>
    %17 = arith.addi %6, %16 : vector<64x1xi32>
    %18 = arith.select %15, %17, %6 : vector<64x1xi1>, vector<64x1xi32>
    %c1_i32_5 = arith.constant 1 : i32
    %19 = vector.broadcast %c1_i32_5 : i32 to vector<64x1xi32>
    %20 = arith.cmpi sge, %18, %19 : vector<64x1xi32>
    %c6_i32 = arith.constant 6 : i32
    %21 = vector.broadcast %c6_i32 : i32 to vector<64x1xi32>
    %22 = arith.cmpi sle, %18, %21 : vector<64x1xi32>
    %c0 = arith.constant 0 : index
    %c0_6 = arith.constant 0 : index
    %c0_7 = arith.constant 0 : index
    %c0_8 = arith.constant 0 : index
    %c0_9 = arith.constant 0 : index
    %23 = vector.load %arg3[%c0, %c0_6, %c0_7, %c0_8, %c0_9] : memref<1x8x2x8x256xf32, #tpu.memory_space<vmem>>, vector<1x8x1x8x256xf32>
    %24 = vector.shape_cast %23 : vector<1x8x1x8x256xf32> to vector<8x8x256xf32>
    %c0_10 = arith.constant 0 : index
    %c0_11 = arith.constant 0 : index
    %c1 = arith.constant 1 : index
    %c0_12 = arith.constant 0 : index
    %c0_13 = arith.constant 0 : index
    %25 = vector.load %arg3[%c0_10, %c0_11, %c1, %c0_12, %c0_13] : memref<1x8x2x8x256xf32, #tpu.memory_space<vmem>>, vector<1x8x1x8x256xf32>
    %26 = vector.shape_cast %25 : vector<1x8x1x8x256xf32> to vector<8x8x256xf32>
    %cst = arith.constant 0.000000e+00 : f32
    %27 = vector.broadcast %cst : f32 to vector<1x8x256xf32>
    %c0_14 = arith.constant 0 : index
    %c0_15 = arith.constant 0 : index
    %c0_16 = arith.constant 0 : index
    %c0_17 = arith.constant 0 : index
    %c0_18 = arith.constant 0 : index
    %28 = vector.load %arg4[%c0_14, %c0_15, %c0_16, %c0_17, %c0_18] : memref<1x1x1x8x256xf32, #tpu.memory_space<vmem>>, vector<1x1x1x8x256xf32>
    %29 = vector.shape_cast %28 : vector<1x1x1x8x256xf32> to vector<1x8x256xf32>
    %30 = arith.select %0, %27, %29 : vector<1x8x256xf32>
    %c0_19 = arith.constant 0 : index
    %c0_20 = arith.constant 0 : index
    %c0_21 = arith.constant 0 : index
    %c0_22 = arith.constant 0 : index
    %c0_23 = arith.constant 0 : index
    %31 = vector.load %arg5[%c0_19, %c0_20, %c0_21, %c0_22, %c0_23] : memref<1x1x1x8x256xf32, #tpu.memory_space<vmem>>, vector<1x1x1x8x256xf32>
    %32 = vector.shape_cast %31 : vector<1x1x1x8x256xf32> to vector<1x8x256xf32>
    %33 = arith.select %1, %27, %32 : vector<1x8x256xf32>
    %34 = vector.extract_strided_slice %26 {offsets = [0, 0, 0], sizes = [7, 8, 256], strides = [1, 1, 1]} : vector<8x8x256xf32> to vector<7x8x256xf32>
    %35 = tpu.concatenate %30, %34 in 0 : vector<1x8x256xf32>, vector<7x8x256xf32> -> vector<8x8x256xf32>
    %36 = vector.extract_strided_slice %24 {offsets = [1, 0, 0], sizes = [7, 8, 256], strides = [1, 1, 1]} : vector<8x8x256xf32> to vector<7x8x256xf32>
    %37 = tpu.concatenate %36, %33 in 0 : vector<7x8x256xf32>, vector<1x8x256xf32> -> vector<8x8x256xf32>
    %38 = vector.shape_cast %35 : vector<8x8x256xf32> to vector<64x256xf32>
    %39 = vector.shape_cast %24 : vector<8x8x256xf32> to vector<64x256xf32>
    %40 = vector.shape_cast %26 : vector<8x8x256xf32> to vector<64x256xf32>
    %41 = vector.shape_cast %37 : vector<8x8x256xf32> to vector<64x256xf32>
    %42 = vector.extract_strided_slice %38 {offsets = [0, 0], sizes = [64, 128], strides = [1, 1]} : vector<64x256xf32> to vector<64x128xf32>
    %43 = vector.extract_strided_slice %38 {offsets = [0, 128], sizes = [64, 128], strides = [1, 1]} : vector<64x256xf32> to vector<64x128xf32>
    %44 = vector.extract_strided_slice %43 {offsets = [0, 0], sizes = [1, 128], strides = [1, 1]} : vector<64x128xf32> to vector<1x128xf32>
    %45 = vector.extract_strided_slice %43 {offsets = [0, 0], sizes = [63, 128], strides = [1, 1]} : vector<64x128xf32> to vector<63x128xf32>
    %46 = tpu.concatenate %44, %45 in 0 : vector<1x128xf32>, vector<63x128xf32> -> vector<64x128xf32>
    %47 = vector.extract_strided_slice %42 {offsets = [1, 0], sizes = [63, 128], strides = [1, 1]} : vector<64x128xf32> to vector<63x128xf32>
    %48 = vector.extract_strided_slice %42 {offsets = [63, 0], sizes = [1, 128], strides = [1, 1]} : vector<64x128xf32> to vector<1x128xf32>
    %49 = tpu.concatenate %47, %48 in 0 : vector<63x128xf32>, vector<1x128xf32> -> vector<64x128xf32>
    %cst_24 = arith.constant 0.000000e+00 : f32
    %50 = vector.broadcast %cst_24 : f32 to vector<64x128xf32>
    %51 = vector.shape_cast %20 : vector<64x1xi1> to vector<64x1xi1>
    %52 = vector.broadcast %51 : vector<64x1xi1> to vector<64x128xi1>
    %53 = arith.select %52, %46, %50 : vector<64x128xi1>, vector<64x128xf32>
    %cst_25 = arith.constant 0.000000e+00 : f32
    %54 = vector.broadcast %cst_25 : f32 to vector<64x128xf32>
    %55 = vector.shape_cast %22 : vector<64x1xi1> to vector<64x1xi1>
    %56 = vector.broadcast %55 : vector<64x1xi1> to vector<64x128xi1>
    %57 = arith.select %56, %49, %54 : vector<64x128xi1>, vector<64x128xf32>
    %58 = tpu.concatenate %53, %42, %43, %57 in 1 : vector<64x128xf32>, vector<64x128xf32>, vector<64x128xf32>, vector<64x128xf32> -> vector<64x512xf32>
    %59 = vector.extract_strided_slice %39 {offsets = [0, 0], sizes = [64, 128], strides = [1, 1]} : vector<64x256xf32> to vector<64x128xf32>
    %60 = vector.extract_strided_slice %39 {offsets = [0, 128], sizes = [64, 128], strides = [1, 1]} : vector<64x256xf32> to vector<64x128xf32>
    %61 = vector.extract_strided_slice %60 {offsets = [0, 0], sizes = [1, 128], strides = [1, 1]} : vector<64x128xf32> to vector<1x128xf32>
    %62 = vector.extract_strided_slice %60 {offsets = [0, 0], sizes = [63, 128], strides = [1, 1]} : vector<64x128xf32> to vector<63x128xf32>
    %63 = tpu.concatenate %61, %62 in 0 : vector<1x128xf32>, vector<63x128xf32> -> vector<64x128xf32>
    %64 = vector.extract_strided_slice %59 {offsets = [1, 0], sizes = [63, 128], strides = [1, 1]} : vector<64x128xf32> to vector<63x128xf32>
    %65 = vector.extract_strided_slice %59 {offsets = [63, 0], sizes = [1, 128], strides = [1, 1]} : vector<64x128xf32> to vector<1x128xf32>
    %66 = tpu.concatenate %64, %65 in 0 : vector<63x128xf32>, vector<1x128xf32> -> vector<64x128xf32>
    %cst_26 = arith.constant 0.000000e+00 : f32
    %67 = vector.broadcast %cst_26 : f32 to vector<64x128xf32>
    %68 = vector.shape_cast %20 : vector<64x1xi1> to vector<64x1xi1>
    %69 = vector.broadcast %68 : vector<64x1xi1> to vector<64x128xi1>
    %70 = arith.select %69, %63, %67 : vector<64x128xi1>, vector<64x128xf32>
    %cst_27 = arith.constant 0.000000e+00 : f32
    %71 = vector.broadcast %cst_27 : f32 to vector<64x128xf32>
    %72 = vector.shape_cast %22 : vector<64x1xi1> to vector<64x1xi1>
    %73 = vector.broadcast %72 : vector<64x1xi1> to vector<64x128xi1>
    %74 = arith.select %73, %66, %71 : vector<64x128xi1>, vector<64x128xf32>
    %75 = tpu.concatenate %70, %59, %60, %74 in 1 : vector<64x128xf32>, vector<64x128xf32>, vector<64x128xf32>, vector<64x128xf32> -> vector<64x512xf32>
    %76 = vector.extract_strided_slice %40 {offsets = [0, 0], sizes = [64, 128], strides = [1, 1]} : vector<64x256xf32> to vector<64x128xf32>
    %77 = vector.extract_strided_slice %40 {offsets = [0, 128], sizes = [64, 128], strides = [1, 1]} : vector<64x256xf32> to vector<64x128xf32>
    %78 = vector.extract_strided_slice %77 {offsets = [0, 0], sizes = [1, 128], strides = [1, 1]} : vector<64x128xf32> to vector<1x128xf32>
    %79 = vector.extract_strided_slice %77 {offsets = [0, 0], sizes = [63, 128], strides = [1, 1]} : vector<64x128xf32> to vector<63x128xf32>
    %80 = tpu.concatenate %78, %79 in 0 : vector<1x128xf32>, vector<63x128xf32> -> vector<64x128xf32>
    %81 = vector.extract_strided_slice %76 {offsets = [1, 0], sizes = [63, 128], strides = [1, 1]} : vector<64x128xf32> to vector<63x128xf32>
    %82 = vector.extract_strided_slice %76 {offsets = [63, 0], sizes = [1, 128], strides = [1, 1]} : vector<64x128xf32> to vector<1x128xf32>
    %83 = tpu.concatenate %81, %82 in 0 : vector<63x128xf32>, vector<1x128xf32> -> vector<64x128xf32>
    %cst_28 = arith.constant 0.000000e+00 : f32
    %84 = vector.broadcast %cst_28 : f32 to vector<64x128xf32>
    %85 = vector.shape_cast %20 : vector<64x1xi1> to vector<64x1xi1>
    %86 = vector.broadcast %85 : vector<64x1xi1> to vector<64x128xi1>
    %87 = arith.select %86, %80, %84 : vector<64x128xi1>, vector<64x128xf32>
    %cst_29 = arith.constant 0.000000e+00 : f32
    %88 = vector.broadcast %cst_29 : f32 to vector<64x128xf32>
    %89 = vector.shape_cast %22 : vector<64x1xi1> to vector<64x1xi1>
    %90 = vector.broadcast %89 : vector<64x1xi1> to vector<64x128xi1>
    %91 = arith.select %90, %83, %88 : vector<64x128xi1>, vector<64x128xf32>
    %92 = tpu.concatenate %87, %76, %77, %91 in 1 : vector<64x128xf32>, vector<64x128xf32>, vector<64x128xf32>, vector<64x128xf32> -> vector<64x512xf32>
    %93 = vector.extract_strided_slice %41 {offsets = [0, 0], sizes = [64, 128], strides = [1, 1]} : vector<64x256xf32> to vector<64x128xf32>
    %94 = vector.extract_strided_slice %41 {offsets = [0, 128], sizes = [64, 128], strides = [1, 1]} : vector<64x256xf32> to vector<64x128xf32>
    %95 = vector.extract_strided_slice %94 {offsets = [0, 0], sizes = [1, 128], strides = [1, 1]} : vector<64x128xf32> to vector<1x128xf32>
    %96 = vector.extract_strided_slice %94 {offsets = [0, 0], sizes = [63, 128], strides = [1, 1]} : vector<64x128xf32> to vector<63x128xf32>
    %97 = tpu.concatenate %95, %96 in 0 : vector<1x128xf32>, vector<63x128xf32> -> vector<64x128xf32>
    %98 = vector.extract_strided_slice %93 {offsets = [1, 0], sizes = [63, 128], strides = [1, 1]} : vector<64x128xf32> to vector<63x128xf32>
    %99 = vector.extract_strided_slice %93 {offsets = [63, 0], sizes = [1, 128], strides = [1, 1]} : vector<64x128xf32> to vector<1x128xf32>
    %100 = tpu.concatenate %98, %99 in 0 : vector<63x128xf32>, vector<1x128xf32> -> vector<64x128xf32>
    %cst_30 = arith.constant 0.000000e+00 : f32
    %101 = vector.broadcast %cst_30 : f32 to vector<64x128xf32>
    %102 = vector.shape_cast %20 : vector<64x1xi1> to vector<64x1xi1>
    %103 = vector.broadcast %102 : vector<64x1xi1> to vector<64x128xi1>
    %104 = arith.select %103, %97, %101 : vector<64x128xi1>, vector<64x128xf32>
    %cst_31 = arith.constant 0.000000e+00 : f32
    %105 = vector.broadcast %cst_31 : f32 to vector<64x128xf32>
    %106 = vector.shape_cast %22 : vector<64x1xi1> to vector<64x1xi1>
    %107 = vector.broadcast %106 : vector<64x1xi1> to vector<64x128xi1>
    %108 = arith.select %107, %100, %105 : vector<64x128xi1>, vector<64x128xf32>
    %109 = tpu.concatenate %104, %93, %94, %108 in 1 : vector<64x128xf32>, vector<64x128xf32>, vector<64x128xf32>, vector<64x128xf32> -> vector<64x512xf32>
    %110 = tpu.concatenate %58, %75, %92, %109 in 1 : vector<64x512xf32>, vector<64x512xf32>, vector<64x512xf32>, vector<64x512xf32> -> vector<64x2048xf32>
    %c0_32 = arith.constant 0 : index
    %c0_33 = arith.constant 0 : index
    %111 = vector.load %arg6[%c0_32, %c0_33] : memref<2048x256xf32, #tpu.memory_space<vmem>>, vector<2048x256xf32>
    %cst_34 = arith.constant dense<0.000000e+00> : vector<64x256xf32>
    %112 = tpu.matmul %110, %111, %cst_34 {dimension_numbers = #tpu.dot_dimension_numbers<[1], [0], [0], [1], [0, 0, 1, 1], [], []>} : vector<64x2048xf32>, vector<2048x256xf32>, vector<64x256xf32> -> vector<64x256xf32>
    %c0_35 = arith.constant 0 : index
    %c0_36 = arith.constant 0 : index
    %113 = vector.load %arg7[%c0_35, %c0_36] : memref<1x256xf32, #tpu.memory_space<vmem>>, vector<1x256xf32>
    %114 = vector.broadcast %113 : vector<1x256xf32> to vector<64x256xf32>
    %115 = arith.addf %112, %114 : vector<64x256xf32>
    %c0_37 = arith.constant 0 : index
    %c0_38 = arith.constant 0 : index
    %c0_39 = arith.constant 0 : index
    %116 = vector.load %arg8[%c0_37, %c0_38, %c0_39] : memref<1x64x256xf32, #tpu.memory_space<vmem>>, vector<1x64x256xf32>
    %117 = vector.shape_cast %116 : vector<1x64x256xf32> to vector<64x256xf32>
    %118 = vector.shape_cast %115 : vector<64x256xf32> to vector<1x64x256xf32>
    tpu.vector_store %arg8[%c0_37, %c0_38, %c0_39], %118 {strides = array<i32>} : memref<1x64x256xf32, #tpu.memory_space<vmem>>, vector<1x64x256xf32>,
    return
  }
  func.func @transform_0(%arg0: i32, %arg1: i32, %arg2: i32) -> (i32, i32, i32, i32, i32) {
    %c0_i32 = arith.constant 0 : i32
    %c0_i32_0 = arith.constant 0 : i32
    %c0_i32_1 = arith.constant 0 : i32
    %c0_i32_2 = arith.constant 0 : i32
    return %arg0, %arg1, %c0_i32, %c0_i32_0, %c0_i32_1 : i32, i32, i32, i32, i32
  }
  func.func @transform_1(%arg0: i32, %arg1: i32, %arg2: i32) -> (i32, i32, i32, i32, i32) {
    %c8_i32 = arith.constant 8 : i32
    %0 = arith.muli %arg1, %c8_i32 : i32
    %c1_i32 = arith.constant 1 : i32
    %1 = arith.subi %0, %c1_i32 : i32
    %c0_i32 = arith.constant 0 : i32
    %2 = arith.maxsi %1, %c0_i32 : i32
    %c1_i32_0 = arith.constant 1 : i32
    %c0_i32_1 = arith.constant 0 : i32
    %c0_i32_2 = arith.constant 0 : i32
    %c0_i32_3 = arith.constant 0 : i32
    return %arg0, %2, %c1_i32_0, %c0_i32_1, %c0_i32_2 : i32, i32, i32, i32, i32
  }
  func.func @transform_2(%arg0: i32, %arg1: i32, %arg2: i32) -> (i32, i32, i32, i32, i32) {
    %c1_i32 = arith.constant 1 : i32
    %0 = arith.addi %arg1, %c1_i32 : i32
    %c8_i32 = arith.constant 8 : i32
    %1 = arith.muli %0, %c8_i32 : i32
    %c7_i32 = arith.constant 7 : i32
    %2 = arith.minsi %1, %c7_i32 : i32
    %c0_i32 = arith.constant 0 : i32
    %c0_i32_0 = arith.constant 0 : i32
    %c0_i32_1 = arith.constant 0 : i32
    %c0_i32_2 = arith.constant 0 : i32
    return %arg0, %2, %c0_i32, %c0_i32_0, %c0_i32_1 : i32, i32, i32, i32, i32
  }
  func.func @transform_3(%arg0: i32, %arg1: i32, %arg2: i32) -> (i32, i32) {
    %c0_i32 = arith.constant 0 : i32
    %c0_i32_0 = arith.constant 0 : i32
    return %c0_i32, %arg2 : i32, i32
  }
  func.func @transform_4(%arg0: i32, %arg1: i32, %arg2: i32) -> (i32, i32) {
    %c0_i32 = arith.constant 0 : i32
    %c0_i32_0 = arith.constant 0 : i32
    return %c0_i32, %arg2 : i32, i32
  }
  func.func @transform_5(%arg0: i32, %arg1: i32, %arg2: i32) -> (i32, i32, i32) {
    %c0_i32 = arith.constant 0 : i32
    return %arg0, %arg1, %arg2 : i32, i32, i32
  }
}

</mosaic_0001>

<bundles_post_ra>
// kernel: tpu_custom_call.1
= control target key start
LH: loop header
LB: loop body
LE: loop exit
PB: predicated region body
PF: predicated region fallthrough
CT: control target
= control target key end

     0   :  { %s4503_s0 = inlined_call_operand.hbm [shape: f32[2,8,2,8,256], index: 0, kind: input, shape index: {}]   ;;  %s4504_s1 = inlined_call_operand.hbm [shape: f32[2,8,2,8,256], index: 1, kind: input, shape index: {}]   ;;  %s4505_s2 = inlined_call_operand.hbm [shape: f32[2,8,2,8,256], index: 2, kind: input, shape index: {}]   ;;  %s4506_s3 = inlined_call_operand.hbm [shape: f32[2048,256], index: 3, kind: input, shape index: {}]   ;;  %s4507_s4 = inlined_call_operand.hbm [shape: f32[1,256], index: 4, kind: input, shape index: {}]   ;;  %s4508_s5 = inlined_call_operand.hbm [shape: f32[2,64,256], index: 5, kind: output, shape index: {}]  }
   0x1   :  { %4539 = sst [smem:[#allocation21_spill]] %s4504_s1 }
   0x2   :  { %4540 = sst [smem:[#allocation22_spill]] %s4506_s3 }
   0x3   :  { %10 = vsyncpa [#allocation3], 0 }
   0x4   :  { %12 = vsyncpa [#allocation3 + $0x1], 0 }
   0x5   :  { %13 = vsyncpa [#allocation6], 0 }
   0x6   :  { %15 = vsyncpa [#allocation6 + $0x1], 0 }
   0x7   :  { %16 = vsyncpa [#allocation9], 0 }
   0x8   :  { %17 = vsyncpa [#allocation4], 0 }
   0x9   :  { %19 = vsyncpa [#allocation4 + $0x1], 0  ;;  %s3608_s18 = smov 0   ;;  %s3610_s19 = smov 0  }
   0xa   :  { %s3612_s20 = smov 0   ;;  %s3614_s21 = smov 0  }
   0xb   :  { %s3616_s22 = smov 0   ;;  %s3618_s23 = smov 0  }
   0xc LB: > { %4541 = sst [smem:[#allocation16_spill]] %s3553_s20  ;;  %s3639_s24 = sadd.s32 4294967295, %s3565_s23   ;;  %s3565_s23 = sphi %s3618_s23, %s25_s23   ;;  %s3561_s22 = sphi %s3616_s22, %s4637_s22   ;;  %s3557_s21 = sphi %s3614_s21, %s4636_s21   ;;  %s3553_s20 = sphi %s3612_s20, %s4635_s20   ;;  %s3549_s19 = sphi %s3610_s19, %s4639_s19   ;;  %s3545_s18 = sphi %s3608_s18, %s4638_s18  }
   0xd   : > { %4542 = sst [smem:[#allocation17_spill]] %s3561_s22  ;;  %s2478_s25 = sadd.s32 4294967294, %s3565_s23  }
   0xe   : > { %p66_p0 = scmp.ne.s32.totalorder %s3549_s19, %s3545_s18  ;;  %p4509_p1 = scmp.eq.s32.totalorder %s3639_s24, 0 }
   0xf   : > { %p224_p3 = scmp.eq.s32.totalorder %s2478_s25, 1  ;;  %p2479_p5 = scmp.ge.s32.totalorder %s3565_s23, 1 }
  0x10   : > { %p3648_p4 = por %p4509_p1, %p66_p0  ;;  %p231_p7 = scmp.lt.s32.totalorder %s3565_s23, 3 }
  0x11   : > { %p3653_p6 = por %p224_p3, %p66_p0  ;;  %s3567_s29 = smov [#allocation8]  }
  0x12   : > { %s4543_s26 = scalar_select %p3648_p4, 1, 0 }
  0x13   : > { %s4544_s27 = scalar_select %p3653_p6, 1, 0 }
  0x14   : > { %p3658_p8 = pnand %p2479_p5, %p231_p7  ;;  %s246_s30 = sshll.u32 %s3567_s29, 4  ;;  %s247_s30 = int_to_ptr.vmem [resolvable:$true] %s246_s30 }
  0x15   : > { %4545 = sst [smem:[#allocation18_spill]] %s4544_s27  ;;  %s44_s7 = sadd.s32 1, %s3561_s22 }
  0x16   : > { %s4546_s28 = scalar_select %p3658_p8, 1, 0 }
  0x17   : > { %p3246_p9 = pneg %p3658_p8  ;;  %s4548_s3 = sld [smem:[#allocation22_spill]] }
  0x19   : > { %p3667_p11 = pnand %p3246_p9, %p4509_p1 }
  0x1b   : > { %s4547_s6 = scalar_select %p3667_p11, 1, 0 }
  0x1c   : > { %p4518_p13 = pneg %p3667_p11 }
  0x1d   : > { %s3328_s10 = scalar_lea.hbm %s4548_s3, 65536 }
  0x1e   : > { %p3329_p12 = scmp.ne.s32.totalorder %s4548_s3, %s3328_s10  ;;  %p3335_p5 = scmp.lt.u32.totalorder %s3328_s10, %s4548_s3 }
  0x20   : > { %p3331_p0 = pnand %p4518_p13, %p3329_p12 }
  0x22   : > { %p3332_p3 = pneg %p3331_p0 }
  0x24   : > { %p3337_p7 = pnand %p3335_p5, %p3332_p3 }
  0x26   : > { %3340 = shalt.err (!%p3337_p7)
}
  0x27   : > { %s3341_s15 = scalar_lea.vmem %s247_s30, 65536  ;;  %p3349_p2 = scmp.lt.s32.totalorder %s247_s30, %s247_s30 }
  0x28   : > { %p3342_p9 = scmp.ne.s32.totalorder %s247_s30, %s3341_s15  ;;  %p3350_p6 = scmp.lt.s32.totalorder %s3341_s15, %s3341_s15 }
  0x2a   : > { %p3344_p10 = pnand %p3342_p9, %p4518_p13  ;;  %p3351_p4 = por %p3350_p6, %p3349_p2 }
  0x2c   : > { %p3345_p1 = pneg %p3344_p10 }
  0x2e   : > { %p3352_p8 = pnand %p3351_p4, %p3345_p1 }
  0x30   : > { %3355 = shalt.err (!%p3352_p8)
}
  0x31   : > { %s4512_s16 = smov 256   ;;  %s4513_s17 = smov 16  }
  0x32   : > { %3249 = dma.hbm_to_vmem [thread:$0]  (!%p3667_p11), %s4548_s3, 65536, %s247_s30, [#allocation9], %s4512_s16, %s4512_s16, %s4513_s17  }
  0x33   : > { %p46_p1 = scmp.ge.s32.totalorder %s44_s7, 2  ;;  %s53_s8 = sadd.s32 1, %s3553_s20 }
  0x34   : > { %p60_p2 = scmp.ne.s32.totalorder %s3553_s20, %s3549_s19  ;;  %p61_p4 = scmp.eq.s32.totalorder %s3565_s23, 0 }
  0x35   : > { %s4641_s7 = smov (%p46_p1, %s44_s7), 0  ;;  %p4550_p8 = scmp.eq.s32.totalorder %s3639_s24, 1 }
  0x36   : > { %4549 = sst [smem:[#allocation19_spill]] %s4641_s7  ;;  %p62_p6 = por %p61_p4, %p60_p2 }
  0x37   : > { %p3705_p10 = por %p4550_p8, %p60_p2  ;;  %s48_s10 = ssub.s32 %s3561_s22, %s4641_s7 }
  0x38   : > { %p3269_p12 = scmp.lt.s32.totalorder %s3565_s23, 2  ;;  %p51_p0 = scmp.eq.s32.totalorder %s48_s10, 0 }
  0x39   : > { %s4551_s9 = scalar_select %p3705_p10, 1, 0 }
  0x3a   : > { %s3713_s11 = sand.u32 1, %s3553_s20   ;;  %s3716_s30 = sshll.u32 %s3561_s22, 12 }
  0x3b   : > { %p3718_p3 = pnand %p3269_p12, %p62_p6  ;;  %s3729_s25 = scalar_lea.hbm %s4503_s0, %s3716_s30 }
  0x3c   : > { %s3723_s13 = scalar_select %p51_p0, %s3553_s20, %s53_s8  }
  0x3d   : > { %s4552_s12 = scalar_select %p3718_p3, 1, 0 }
  0x3e   : > { %4553 = sst [smem:[#allocation20_spill]] %s3723_s13  ;;  %s298_s29 = sand.u32 1, %s3565_s23  }
  0x3f   : > { %s4517_s10 = sshll.u32 %s3713_s11, 4  ;;  %s4554_s1 = sld [smem:[#allocation21_spill]] }
  0x40   : > { %s302_s7 = scalar_lea.vmem [#allocation5], %s4517_s10  ;;  %s3743_s8 = scalar_lea.sflag [#allocation6], %s298_s29 }
  0x41   : > { %s317_s22 = sshll.u32 %s302_s7, 4  ;;  %p3748_p7 = pneg %p3718_p3  ;;  %s3741_s22 = int_to_ptr.vmem [resolvable:$true] %s317_s22 }
  0x43   : > { %s4555_s15 = scalar_select %p3748_p7, 1, 0 }
  0x45   : > { %s2362_s3 = scalar_lea.hbm %s4554_s1, %s3716_s30  ;;  %s3361_s17 = scalar_lea.hbm %s4554_s1, 8192 }
  0x46   : > { %s3739_s27 = scalar_lea.hbm %s2362_s3, 256  ;;  %s3386_s14 = scalar_lea.hbm %s2362_s3, 512 }
  0x47   : > { %p3357_p5 = scmp.ne.s32.totalorder %s3739_s27, %s3386_s14  ;;  %p3362_p2 = scmp.lt.u32.totalorder %s3739_s27, %s4554_s1 }
  0x48   : > { %p3363_p4 = scmp.lt.u32.totalorder %s3361_s17, %s3386_s14  ;;  %p3365_p8 = scmp.lt.u32.totalorder %s3386_s14, %s3739_s27 }
  0x49   : > { %p3359_p9 = pnand %p3748_p7, %p3357_p5 }
  0x4a   : > { %p3364_p6 = por %p3363_p4, %p3362_p2 }
  0x4b   : > { %p3360_p1 = pneg %p3359_p9 }
  0x4c   : > { %p3366_p12 = por %p3365_p8, %p3364_p6 }
  0x4e   : > { %p3367_p0 = pnand %p3366_p12, %p3360_p1 }
  0x50   : > { %3370 = shalt.err (!%p3367_p0)
}
  0x51   : > { %s3371_s3 = scalar_lea.vmem %s3741_s22, 256  ;;  %s3570_s29 = smov [#allocation5]  }
  0x52   : > { %p3372_p5 = scmp.ne.s32.totalorder %s3741_s22, %s3371_s3  ;;  %s3376_s7 = sshll.u32 %s3570_s29, 4  ;;  %s3377_s7 = int_to_ptr.vmem [resolvable:$false] %s3376_s7 }
  0x53   : > { %s3378_s13 = scalar_lea.vmem %s3377_s7, 512  ;;  %p3379_p10 = scmp.lt.s32.totalorder %s3741_s22, %s3377_s7 }
  0x54   : > { %p3374_p9 = pnand %p3372_p5, %p3748_p7  ;;  %p3380_p11 = scmp.lt.s32.totalorder %s3378_s13, %s3371_s3 }
  0x56   : > { %p3375_p13 = pneg %p3374_p9  ;;  %p3381_p2 = por %p3380_p11, %p3379_p10 }
  0x58   : > { %p3382_p4 = pnand %p3381_p2, %p3375_p13 }
  0x5a   : > { %3385 = shalt.err (!%p3382_p4)
}
  0x5b   : > { %3259 = dma.hbm_to_vmem [thread:$0]  (!%p3718_p3), %s3739_s27, 256, %s3741_s22, %s3743_s8  }
  0x5c   : > { %s3571_s10 = smov [#allocation10]   ;;  %s2483_s16 = sshll.u32 %s3713_s11, 8 }
  0x5d   : > { %s263_s14 = sshll.u32 %s3571_s10, 4  ;;  %s3387_s7 = scalar_lea.hbm %s4507_s4, 32  ;;  %s264_s14 = int_to_ptr.vmem [resolvable:$true] %s263_s14 }
  0x5e   : > { %p3388_p11 = scmp.ne.s32.totalorder %s4507_s4, %s3387_s7  ;;  %p4556_p13 = scmp.ne.s32.totalorder %s4547_s6, 0 }
  0x5f   : > { %p3394_p8 = scmp.lt.u32.totalorder %s3387_s7, %s4507_s4 }
  0x60   : > { %p4557_p10 = pneg %p4556_p13 }
  0x62   : > { %p3390_p1 = pnand %p3388_p11, %p4557_p10 }
  0x64   : > { %p3391_p6 = pneg %p3390_p1 }
  0x66   : > { %p3396_p12 = pnand %p3394_p8, %p3391_p6 }
  0x68   : > { %3399 = shalt.err (!%p3396_p12)
}
  0x69   : > { %s3400_s22 = scalar_lea.vmem %s264_s14, 32  ;;  %p4558_p5 = pmov %p4557_p10 }
  0x6a   : > { %p3401_p0 = scmp.ne.s32.totalorder %s264_s14, %s3400_s22  ;;  %p3408_p4 = scmp.lt.s32.totalorder %s264_s14, %s264_s14 }
  0x6b   : > { %p3409_p3 = scmp.lt.s32.totalorder %s3400_s22, %s3400_s22 }
  0x6c   : > { %p3403_p9 = pnand %p3401_p0, %p4558_p5 }
  0x6d   : > { %p3410_p7 = por %p3409_p3, %p3408_p4 }
  0x6e   : > { %p3404_p2 = pneg %p3403_p9 }
  0x70   : > { %p3411_p10 = pnand %p3410_p7, %p3404_p2 }
  0x72   : > { %3414 = shalt.err (!%p3411_p10)
}
  0x73   : > { %3252 = dma.hbm_to_vmem [thread:$0]  (!%p4556_p13), %s4507_s4, 32, %s264_s14, [#allocation9]  }
  0x74   : > { %s2587_s1 = sadd.s32 3584, %s3716_s30  ;;  %s278_s20 = scalar_lea.vmem [#allocation2], %s2483_s16 }
  0x75   : > { %s288_s17 = sshll.u32 %s278_s20, 4  ;;  %s3797_s3 = scalar_lea.hbm %s4505_s2, %s2587_s1  ;;  %s3799_s17 = int_to_ptr.vmem [resolvable:$true] %s288_s17 }
  0x76   : > { %s4559_s6 = sshll.u32 %s3713_s11, 4  ;;  %s275_s27 = scalar_lea.sflag [#allocation3], %s3713_s11 }
  0x77   : > { %s3803_s13 = scalar_lea.vmem [#allocation7], %s4559_s6  ;;  %s3415_s10 = scalar_lea.hbm %s3729_s25, 4096 }
  0x78   : > { %s342_s22 = sshll.u32 %s3803_s13, 4  ;;  %p3416_p3 = scmp.ne.s32.totalorder %s3729_s25, %s3415_s10  ;;  %s343_s22 = int_to_ptr.vmem [resolvable:$true] %s342_s22 }
  0x79   : > { %p4560_p7 = scmp.ne.s32.totalorder %s4555_s15, 0  ;;  %s3420_s16 = scalar_lea.hbm %s4503_s0, 8192 }
  0x7a   : > { %p3421_p1 = scmp.lt.u32.totalorder %s3729_s25, %s4503_s0  ;;  %p3422_p6 = scmp.lt.u32.totalorder %s3420_s16, %s3415_s10 }
  0x7b   : > { %p3418_p11 = pnand %p3416_p3, %p4560_p7  ;;  %p3424_p12 = scmp.lt.u32.totalorder %s3415_s10, %s3729_s25 }
  0x7c   : > { %p3423_p8 = por %p3422_p6, %p3421_p1 }
  0x7d   : > { %p3419_p13 = pneg %p3418_p11 }
  0x7e   : > { %p3425_p0 = por %p3424_p12, %p3423_p8 }
  0x80   : > { %p3426_p5 = pnand %p3425_p0, %p3419_p13 }
  0x82   : > { %3429 = shalt.err (!%p3426_p5)
}
  0x83   : > { %s3430_s29 = scalar_lea.vmem %s3799_s17, 4096  ;;  %s3572_s7 = smov [#allocation2]  }
  0x84   : > { %p3431_p9 = scmp.ne.s32.totalorder %s3799_s17, %s3430_s29  ;;  %s3435_s6 = sshll.u32 %s3572_s7, 4  ;;  %s3436_s6 = int_to_ptr.vmem [resolvable:$false] %s3435_s6 }
  0x85   : > { %s3437_s30 = scalar_lea.vmem %s3436_s6, 8192  ;;  %p3438_p10 = scmp.lt.s32.totalorder %s3799_s17, %s3436_s6 }
  0x86   : > { %p3433_p2 = pnand %p3431_p9, %p4560_p7  ;;  %p3439_p3 = scmp.lt.s32.totalorder %s3437_s30, %s3430_s29 }
  0x88   : > { %p3434_p4 = pneg %p3433_p2  ;;  %p3440_p11 = por %p3439_p3, %p3438_p10 }
  0x8a   : > { %p3441_p1 = pnand %p3440_p11, %p3434_p4 }
  0x8c   : > { %3444 = shalt.err (!%p3441_p1)
}
  0x8d   : > { %p4561_p13 = scmp.ne.s32.totalorder %s4552_s12, 0  ;;  %s4562_s10 = smov 16  }
  0x8e   : > { %s4563_s14 = smov 256   ;;  %s3445_s16 = scalar_lea.hbm %s3797_s3, 256 }
  0x8f   : > { %3256 = dma.hbm_to_vmem [thread:$0]  (!%p4561_p13), %s3729_s25, 4096, %s3799_s17, %s275_s27, %s4563_s14, %s4563_s14, %s4562_s10  }
  0x90   : > { %p3446_p6 = scmp.ne.s32.totalorder %s3797_s3, %s3445_s16  ;;  %s3450_s11 = scalar_lea.hbm %s4505_s2, 8192 }
  0x91   : > { %p3451_p0 = scmp.lt.u32.totalorder %s3797_s3, %s4505_s2  ;;  %p3452_p5 = scmp.lt.u32.totalorder %s3450_s11, %s3445_s16 }
  0x92   : > { %p3448_p8 = pnand %p3446_p6, %p4560_p7  ;;  %p3454_p2 = scmp.lt.u32.totalorder %s3445_s16, %s3797_s3 }
  0x93   : > { %p3453_p9 = por %p3452_p5, %p3451_p0 }
  0x94   : > { %p3449_p12 = pneg %p3448_p8 }
  0x95   : > { %p3455_p4 = por %p3454_p2, %p3453_p9 }
  0x97   : > { %p3456_p10 = pnand %p3455_p4, %p3449_p12 }
  0x99   : > { %3459 = shalt.err (!%p3456_p10)
}
  0x9a   : > { %s3460_s25 = scalar_lea.vmem %s343_s22, 256  ;;  %s3573_s17 = smov [#allocation7]  }
  0x9b   : > { %p3461_p3 = scmp.ne.s32.totalorder %s343_s22, %s3460_s25  ;;  %s3465_s13 = sshll.u32 %s3573_s17, 4  ;;  %s3466_s13 = int_to_ptr.vmem [resolvable:$false] %s3465_s13 }
  0x9c   : > { %s3467_s27 = scalar_lea.vmem %s3466_s13, 512  ;;  %p3468_p6 = scmp.lt.s32.totalorder %s343_s22, %s3466_s13 }
  0x9d   : > { %p3463_p11 = pnand %p3461_p3, %p4560_p7  ;;  %p3469_p8 = scmp.lt.s32.totalorder %s3467_s27, %s3460_s25 }
  0x9f   : > { %p3464_p1 = pneg %p3463_p11  ;;  %p3470_p13 = por %p3469_p8, %p3468_p6 }
  0xa1   : > { %p3471_p0 = pnand %p3470_p13, %p3464_p1 }
  0xa3   : > { %3474 = shalt.err (!%p3471_p0)
}
  0xa4   : > { %p4564_p5 = scmp.ne.s32.totalorder %s4552_s12, 0  ;;  %p4565_p12 = scmp.ne.s32.totalorder %s4546_s28, 0 }
  0xa5   : > { %s3856_s15 = sand.u32 (!%p4565_p12), 1, %s3549_s19   ;;  %p4566_p7 = scmp.ne.s32.totalorder (!%p4565_p12), %s4543_s26, 0 }
  0xa6   : > { %3262 = dma.hbm_to_vmem [thread:$0]  (!%p4564_p5), %s3797_s3, 256, %s343_s22, %s3743_s8  }
  0xa7   : > { %351 = sbr.rel (%p4565_p12) target bundleno = 701 (0x2bd), region = 40  ;;  %s2493_s6 = sshll.u32 (!%p4565_p12), %s3856_s15, 8 }
  0xa8   : > { %s354_s30 = scalar_lea.sflag (!%p4565_p12), [#allocation3], %s3856_s15  ;;  %s3860_s10 = scalar_lea.vmem (!%p4565_p12), [#allocation2], %s2493_s6 }
  0xae   : > { %3528 = dma.done.wait (%p4566_p7), %s354_s30, 4096  }
  0xaf   : > { %3530 = vsyncadd (%p4566_p7), %s354_s30, 4294963200  ;;  %s362_s12 = sand.u32 1, %s3639_s24  }
  0xb0   : > { %s363_s28 = scalar_lea.sflag [#allocation6], %s362_s12 }
  0xb1   : > { %3532 = dma.done.wait (%p4566_p7), %s363_s28, 512  }
  0xb2   : > { %3534 = vsyncadd (%p4566_p7), %s363_s28, 4294966784  ;;  %p4567_p13 = scmp.eq.s32.totalorder %s3639_s24, 0 }
  0xb4   : > { %3536 = dma.done.wait (%p4567_p13), [#allocation9], 65568   ;;  %p4568_p9 = pmov %p4567_p13 }
  0xb5   : > { %v3574_v0 = vmov 0.0   ;;  %v850_v1 = vld [vmem:[#allocation8 + $0x8] sm:$0xff]  ;;  %v852_v2 = vld [vmem:[#allocation8 + $0x18] sm:$0xff]  ;;  %v849_v6 = vld [vmem:[#allocation8] sm:$0xff]  ;;  %vm4533_vm0 = vcmask 1040384   ;;  %vm4534_vm8 = vcmask 1046528  }
  0xb6   : > { %3538 = vsyncadd (%p4568_p9), [#allocation9], 4294901728  ;;  %1437 = vmatprep.mubr.f32.mxu1 %v3574_v0  ;;  %v1106_v3 = vld [vmem:[#allocation8 + $0x808] sm:$0xff]  ;;  %v2590_v4 = vpack.c.bf16 %v852_v2, %v850_v1  ;;  %v1108_v5 = vld [vmem:[#allocation8 + $0x818] sm:$0xff]  ;;  %s2498_s24 = sshll.u32 %s3856_s15, 7  ;;  %s2588_s8 = sshll.u32 %s3557_s21, 11 }
  0xb7   : > { %v851_v7 = vld [vmem:[#allocation8 + $0x10] sm:$0xff]  ;;  %v2846_v8 = vpack.c.bf16 %v1108_v5, %v1106_v3  ;;  %v1105_v10 = vld [vmem:[#allocation8 + $0x800] sm:$0xff]  ;;  %v854_v12 = vld [vmem:[#allocation8 + $0x28] sm:$0xff]  ;;  %s4415_s26 = scalar_lea.vmem [#allocation11], %s2498_s24  ;;  %s4450_s16 = scalar_lea.hbm %s4508_s5, %s2588_s8 }
  0xb8   : > { %v2592_v9 = vpack.c.bf16 %v851_v7, %v849_v6  ;;  %v1107_v11 = vld [vmem:[#allocation8 + $0x810] sm:$0xff]  ;;  %2591 = vmatprep.subr.bf16.mxu1 %v2590_v4  ;;  %v856_v14 = vld [vmem:[#allocation8 + $0x38] sm:$0xff]  ;;  %v1110_v15 = vld [vmem:[#allocation8 + $0x828] sm:$0xff]  ;;  %s2312_s3 = sshll.u32 %s4415_s26, 4  ;;  %s2294_s21 = scalar_lea.sflag [#allocation4], %s3856_s15  ;;  %s4452_s3 = int_to_ptr.vmem [resolvable:$true] %s2312_s3 }
  0xb9   : > { %v2848_v13 = vpack.c.bf16 %v1107_v11, %v1105_v10  ;;  %v1112_v16 = vld [vmem:[#allocation8 + $0x838] sm:$0xff]  ;;  %2847 = vmatprep.subr.bf16.mxu0 %v2846_v8  ;;  %v2594_v17 = vpack.c.bf16 %v856_v14, %v854_v12  ;;  %v853_v19 = vld [vmem:[#allocation8 + $0x20] sm:$0xff]  ;;  %v855_v20 = vld [vmem:[#allocation8 + $0x30] sm:$0xff]  ;;  %s3475_s20 = scalar_lea.vmem %s4452_s3, 2048  ;;  %p4630_p4 = scmp.ne.s32.totalorder %s4551_s9, 0 }
  0xba   : > { %2593 = vmatpush1.bf16.msra.mxu1 %v2592_v9  ;;  %v2850_v18 = vpack.c.bf16 %v1112_v16, %v1110_v15  ;;  %v1109_v21 = vld [vmem:[#allocation8 + $0x820] sm:$0xff]  ;;  %v2596_v22 = vpack.c.bf16 %v855_v20, %v853_v19  ;;  %v1111_v23 = vld [vmem:[#allocation8 + $0x830] sm:$0xff]  ;;  %v858_v24 = vld [vmem:[#allocation8 + $0x48] sm:$0xff]  ;;  %p3476_p2 = scmp.ne.s32.totalorder %s4452_s3, %s3475_s20  ;;  %s3575_s1 = smov [#allocation11]  }
  0xbb   : > { %2849 = vmatpush1.bf16.msra.mxu0 %v2848_v13  ;;  %v860_v25 = vld [vmem:[#allocation8 + $0x58] sm:$0xff]  ;;  %2595 = vmatprep.subr.bf16.mxu1 %v2594_v17  ;;  %v2852_v26 = vpack.c.bf16 %v1111_v23, %v1109_v21  ;;  %v1114_v28 = vld [vmem:[#allocation8 + $0x848] sm:$0xff]  ;;  %v857_v30 = vld [vmem:[#allocation8 + $0x40] sm:$0xff]  ;;  %s3479_s11 = sshll.u32 %s3575_s1, 4  ;;  %s3480_s11 = int_to_ptr.vmem [resolvable:$false] %s3479_s11 }
  0xbc   : > { %2851 = vmatprep.subr.bf16.mxu0 %v2850_v18  ;;  %v2598_v27 = vpack.c.bf16 %v860_v25, %v858_v24  ;;  %v1116_v29 = vld [vmem:[#allocation8 + $0x858] sm:$0xff]  ;;  %v859_v32 = vld [vmem:[#allocation8 + $0x50] sm:$0xff]  ;;  %v1113_v33 = vld [vmem:[#allocation8 + $0x840] sm:$0xff]  ;;  %p3477_p10 = pnand %p3476_p2, %p4630_p4  ;;  %s3481_s29 = scalar_lea.vmem %s3480_s11, 4096 }
  0xbd   : > { %v2854_v31 = vpack.c.bf16 %v1116_v29, %v1114_v28  ;;  %v1115_v34 = vld [vmem:[#allocation8 + $0x850] sm:$0xff]  ;;  %v2600_v35 = vpack.c.bf16 %v859_v32, %v857_v30  ;;  %v862_v36 = vld [vmem:[#allocation8 + $0x68] sm:$0xff]  ;;  %v864_v37 = vld [vmem:[#allocation8 + $0x78] sm:$0xff]  ;;  %p3482_p11 = scmp.lt.s32.totalorder %s4452_s3, %s3480_s11  ;;  %p3483_p1 = scmp.lt.s32.totalorder %s3481_s29, %s3475_s20 }
  0xbe   : > { %2597 = vmatpush1.bf16.msra.mxu1 %v2596_v22  ;;  %v1118_v38 = vld [vmem:[#allocation8 + $0x868] sm:$0xff]  ;;  %v2856_v39 = vpack.c.bf16 %v1115_v34, %v1113_v33  ;;  %v2602_v40 = vpack.c.bf16 %v864_v37, %v862_v36  ;;  %v1120_v41 = vld [vmem:[#allocation8 + $0x878] sm:$0xff]  ;;  %v861_v42 = vld [vmem:[#allocation8 + $0x60] sm:$0xff]  ;;  %p3478_p3 = pneg %p3477_p10 }
  0xbf   : > { %2853 = vmatpush1.bf16.msra.mxu0 %v2852_v26  ;;  %2599 = vmatprep.subr.bf16.mxu1 %v2598_v27  ;;  %v863_v43 = vld [vmem:[#allocation8 + $0x70] sm:$0xff]  ;;  %v2858_v44 = vpack.c.bf16 %v1120_v41, %v1118_v38  ;;  %v1117_v45 = vld [vmem:[#allocation8 + $0x860] sm:$0xff]  ;;  %v866_v47 = vld [vmem:[#allocation8 + $0x88] sm:$0xff]  ;;  %p3484_p6 = por %p3483_p1, %p3482_p11 }
  0xc0   : > { %2855 = vmatprep.subr.bf16.mxu0 %v2854_v31  ;;  %v1119_v46 = vld [vmem:[#allocation8 + $0x870] sm:$0xff]  ;;  %v868_v48 = vld [vmem:[#allocation8 + $0x98] sm:$0xff]  ;;  %v1122_v49 = vld [vmem:[#allocation8 + $0x888] sm:$0xff]  ;;  %v2604_v51 = vpack.c.bf16 %v863_v43, %v861_v42 }
  0xc1   : > { %v1124_v50 = vld [vmem:[#allocation8 + $0x898] sm:$0xff]  ;;  %v2860_v52 = vpack.c.bf16 %v1119_v46, %v1117_v45  ;;  %v2606_v53 = vpack.c.bf16 %v868_v48, %v866_v47  ;;  %v865_v54 = vld [vmem:[#allocation8 + $0x80] sm:$0xff]  ;;  %v867_v55 = vld [vmem:[#allocation8 + $0x90] sm:$0xff]  ;;  %p3485_p8 = pnand %p3484_p6, %p3478_p3 }
  0xc2   : > { %2601 = vmatpush1.bf16.msra.mxu1 %v2600_v35  ;;  %v1121_v56 = vld [vmem:[#allocation8 + $0x880] sm:$0xff]  ;;  %v2862_v57 = vpack.c.bf16 %v1124_v50, %v1122_v49  ;;  %v1123_v58 = vld [vmem:[#allocation8 + $0x890] sm:$0xff]  ;;  %v870_v59 = vld [vmem:[#allocation8 + $0xa8] sm:$0xff]  ;;  %v2608_v63 = vpack.c.bf16 %v867_v55, %v865_v54 }
  0xc3   : > { %2857 = vmatpush1.bf16.msra.mxu0 %v2856_v39  ;;  %2603 = vmatprep.subr.bf16.mxu1 %v2602_v40  ;;  %v872_v60 = vld [vmem:[#allocation8 + $0xb8] sm:$0xff]  ;;  %v1126_v61 = vld [vmem:[#allocation8 + $0x8a8] sm:$0xff]  ;;  %v2864_v1 = vpack.c.bf16 %v1123_v58, %v1121_v56  ;;  %v869_v3 = vld [vmem:[#allocation8 + $0xa0] sm:$0xff] }
  0xc4   : > { %2859 = vmatprep.subr.bf16.mxu0 %v2858_v44  ;;  %v1128_v62 = vld [vmem:[#allocation8 + $0x8b8] sm:$0xff]  ;;  %v2610_v2 = vpack.c.bf16 %v872_v60, %v870_v59  ;;  %v871_v4 = vld [vmem:[#allocation8 + $0xb0] sm:$0xff]  ;;  %v1125_v5 = vld [vmem:[#allocation8 + $0x8a0] sm:$0xff] }
  0xc5   : > { %v2866_v6 = vpack.c.bf16 %v1128_v62, %v1126_v61  ;;  %v1127_v7 = vld [vmem:[#allocation8 + $0x8b0] sm:$0xff]  ;;  %v874_v8 = vld [vmem:[#allocation8 + $0xc8] sm:$0xff]  ;;  %v876_v9 = vld [vmem:[#allocation8 + $0xd8] sm:$0xff]  ;;  %v2612_v12 = vpack.c.bf16 %v871_v4, %v869_v3 }
  0xc6   : > { %2605 = vmatpush1.bf16.msra.mxu1 %v2604_v51  ;;  %v1130_v10 = vld [vmem:[#allocation8 + $0x8c8] sm:$0xff]  ;;  %v1132_v11 = vld [vmem:[#allocation8 + $0x8d8] sm:$0xff]  ;;  %v2868_v13 = vpack.c.bf16 %v1127_v7, %v1125_v5  ;;  %v2614_v14 = vpack.c.bf16 %v876_v9, %v874_v8  ;;  %v873_v15 = vld [vmem:[#allocation8 + $0xc0] sm:$0xff] }
  0xc7   : > { %2861 = vmatpush1.bf16.msra.mxu0 %v2860_v52  ;;  %2607 = vmatprep.subr.bf16.mxu1 %v2606_v53  ;;  %v875_v16 = vld [vmem:[#allocation8 + $0xd0] sm:$0xff]  ;;  %v1129_v17 = vld [vmem:[#allocation8 + $0x8c0] sm:$0xff]  ;;  %v2870_v18 = vpack.c.bf16 %v1132_v11, %v1130_v10  ;;  %v878_v20 = vld [vmem:[#allocation8 + $0xe8] sm:$0xff] }
  0xc8   : > { %2863 = vmatprep.subr.bf16.mxu0 %v2862_v57  ;;  %v1131_v19 = vld [vmem:[#allocation8 + $0x8d0] sm:$0xff]  ;;  %v880_v21 = vld [vmem:[#allocation8 + $0xf8] sm:$0xff]  ;;  %v1134_v22 = vld [vmem:[#allocation8 + $0x8e8] sm:$0xff]  ;;  %v2616_v24 = vpack.c.bf16 %v875_v16, %v873_v15 }
  0xc9   : > { %v1136_v23 = vld [vmem:[#allocation8 + $0x8f8] sm:$0xff]  ;;  %v2872_v25 = vpack.c.bf16 %v1131_v19, %v1129_v17  ;;  %v2618_v26 = vpack.c.bf16 %v880_v21, %v878_v20  ;;  %v877_v27 = vld [vmem:[#allocation8 + $0xe0] sm:$0xff]  ;;  %v879_v28 = vld [vmem:[#allocation8 + $0xf0] sm:$0xff] }
  0xca   : > { %2609 = vmatpush1.bf16.msra.mxu1 %v2608_v63  ;;  %v1133_v29 = vld [vmem:[#allocation8 + $0x8e0] sm:$0xff]  ;;  %v2874_v30 = vpack.c.bf16 %v1136_v23, %v1134_v22  ;;  %v1135_v31 = vld [vmem:[#allocation8 + $0x8f0] sm:$0xff]  ;;  %v882_v32 = vld [vmem:[#allocation8 + $0x108] sm:$0xff]  ;;  %v2620_v36 = vpack.c.bf16 %v879_v28, %v877_v27 }
  0xcb   : > { %2865 = vmatpush1.bf16.msra.mxu0 %v2864_v1  ;;  %2611 = vmatprep.subr.bf16.mxu1 %v2610_v2  ;;  %v884_v33 = vld [vmem:[#allocation8 + $0x118] sm:$0xff]  ;;  %v1138_v34 = vld [vmem:[#allocation8 + $0x908] sm:$0xff]  ;;  %v2876_v37 = vpack.c.bf16 %v1135_v31, %v1133_v29  ;;  %v881_v39 = vld [vmem:[#allocation8 + $0x100] sm:$0xff] }
  0xcc   : > { %2867 = vmatprep.subr.bf16.mxu0 %v2866_v6  ;;  %v1140_v35 = vld [vmem:[#allocation8 + $0x918] sm:$0xff]  ;;  %v2622_v38 = vpack.c.bf16 %v884_v33, %v882_v32  ;;  %v883_v40 = vld [vmem:[#allocation8 + $0x110] sm:$0xff]  ;;  %v1137_v41 = vld [vmem:[#allocation8 + $0x900] sm:$0xff] }
  0xcd   : > { %v2878_v42 = vpack.c.bf16 %v1140_v35, %v1138_v34  ;;  %v1139_v43 = vld [vmem:[#allocation8 + $0x910] sm:$0xff]  ;;  %v886_v44 = vld [vmem:[#allocation8 + $0x128] sm:$0xff]  ;;  %v888_v45 = vld [vmem:[#allocation8 + $0x138] sm:$0xff]  ;;  %v2624_v48 = vpack.c.bf16 %v883_v40, %v881_v39 }
  0xce   : > { %2613 = vmatpush1.bf16.msra.mxu1 %v2612_v12  ;;  %v1142_v46 = vld [vmem:[#allocation8 + $0x928] sm:$0xff]  ;;  %v1144_v47 = vld [vmem:[#allocation8 + $0x938] sm:$0xff]  ;;  %v2880_v49 = vpack.c.bf16 %v1139_v43, %v1137_v41  ;;  %v2626_v50 = vpack.c.bf16 %v888_v45, %v886_v44  ;;  %v885_v51 = vld [vmem:[#allocation8 + $0x120] sm:$0xff] }
  0xcf   : > { %2869 = vmatpush1.bf16.msra.mxu0 %v2868_v13  ;;  %2615 = vmatprep.subr.bf16.mxu1 %v2614_v14  ;;  %v887_v52 = vld [vmem:[#allocation8 + $0x130] sm:$0xff]  ;;  %v1141_v53 = vld [vmem:[#allocation8 + $0x920] sm:$0xff]  ;;  %v2882_v54 = vpack.c.bf16 %v1144_v47, %v1142_v46  ;;  %v890_v56 = vld [vmem:[#allocation8 + $0x148] sm:$0xff]  ;;  %v434_v47 = vlaneseq }
  0xd0   : > { %2871 = vmatprep.subr.bf16.mxu0 %v2870_v18  ;;  %v1143_v55 = vld [vmem:[#allocation8 + $0x930] sm:$0xff]  ;;  %v892_v57 = vld [vmem:[#allocation8 + $0x158] sm:$0xff]  ;;  %v1146_v58 = vld [vmem:[#allocation8 + $0x948] sm:$0xff]  ;;  %v2628_v60 = vpack.c.bf16 %v887_v52, %v885_v51 }
  0xd1   : > { %v1148_v59 = vld [vmem:[#allocation8 + $0x958] sm:$0xff]  ;;  %v2884_v61 = vpack.c.bf16 %v1143_v55, %v1141_v53  ;;  %v2630_v62 = vpack.c.bf16 %v892_v57, %v890_v56  ;;  %v889_v63 = vld [vmem:[#allocation8 + $0x140] sm:$0xff]  ;;  %v891_v1 = vld [vmem:[#allocation8 + $0x150] sm:$0xff] }
  0xd2   : > { %2617 = vmatpush1.bf16.msra.mxu1 %v2616_v24  ;;  %v1145_v2 = vld [vmem:[#allocation8 + $0x940] sm:$0xff]  ;;  %v2886_v3 = vpack.c.bf16 %v1148_v59, %v1146_v58  ;;  %v1147_v4 = vld [vmem:[#allocation8 + $0x950] sm:$0xff]  ;;  %v894_v5 = vld [vmem:[#allocation8 + $0x168] sm:$0xff]  ;;  %v2632_v9 = vpack.c.bf16 %v891_v1, %v889_v63 }
  0xd3   : > { %2873 = vmatpush1.bf16.msra.mxu0 %v2872_v25  ;;  %2619 = vmatprep.subr.bf16.mxu1 %v2618_v26  ;;  %v896_v6 = vld [vmem:[#allocation8 + $0x178] sm:$0xff]  ;;  %v1150_v7 = vld [vmem:[#allocation8 + $0x968] sm:$0xff]  ;;  %v2888_v10 = vpack.c.bf16 %v1147_v4, %v1145_v2  ;;  %v893_v12 = vld [vmem:[#allocation8 + $0x160] sm:$0xff] }
  0xd4   : > { %2875 = vmatprep.subr.bf16.mxu0 %v2874_v30  ;;  %v1152_v8 = vld [vmem:[#allocation8 + $0x978] sm:$0xff]  ;;  %v2634_v11 = vpack.c.bf16 %v896_v6, %v894_v5  ;;  %v895_v13 = vld [vmem:[#allocation8 + $0x170] sm:$0xff]  ;;  %v1149_v14 = vld [vmem:[#allocation8 + $0x960] sm:$0xff] }
  0xd5   : > { %v2890_v15 = vpack.c.bf16 %v1152_v8, %v1150_v7  ;;  %v1151_v16 = vld [vmem:[#allocation8 + $0x970] sm:$0xff]  ;;  %v898_v17 = vld [vmem:[#allocation8 + $0x188] sm:$0xff]  ;;  %v900_v18 = vld [vmem:[#allocation8 + $0x198] sm:$0xff]  ;;  %v2636_v22 = vpack.c.bf16 %v895_v13, %v893_v12 }
  0xd6   : > { %2621 = vmatpush1.bf16.msra.mxu1 %v2620_v36  ;;  %v1154_v19 = vld [vmem:[#allocation8 + $0x988] sm:$0xff]  ;;  %v1156_v20 = vld [vmem:[#allocation8 + $0x998] sm:$0xff]  ;;  %v3877_v21 = vld [vmem:[%s3860_s10 + $0x10] sm:$0xff]  ;;  %v2892_v23 = vpack.c.bf16 %v1151_v16, %v1149_v14  ;;  %v2638_v24 = vpack.c.bf16 %v900_v18, %v898_v17 }
  0xd7   : > { %2877 = vmatpush1.bf16.msra.mxu0 %v2876_v37  ;;  %2623 = vmatprep.subr.bf16.mxu1 %v2622_v38  ;;  %v897_v25 = vld [vmem:[#allocation8 + $0x180] sm:$0xff]  ;;  %v899_v26 = vld [vmem:[#allocation8 + $0x190] sm:$0xff]  ;;  %v2894_v28 = vpack.c.bf16 %v1156_v20, %v1154_v19  ;;  %v902_v30 = vld [vmem:[#allocation8 + $0x1a8] sm:$0xff] }
  0xd8   : > { %2879 = vmatprep.subr.bf16.mxu0 %v2878_v42  ;;  %1889 = vmatprep.mubr.f32.mxu0 %v3877_v21  ;;  %v1153_v27 = vld [vmem:[#allocation8 + $0x980] sm:$0xff]  ;;  %v1155_v29 = vld [vmem:[#allocation8 + $0x990] sm:$0xff]  ;;  %v904_v31 = vld [vmem:[#allocation8 + $0x1b8] sm:$0xff]  ;;  %v2640_v34 = vpack.c.bf16 %v899_v26, %v897_v25 }
  0xd9   : > { %v1158_v32 = vld [vmem:[#allocation8 + $0x9a8] sm:$0xff]  ;;  %v1160_v33 = vld [vmem:[#allocation8 + $0x9b8] sm:$0xff]  ;;  %v2896_v35 = vpack.c.bf16 %v1155_v29, %v1153_v27  ;;  %v2642_v36 = vpack.c.bf16 %v904_v31, %v902_v30  ;;  %v901_v37 = vld [vmem:[#allocation8 + $0x1a0] sm:$0xff] }
  0xda   : > { %2625 = vmatpush1.bf16.msra.mxu1 %v2624_v48  ;;  %v903_v38 = vld [vmem:[#allocation8 + $0x1b0] sm:$0xff]  ;;  %v1157_v39 = vld [vmem:[#allocation8 + $0x9a0] sm:$0xff]  ;;  %v2898_v40 = vpack.c.bf16 %v1160_v33, %v1158_v32  ;;  %v906_v42 = vld [vmem:[#allocation8 + $0x1c8] sm:$0xff] }
  0xdb   : > { %2881 = vmatpush1.bf16.msra.mxu0 %v2880_v49  ;;  %2627 = vmatprep.subr.bf16.mxu1 %v2626_v50  ;;  %v1159_v41 = vld [vmem:[#allocation8 + $0x9b0] sm:$0xff]  ;;  %v908_v43 = vld [vmem:[#allocation8 + $0x1d8] sm:$0xff]  ;;  %v1162_v44 = vld [vmem:[#allocation8 + $0x9c8] sm:$0xff]  ;;  %v2644_v46 = vpack.c.bf16 %v903_v38, %v901_v37 }
  0xdc   : > { %2883 = vmatprep.subr.bf16.mxu0 %v2882_v54  ;;  %v1164_v45 = vld [vmem:[#allocation8 + $0x9d8] sm:$0xff]  ;;  %v2900_v48 = vpack.c.bf16 %v1159_v41, %v1157_v39  ;;  %v2646_v49 = vpack.c.bf16 %v908_v43, %v906_v42  ;;  %v905_v50 = vld [vmem:[#allocation8 + $0x1c0] sm:$0xff]  ;;  %v907_v51 = vld [vmem:[#allocation8 + $0x1d0] sm:$0xff] }
  0xdd   : > { %v1161_v52 = vld [vmem:[#allocation8 + $0x9c0] sm:$0xff]  ;;  %v2902_v53 = vpack.c.bf16 %v1164_v45, %v1162_v44  ;;  %v1163_v54 = vld [vmem:[#allocation8 + $0x9d0] sm:$0xff]  ;;  %v910_v55 = vld [vmem:[#allocation8 + $0x1e8] sm:$0xff]  ;;  %v2648_v59 = vpack.c.bf16 %v907_v51, %v905_v50 }
  0xde   : > { %2629 = vmatpush1.bf16.msra.mxu1 %v2628_v60  ;;  %v912_v56 = vld [vmem:[#allocation8 + $0x1f8] sm:$0xff]  ;;  %v1166_v57 = vld [vmem:[#allocation8 + $0x9e8] sm:$0xff]  ;;  %v909_v60 = vld [vmem:[#allocation8 + $0x1e0] sm:$0xff] }
  0xdf   : > { %2885 = vmatpush1.bf16.msra.mxu0 %v2884_v61  ;;  %2631 = vmatprep.subr.bf16.mxu1 %v2630_v62  ;;  %v1168_v58 = vld [vmem:[#allocation8 + $0x9f8] sm:$0xff]  ;;  %v3880_v61 = vshrl.u32 %v434_v47, 7  ;;  %v2904_v62 = vpack.c.bf16 %v1163_v54, %v1161_v52  ;;  %v2650_v63 = vpack.c.bf16 %v912_v56, %v910_v55  ;;  %v911_v1 = vld [vmem:[#allocation8 + $0x1f0] sm:$0xff]  ;;  %v1165_v2 = vld [vmem:[#allocation8 + $0x9e0] sm:$0xff] }
  0xe0   : > { %2887 = vmatprep.subr.bf16.mxu0 %v2886_v3  ;;  %v1167_v3 = vld [vmem:[#allocation8 + $0x9f0] sm:$0xff]  ;;  %v2906_v4 = vpack.c.bf16 %v1168_v58, %v1166_v57  ;;  %v914_v5 = vld [vmem:[#allocation8 + $0x208] sm:$0xff]  ;;  %v916_v6 = vld [vmem:[#allocation8 + $0x218] sm:$0xff] }
  0xe1   : > { %v3883_v7 = vld [vmem:[%s3860_s10 + $0x18] sm:$0xff]  ;;  %v1170_v8 = vld [vmem:[#allocation8 + $0xa08] sm:$0xff]  ;;  %v447_v12 = vand.u32 7, %v3880_v61  ;;  %v3890_v13 = vadd.s32 8, %v3880_v61  ;;  %v2908_v14 = vpack.c.bf16 %v1167_v3, %v1165_v2  ;;  %v913_v16 = vld [vmem:[#allocation8 + $0x200] sm:$0xff]  ;;  %v3905_v31 = vadd.s32 16, %v3880_v61 }
  0xe2   : > { %2633 = vmatpush1.bf16.msra.mxu1 %v2632_v9  ;;  %v1172_v9 = vld [vmem:[#allocation8 + $0xa18] sm:$0xff]  ;;  %v915_v17 = vld [vmem:[#allocation8 + $0x210] sm:$0xff]  ;;  %v3893_v18 = vrot.slane %v3883_v7, 7  ;;  %v1169_v19 = vld [vmem:[#allocation8 + $0xa00] sm:$0xff]  ;;  %v3913_v44 = vadd.s32 24, %v3880_v61 }
  0xe3   : > { %2889 = vmatpush1.bf16.msra.mxu0 %v2888_v10  ;;  %2635 = vmatprep.subr.bf16.mxu1 %v2634_v11  ;;  %v3886_v10 = vrot.slane %v3574_v0, 7  ;;  %v2652_v11 = vpack.c.bf16 %v911_v1, %v909_v60  ;;  %v2910_v20 = vpack.c.bf16 %v1172_v9, %v1170_v8  ;;  %v1174_v26 = vld [vmem:[#allocation8 + $0xa28] sm:$0xff]  ;;  %v1176_v27 = vld [vmem:[#allocation8 + $0xa38] sm:$0xff]  ;;  %vm3899_vm1 = vcmp.ge.s32.totalorder %v447_v12, 1  ;;  %v1173_v37 = vld [vmem:[#allocation8 + $0xa20] sm:$0xff] }
  0xe4   : > { %2891 = vmatprep.subr.bf16.mxu0 %v2890_v15  ;;  %v2654_v15 = vpack.c.bf16 %v916_v6, %v914_v5  ;;  %v2656_v29 = vpack.c.bf16 %v915_v17, %v913_v16  ;;  %v454_v30 = vand.u32 7, %v3890_v13  ;;  %v798_v32 = vsel %vm4533_vm0, %v3883_v7, %v3893_v18  ;;  %v1175_v39 = vld [vmem:[#allocation8 + $0xa30] sm:$0xff]  ;;  %v924_v41 = vld [vmem:[#allocation8 + $0x258] sm:$0xff]  ;;  %v1178_v42 = vld [vmem:[#allocation8 + $0xa48] sm:$0xff] }
  0xe5   : > { %v631_v25 = vsel %vm4533_vm0, 0.0, %v3886_v10  ;;  %v2914_v38 = vpack.c.bf16 %v1176_v27, %v1174_v26  ;;  %v1180_v43 = vld [vmem:[#allocation8 + $0xa58] sm:$0xff]  ;;  %v3918_v47 = vld [vmem:[%s3860_s10 + $0x30] sm:$0xff]  ;;  %v4532_v50 = vand.u32 7, %v3905_v31  ;;  %v2916_v51 = vpack.c.bf16 %v1175_v39, %v1173_v37  ;;  %v1177_v54 = vld [vmem:[#allocation8 + $0xa40] sm:$0xff] }
  0xe6   : > { %2637 = vmatpush1.bf16.msra.mxu1 %v2636_v22  ;;  %v1171_v22 = vld [vmem:[#allocation8 + $0xa10] sm:$0xff]  ;;  %vm3922_vm2 = vcmp.ge.s32.totalorder %v454_v30, 1  ;;  %v3931_v55 = vld [vmem:[%s3860_s10 + $0x38] sm:$0xff]  ;;  %v2918_v56 = vpack.c.bf16 %v1180_v43, %v1178_v42  ;;  %v926_v58 = vld [vmem:[#allocation8 + $0x268] sm:$0xff]  ;;  %v3939_v1 = vadd.s32 32, %v3880_v61  ;;  %v4531_v8 = vand.u32 7, %v3913_v44 }
  0xe7   : > { %2893 = vmatpush1.bf16.msra.mxu0 %v2892_v23  ;;  %2639 = vmatprep.subr.bf16.mxu1 %v2638_v24  ;;  %v918_v23 = vld [vmem:[#allocation8 + $0x228] sm:$0xff]  ;;  %v920_v24 = vld [vmem:[#allocation8 + $0x238] sm:$0xff]  ;;  %v2912_v33 = vpack.c.bf16 %v1171_v22, %v1169_v19  ;;  %v1179_v57 = vld [vmem:[#allocation8 + $0xa50] sm:$0xff]  ;;  %v611_v60 = vrot.slane %v3931_v55, 7  ;;  %vm3949_vm3 = vcmp.ge.s32.totalorder %v4532_v50, 1  ;;  %vm4078_vm10 = vcmp.le.s32.totalorder %v447_v12, 6 }
  0xe8   : > { %2895 = vmatprep.subr.bf16.mxu0 %v2894_v28  ;;  %v925_v3 = vld [vmem:[#allocation8 + $0x260] sm:$0xff]  ;;  %v3945_v5 = vld [vmem:[%s3860_s10 + $0x50] sm:$0xff]  ;;  %v2920_v9 = vpack.c.bf16 %v1179_v57, %v1177_v54  ;;  %v3955_v16 = vld [vmem:[%s3860_s10 + $0x58] sm:$0xff]  ;;  %vm3973_vm4 = vcmp.ge.s32.totalorder %v4531_v8, 1  ;;  %vm4106_vm11 = vcmp.le.s32.totalorder %v454_v30, 6 }
  0xe9   : > { %v930_v19 = vld [vmem:[#allocation8 + $0x288] sm:$0xff]  ;;  %v613_v22 = vrot.slane %v3955_v16, 7  ;;  %v929_v37 = vld [vmem:[#allocation8 + $0x280] sm:$0xff]  ;;  %v1187_v42 = vld [vmem:[#allocation8 + $0xa90] sm:$0xff] }
  0xea   : > { %2641 = vmatpush1.bf16.msra.mxu1 %v2640_v34  ;;  %v2658_v34 = vpack.c.bf16 %v920_v24, %v918_v23  ;;  %v1186_v23 = vld [vmem:[#allocation8 + $0xa88] sm:$0xff]  ;;  %v1188_v24 = vld [vmem:[#allocation8 + $0xa98] sm:$0xff]  ;;  %v1185_v39 = vld [vmem:[#allocation8 + $0xa80] sm:$0xff] }
  0xeb   : > { %2897 = vmatpush1.bf16.msra.mxu0 %v2896_v35  ;;  %2643 = vmatprep.subr.bf16.mxu1 %v2642_v36  ;;  %v917_v35 = vld [vmem:[#allocation8 + $0x220] sm:$0xff]  ;;  %v919_v36 = vld [vmem:[#allocation8 + $0x230] sm:$0xff]  ;;  %v614_v27 = vsel %vm4533_vm0, %v611_v60, %v613_v22  ;;  %v934_v43 = vld [vmem:[#allocation8 + $0x2a8] sm:$0xff] }
  0xec   : > { %2899 = vmatprep.subr.bf16.mxu0 %v2898_v40  ;;  %v922_v40 = vld [vmem:[#allocation8 + $0x248] sm:$0xff]  ;;  %v2660_v45 = vpack.c.bf16 %v919_v36, %v917_v35  ;;  %v987_v13 = vld [vmem:[#allocation8 + $0x450] sm:$0xff]  ;;  %v1241_v30 = vld [vmem:[#allocation8 + $0xc40] sm:$0xff] }
  0xed   : > { %v2662_v52 = vpack.c.bf16 %v924_v41, %v922_v40  ;;  %v2926_v41 = vpack.c.bf16 %v1188_v24, %v1186_v23  ;;  %v937_v23 = vld [vmem:[#allocation8 + $0x2c0] sm:$0xff]  ;;  %v4020_v24 = vld [vmem:[%s3860_s10 + $0xb0] sm:$0xff]  ;;  %v1064_v6 = vld [vmem:[#allocation8 + $0x6b8] sm:$0xff] }
  0xee   : > { %2645 = vmatpush1.bf16.msra.mxu1 %v2644_v46  ;;  %v921_v46 = vld [vmem:[#allocation8 + $0x240] sm:$0xff]  ;;  %v1072_v57 = vld [vmem:[#allocation8 + $0x6f8] sm:$0xff] }
  0xef   : > { %2901 = vmatpush1.bf16.msra.mxu0 %v2900_v48  ;;  %2647 = vmatprep.subr.bf16.mxu1 %v2646_v49  ;;  %v610_v49 = vsel %vm4533_vm0, %v3886_v10, %v3893_v18  ;;  %v1060_v48 = vld [vmem:[#allocation8 + $0x698] sm:$0xff] }
  0xf0   : > { %2903 = vmatprep.subr.bf16.mxu0 %v2902_v53  ;;  %v923_v53 = vld [vmem:[#allocation8 + $0x250] sm:$0xff] }
  0xf1   : > { %v2664_v2 = vpack.c.bf16 %v923_v53, %v921_v46  ;;  %v1190_v46 = vld [vmem:[#allocation8 + $0xaa8] sm:$0xff]  ;;  %v3992_v53 = vadd.s32 48, %v3880_v61 }
  0xf2   : > { %2649 = vmatpush1.bf16.msra.mxu1 %v2648_v59  ;;  %v928_v59 = vld [vmem:[#allocation8 + $0x278] sm:$0xff] }
  0xf3   : > { %2905 = vmatpush1.bf16.msra.mxu0 %v2904_v62  ;;  %2651 = vmatprep.subr.bf16.mxu1 %v2650_v63  ;;  %v1182_v62 = vld [vmem:[#allocation8 + $0xa68] sm:$0xff]  ;;  %v1184_v63 = vld [vmem:[#allocation8 + $0xa78] sm:$0xff] }
  0xf4   : > { %2907 = vmatprep.subr.bf16.mxu0 %v2906_v4  ;;  %v612_v4 = vsel %vm4533_vm0, %v3893_v18, %v611_v60  ;;  %v2922_v17 = vpack.c.bf16 %v1184_v63, %v1182_v62  ;;  %v1183_v18 = vld [vmem:[#allocation8 + $0xa70] sm:$0xff]  ;;  %v2928_v60 = vpack.c.bf16 %v1187_v42, %v1185_v39  ;;  %v933_v63 = vld [vmem:[#allocation8 + $0x2a0] sm:$0xff]  ;;  %v942_v42 = vld [vmem:[#allocation8 + $0x2e8] sm:$0xff] }
  0xf5   : > { %v1193_v39 = vld [vmem:[#allocation8 + $0xac0] sm:$0xff] }
  0xf6   : > { %2653 = vmatpush1.bf16.msra.mxu1 %v2652_v11  ;;  %v2666_v11 = vpack.c.bf16 %v928_v59, %v926_v58 }
  0xf7   : > { %2909 = vmatpush1.bf16.msra.mxu0 %v2908_v14  ;;  %2655 = vmatprep.subr.bf16.mxu1 %v2654_v15  ;;  %v927_v14 = vld [vmem:[#allocation8 + $0x270] sm:$0xff]  ;;  %v1181_v15 = vld [vmem:[#allocation8 + $0xa60] sm:$0xff] }
  0xf8   : > { %2911 = vmatprep.subr.bf16.mxu0 %v2910_v20  ;;  %v932_v20 = vld [vmem:[#allocation8 + $0x298] sm:$0xff]  ;;  %v2668_v26 = vpack.c.bf16 %v927_v14, %v925_v3  ;;  %v2924_v35 = vpack.c.bf16 %v1183_v18, %v1181_v15  ;;  %v1189_v3 = vld [vmem:[#allocation8 + $0xaa0] sm:$0xff]  ;;  %v1194_v15 = vld [vmem:[#allocation8 + $0xac8] sm:$0xff] }
  0xf9   : > { %2515 = vmatmul.mubr.msk.f32.vlgmr.msra.gmra.mrb[0].mxu1 %vm3899_vm1, %v631_v25  ;;  %v3964_v25 = vadd.s32 40, %v3880_v61  ;;  %v2670_v36 = vpack.c.bf16 %v932_v20, %v930_v19  ;;  %v940_v14 = vld [vmem:[#allocation8 + $0x2d8] sm:$0xff]  ;;  %v4016_v20 = vadd.s32 56, %v3880_v61 }
  0xfa   : > { %2657 = vmatpush1.bf16.msra.mxu1 %v2656_v29  ;;  %2547 = vmatmul.mubr.msk.f32.vlgmr.msra.gmra.mrb[0].mxu0 %vm3899_vm1, %v798_v32  ;;  %v3969_v29 = vld [vmem:[%s3860_s10 + $0x70] sm:$0xff]  ;;  %v4013_v19 = vld [vmem:[%s3860_s10 + $0xb8] sm:$0xff] }
  0xfb   : > { %2913 = vmatpush1.bf16.msra.mxu0 %v2912_v33  ;;  %2659 = vmatprep.subr.bf16.mxu1 %v2658_v34  ;;  %v3978_v33 = vld [vmem:[%s3860_s10 + $0x78] sm:$0xff]  ;;  %v4530_v34 = vand.u32 7, %v3939_v1  ;;  %v4529_v59 = vand.u32 7, %v3964_v25 }
  0xfc   : > { %2915 = vmatprep.subr.bf16.mxu0 %v2914_v38  ;;  %1443 = vmatprep.mubr.f32.mxu1 %v3877_v21  ;;  %v931_v38 = vld [vmem:[#allocation8 + $0x290] sm:$0xff]  ;;  %v615_v40 = vrot.slane %v3978_v33, 7  ;;  %v1068_v32 = vld [vmem:[#allocation8 + $0x6d8] sm:$0xff] }
  0xfd   : > { %1895 = vmatprep.mubr.f32.mxu0 %v3918_v47  ;;  %2516 = vmatmul.mubr.msk.f32.gmra.mrb[2].mxu1 %vm3922_vm2, %v610_v49  ;;  %v1192_v49 = vld [vmem:[#allocation8 + $0xab8] sm:$0xff]  ;;  %v2672_v54 = vpack.c.bf16 %v931_v38, %v929_v37  ;;  %vm4000_vm5 = vcmp.ge.s32.totalorder %v4530_v34, 1  ;;  %vm4024_vm6 = vcmp.ge.s32.totalorder %v4529_v59, 1  ;;  %v939_v38 = vld [vmem:[#allocation8 + $0x2d0] sm:$0xff]  ;;  %v950_v59 = vld [vmem:[#allocation8 + $0x328] sm:$0xff] }
  0xfe   : > { %2661 = vmatpush1.bf16.msra.mxu1 %v2660_v45  ;;  %1449 = vmatprep.mubr.f32.mxu1 %v3918_v47  ;;  %v936_v45 = vld [vmem:[#allocation8 + $0x2b8] sm:$0xff]  ;;  %v1205_v34 = vld [vmem:[#allocation8 + $0xb20] sm:$0xff] }
  0xff   : > { %2917 = vmatpush1.bf16.msra.mxu0 %v2916_v51  ;;  %2663 = vmatprep.subr.bf16.mxu1 %v2662_v52  ;;  %v616_v51 = vsel %vm4533_vm0, %v613_v22, %v615_v40  ;;  %v3989_v52 = vld [vmem:[%s3860_s10 + $0x98] sm:$0xff]  ;;  %v2674_v62 = vpack.c.bf16 %v936_v45, %v934_v43 }
 0x100   : > { %2919 = vmatprep.subr.bf16.mxu0 %v2918_v56  ;;  %2548 = vmatmul.mubr.msk.f32.gmra.mrb[2].mxu0 %vm3922_vm2, %v612_v4  ;;  %v3996_v56 = vld [vmem:[%s3860_s10 + $0x90] sm:$0xff]  ;;  %v617_v58 = vrot.slane %v3989_v52, 7  ;;  %v944_v43 = vld [vmem:[#allocation8 + $0x2f8] sm:$0xff] }
 0x101   : > { %1901 = vmatprep.mubr.f32.mxu0 %v3945_v5  ;;  %2517 = vmatmul.mubr.msk.f32.gmra.mrb[4].mxu1 %vm3949_vm3, %v612_v4  ;;  %v2930_v4 = vpack.c.bf16 %v1192_v49, %v1190_v46  ;;  %v4033_v45 = vld [vmem:[%s3860_s10 + $0xd8] sm:$0xff]  ;;  %v1198_v46 = vld [vmem:[#allocation8 + $0xae8] sm:$0xff] }
 0x102   : > { %2665 = vmatpush1.bf16.msra.mxu1 %v2664_v2  ;;  %1455 = vmatprep.mubr.f32.mxu1 %v3945_v5  ;;  %v935_v2 = vld [vmem:[#allocation8 + $0x2b0] sm:$0xff]  ;;  %v618_v18 = vsel %vm4533_vm0, %v615_v40, %v617_v58  ;;  %v1200_v49 = vld [vmem:[#allocation8 + $0xaf8] sm:$0xff] }
 0x103   : > { %2921 = vmatpush1.bf16.msra.mxu0 %v2920_v9  ;;  %2667 = vmatprep.subr.bf16.mxu1 %v2666_v11  ;;  %v1191_v9 = vld [vmem:[#allocation8 + $0xab0] sm:$0xff]  ;;  %v938_v11 = vld [vmem:[#allocation8 + $0x2c8] sm:$0xff]  ;;  %v2676_v22 = vpack.c.bf16 %v935_v2, %v933_v63  ;;  %v1336_v2 = vld [vmem:[#allocation8 + $0xf38] sm:$0xff] }
 0x104   : > { %2923 = vmatprep.subr.bf16.mxu0 %v2922_v17  ;;  %2549 = vmatmul.mubr.msk.f32.gmra.mrb[4].mxu0 %vm3949_vm3, %v614_v27  ;;  %v1196_v17 = vld [vmem:[#allocation8 + $0xad8] sm:$0xff]  ;;  %v2678_v37 = vpack.c.bf16 %v940_v14, %v938_v11  ;;  %v1195_v40 = vld [vmem:[#allocation8 + $0xad0] sm:$0xff]  ;;  %v1197_v14 = vld [vmem:[#allocation8 + $0xae0] sm:$0xff] }
 0x105   : > { %1907 = vmatprep.mubr.f32.mxu0 %v3969_v29  ;;  %2518 = vmatmul.mubr.msk.f32.gmra.mrb[6].mxu1 %vm3973_vm4, %v614_v27  ;;  %v619_v27 = vrot.slane %v4013_v19, 7  ;;  %v4042_v63 = vld [vmem:[%s3860_s10 + $0xd0] sm:$0xff] }
 0x106   : > { %2669 = vmatpush1.bf16.msra.mxu1 %v2668_v26  ;;  %1461 = vmatprep.mubr.f32.mxu1 %v3969_v29  ;;  %v943_v11 = vld [vmem:[#allocation8 + $0x2f0] sm:$0xff] }
 0x107   : > { %2925 = vmatpush1.bf16.msra.mxu0 %v2924_v35  ;;  %2671 = vmatprep.subr.bf16.mxu1 %v2670_v36  ;;  %v4528_v35 = vand.u32 7, %v3992_v53  ;;  %v2932_v36 = vpack.c.bf16 %v1191_v9, %v1189_v3  ;;  %v4527_v3 = vand.u32 7, %v4016_v20  ;;  %v2682_v9 = vpack.c.bf16 %v944_v43, %v942_v42  ;;  %v4068_v42 = vld [vmem:[%s3860_s10 + $0xf0] sm:$0xff]  ;;  %v1338_v43 = vld [vmem:[#allocation8 + $0xf48] sm:$0xff] }
 0x108   : > { %2927 = vmatprep.subr.bf16.mxu0 %v2926_v41  ;;  %2550 = vmatmul.mubr.msk.f32.gmra.mrb[6].mxu0 %vm3973_vm4, %v616_v51  ;;  %v2934_v41 = vpack.c.bf16 %v1196_v17, %v1194_v15  ;;  %v4053_v15 = vld [vmem:[%s3860_s10 + $0xf8] sm:$0xff]  ;;  %v4056_v17 = vrot.slane %v3574_v0, 1 }
 0x109   : > { %1913 = vmatprep.mubr.f32.mxu0 %v3996_v56  ;;  %2519 = vmatmul.mubr.msk.f32.gmra.mrb[8].mxu1 %vm4000_vm5, %v616_v51  ;;  %v620_v51 = vsel %vm4533_vm0, %v617_v58, %v619_v27  ;;  %vm4046_vm7 = vcmp.ge.s32.totalorder %v4528_v35, 1  ;;  %v642_v58 = vrot.slane %v3877_v21, 1  ;;  %v1202_v21 = vld [vmem:[#allocation8 + $0xb08] sm:$0xff]  ;;  %vm4072_vm9 = vcmp.ge.s32.totalorder %v4527_v3, 1  ;;  %v1203_v35 = vld [vmem:[#allocation8 + $0xb10] sm:$0xff] }
 0x10a   : > { %2673 = vmatpush1.bf16.msra.mxu1 %v2672_v54  ;;  %1467 = vmatprep.mubr.f32.mxu1 %v3996_v56  ;;  %v621_v54 = vrot.slane %v4033_v45, 7 }
 0x10b   : > { %2929 = vmatpush1.bf16.msra.mxu0 %v2928_v60  ;;  %2675 = vmatprep.subr.bf16.mxu1 %v2674_v62  ;;  %v2680_v60 = vpack.c.bf16 %v939_v38, %v937_v23  ;;  %v941_v62 = vld [vmem:[#allocation8 + $0x2e0] sm:$0xff]  ;;  %v946_v23 = vld [vmem:[#allocation8 + $0x308] sm:$0xff]  ;;  %v948_v38 = vld [vmem:[#allocation8 + $0x318] sm:$0xff] }
 0x10c   : > { %2931 = vmatprep.subr.bf16.mxu0 %v2930_v4  ;;  %2551 = vmatmul.mubr.msk.f32.gmra.mrb[8].mxu0 %vm4000_vm5, %v618_v18  ;;  %v2936_v4 = vpack.c.bf16 %v1195_v40, %v1193_v39  ;;  %v794_v39 = vrot.slane %v4053_v15, 7  ;;  %v2684_v40 = vpack.c.bf16 %v943_v11, %v941_v62  ;;  %v643_v11 = vsel %vm4534_vm8, %v4056_v17, %v642_v58 }
 0x10d   : > { %1919 = vmatprep.mubr.f32.mxu0 %v4020_v24  ;;  %2520 = vmatmul.mubr.msk.f32.gmra.mrb[10].mxu1 %vm4024_vm6, %v618_v18  ;;  %v2938_v18 = vpack.c.bf16 %v1200_v49, %v1198_v46  ;;  %v945_v49 = vld [vmem:[#allocation8 + $0x300] sm:$0xff] }
 0x10e   : > { %2677 = vmatpush1.bf16.msra.mxu1 %v2676_v22  ;;  %1473 = vmatprep.mubr.f32.mxu1 %v4020_v24  ;;  %v1199_v22 = vld [vmem:[#allocation8 + $0xaf0] sm:$0xff]  ;;  %v795_v12 = vsel %vm4533_vm0, %v621_v54, %v794_v39  ;;  %v954_v39 = vld [vmem:[#allocation8 + $0x348] sm:$0xff] }
 0x10f   : > { %2933 = vmatpush1.bf16.msra.mxu0 %v2932_v36  ;;  %2679 = vmatprep.subr.bf16.mxu1 %v2678_v37  ;;  %v1204_v36 = vld [vmem:[#allocation8 + $0xb18] sm:$0xff]  ;;  %v622_v37 = vsel %vm4533_vm0, %v619_v27, %v621_v54  ;;  %v2940_v46 = vpack.c.bf16 %v1199_v22, %v1197_v14  ;;  %v2686_v27 = vpack.c.bf16 %v948_v38, %v946_v23  ;;  %v1207_v54 = vld [vmem:[#allocation8 + $0xb30] sm:$0xff] }
 0x110   : > { %2935 = vmatprep.subr.bf16.mxu0 %v2934_v41  ;;  %2552 = vmatmul.mubr.msk.f32.gmra.mrb[10].mxu0 %vm4024_vm6, %v620_v51  ;;  %v644_v41 = vrot.slane %v3918_v47, 1  ;;  %v2942_v3 = vpack.c.bf16 %v1204_v36, %v1202_v21  ;;  %v1208_v14 = vld [vmem:[#allocation8 + $0xb38] sm:$0xff]  ;;  %v949_v21 = vld [vmem:[#allocation8 + $0x320] sm:$0xff]  ;;  %v951_v36 = vld [vmem:[#allocation8 + $0x330] sm:$0xff] }
 0x111   : > { %1925 = vmatprep.mubr.f32.mxu0 %v4042_v63  ;;  %2521 = vmatmul.mubr.msk.f32.gmra.mrb[12].mxu1 %vm4046_vm7, %v620_v51  ;;  %v947_v51 = vld [vmem:[#allocation8 + $0x310] sm:$0xff]  ;;  %v1248_v47 = vld [vmem:[#allocation8 + $0xc78] sm:$0xff] }
 0x112   : > { %2681 = vmatpush1.bf16.msra.mxu1 %v2680_v60  ;;  %1479 = vmatprep.mubr.f32.mxu1 %v4042_v63  ;;  %v1201_v60 = vld [vmem:[#allocation8 + $0xb00] sm:$0xff]  ;;  %v2688_v22 = vpack.c.bf16 %v947_v51, %v945_v49  ;;  %v1210_v49 = vld [vmem:[#allocation8 + $0xb48] sm:$0xff]  ;;  %v1212_v51 = vld [vmem:[#allocation8 + $0xb58] sm:$0xff] }
 0x113   : > { %2937 = vmatpush1.bf16.msra.mxu0 %v2936_v4  ;;  %2683 = vmatprep.subr.bf16.mxu1 %v2682_v9  ;;  %v952_v4 = vld [vmem:[#allocation8 + $0x338] sm:$0xff]  ;;  %v1206_v9 = vld [vmem:[#allocation8 + $0xb28] sm:$0xff]  ;;  %v2944_v23 = vpack.c.bf16 %v1203_v35, %v1201_v60  ;;  %v2692_v35 = vpack.c.bf16 %v951_v36, %v949_v21  ;;  %v2950_v60 = vpack.c.bf16 %v1212_v51, %v1210_v49 }
 0x114   : > { %2939 = vmatprep.subr.bf16.mxu0 %v2938_v18  ;;  %2553 = vmatmul.mubr.msk.f32.gmra.mrb[12].mxu0 %vm4046_vm7, %v622_v37  ;;  %v4095_v18 = vsel %vm4534_vm8, %v642_v58, %v644_v41  ;;  %v2690_v38 = vpack.c.bf16 %v952_v4, %v950_v59  ;;  %v2948_v59 = vpack.c.bf16 %v1207_v54, %v1205_v34  ;;  %v958_v4 = vld [vmem:[#allocation8 + $0x368] sm:$0xff]  ;;  %v1213_v34 = vld [vmem:[#allocation8 + $0xb60] sm:$0xff]  ;;  %v1215_v54 = vld [vmem:[#allocation8 + $0xb70] sm:$0xff] }
 0x115   : > { %1931 = vmatprep.mubr.f32.mxu0 %v4068_v42  ;;  %2522 = vmatmul.mubr.msk.f32.gmra.mrb[14].mxu1 %vm4072_vm9, %v622_v37  ;;  %v2946_v37 = vpack.c.bf16 %v1208_v14, %v1206_v9  ;;  %v960_v9 = vld [vmem:[#allocation8 + $0x378] sm:$0xff]  ;;  %v1214_v14 = vld [vmem:[#allocation8 + $0xb68] sm:$0xff] }
 0x116   : > { %2685 = vmatpush1.bf16.msra.mxu1 %v2684_v40  ;;  %2523 = vmatprep.mubr.msk.f32.mxu1 %vm4078_vm10, %v643_v11  ;;  %v956_v40 = vld [vmem:[#allocation8 + $0x358] sm:$0xff]  ;;  %v1211_v11 = vld [vmem:[#allocation8 + $0xb50] sm:$0xff]  ;;  %v2698_v21 = vpack.c.bf16 %v960_v9, %v958_v4  ;;  %v966_v4 = vld [vmem:[#allocation8 + $0x3a8] sm:$0xff] }
 0x117   : > { %2941 = vmatpush1.bf16.msra.mxu0 %v2940_v46  ;;  %2687 = vmatprep.subr.bf16.mxu1 %v2686_v27  ;;  %v2694_v58 = vpack.c.bf16 %v956_v40, %v954_v39  ;;  %v955_v46 = vld [vmem:[#allocation8 + $0x350] sm:$0xff]  ;;  %v1209_v27 = vld [vmem:[#allocation8 + $0xb40] sm:$0xff]  ;;  %v962_v39 = vld [vmem:[#allocation8 + $0x388] sm:$0xff] }
 0x118   : > { %2943 = vmatprep.subr.bf16.mxu0 %v2942_v3  ;;  %2554 = vmatmul.mubr.msk.f32.gmra.mrb[14].mxu0 %vm4072_vm9, %v795_v12  ;;  %v953_v3 = vld [vmem:[#allocation8 + $0x340] sm:$0xff]  ;;  %v1216_v12 = vld [vmem:[#allocation8 + $0xb78] sm:$0xff]  ;;  %v1218_v40 = vld [vmem:[#allocation8 + $0xb88] sm:$0xff] }
 0x119   : > { %2555 = vmatprep.mubr.msk.f32.mxu0 %vm4078_vm10, %v4095_v18  ;;  %v2696_v8 = vpack.c.bf16 %v955_v46, %v953_v3  ;;  %v2954_v36 = vpack.c.bf16 %v1216_v12, %v1214_v14  ;;  %v1220_v49 = vld [vmem:[#allocation8 + $0xb98] sm:$0xff]  ;;  %v1217_v46 = vld [vmem:[#allocation8 + $0xb80] sm:$0xff]  ;;  %v1222_v9 = vld [vmem:[#allocation8 + $0xba8] sm:$0xff] }
 0x11a   : > { %2689 = vmatpush1.bf16.msra.mxu1 %v2688_v22  ;;  %v2952_v22 = vpack.c.bf16 %v1211_v11, %v1209_v27  ;;  %v2958_v27 = vpack.c.bf16 %v1220_v49, %v1218_v40  ;;  %v1219_v11 = vld [vmem:[#allocation8 + $0xb90] sm:$0xff]  ;;  %v1224_v14 = vld [vmem:[#allocation8 + $0xbb8] sm:$0xff] }
 0x11b   : > { %2945 = vmatpush1.bf16.msra.mxu0 %v2944_v23  ;;  %2691 = vmatprep.subr.bf16.mxu1 %v2690_v38  ;;  %v957_v23 = vld [vmem:[#allocation8 + $0x360] sm:$0xff]  ;;  %v959_v38 = vld [vmem:[#allocation8 + $0x370] sm:$0xff]  ;;  %v1228_v40 = vld [vmem:[#allocation8 + $0xbd8] sm:$0xff] }
 0x11c   : > { %2947 = vmatprep.subr.bf16.mxu0 %v2946_v37  ;;  %v964_v37 = vld [vmem:[#allocation8 + $0x398] sm:$0xff]  ;;  %v2700_v51 = vpack.c.bf16 %v959_v38, %v957_v23  ;;  %v1221_v38 = vld [vmem:[#allocation8 + $0xba0] sm:$0xff] }
 0x11d   : > { %v2702_v3 = vpack.c.bf16 %v964_v37, %v962_v39  ;;  %v970_v39 = vld [vmem:[#allocation8 + $0x3c8] sm:$0xff] }
 0x11e   : > { %2693 = vmatpush1.bf16.msra.mxu1 %v2692_v35  ;;  %v2956_v35 = vpack.c.bf16 %v1215_v54, %v1213_v34  ;;  %v2962_v34 = vpack.c.bf16 %v1224_v14, %v1222_v9  ;;  %v1223_v54 = vld [vmem:[#allocation8 + $0xbb0] sm:$0xff]  ;;  %v1226_v37 = vld [vmem:[#allocation8 + $0xbc8] sm:$0xff]  ;;  %v1232_v9 = vld [vmem:[#allocation8 + $0xbf8] sm:$0xff] }
 0x11f   : > { %2949 = vmatpush1.bf16.msra.mxu0 %v2948_v59  ;;  %2695 = vmatprep.subr.bf16.mxu1 %v2694_v58  ;;  %v961_v59 = vld [vmem:[#allocation8 + $0x380] sm:$0xff]  ;;  %v963_v58 = vld [vmem:[#allocation8 + $0x390] sm:$0xff] }
 0x120   : > { %2951 = vmatprep.subr.bf16.mxu0 %v2950_v60  ;;  %v968_v60 = vld [vmem:[#allocation8 + $0x3b8] sm:$0xff]  ;;  %v2704_v12 = vpack.c.bf16 %v963_v58, %v961_v59  ;;  %v1225_v58 = vld [vmem:[#allocation8 + $0xbc0] sm:$0xff] }
 0x121   : > { %v2706_v23 = vpack.c.bf16 %v968_v60, %v966_v4  ;;  %v974_v4 = vld [vmem:[#allocation8 + $0x3e8] sm:$0xff] }
 0x122   : > { %2697 = vmatpush1.bf16.msra.mxu1 %v2696_v8  ;;  %v2960_v8 = vpack.c.bf16 %v1219_v11, %v1217_v46  ;;  %v2966_v46 = vpack.c.bf16 %v1228_v40, %v1226_v37  ;;  %v1227_v11 = vld [vmem:[#allocation8 + $0xbd0] sm:$0xff]  ;;  %v1230_v60 = vld [vmem:[#allocation8 + $0xbe8] sm:$0xff]  ;;  %v1236_v37 = vld [vmem:[#allocation8 + $0xc18] sm:$0xff] }
 0x123   : > { %2953 = vmatpush1.bf16.msra.mxu0 %v2952_v22  ;;  %2699 = vmatprep.subr.bf16.mxu1 %v2698_v21  ;;  %v965_v22 = vld [vmem:[#allocation8 + $0x3a0] sm:$0xff]  ;;  %v967_v21 = vld [vmem:[#allocation8 + $0x3b0] sm:$0xff] }
 0x124   : > { %2955 = vmatprep.subr.bf16.mxu0 %v2954_v36  ;;  %v972_v36 = vld [vmem:[#allocation8 + $0x3d8] sm:$0xff]  ;;  %v2708_v49 = vpack.c.bf16 %v967_v21, %v965_v22  ;;  %v1229_v21 = vld [vmem:[#allocation8 + $0xbe0] sm:$0xff] }
 0x125   : > { %v2710_v59 = vpack.c.bf16 %v972_v36, %v970_v39  ;;  %v978_v39 = vld [vmem:[#allocation8 + $0x408] sm:$0xff] }
 0x126   : > { %2701 = vmatpush1.bf16.msra.mxu1 %v2700_v51  ;;  %v2964_v51 = vpack.c.bf16 %v1223_v54, %v1221_v38  ;;  %v2970_v38 = vpack.c.bf16 %v1232_v9, %v1230_v60  ;;  %v1231_v54 = vld [vmem:[#allocation8 + $0xbf0] sm:$0xff]  ;;  %v1234_v36 = vld [vmem:[#allocation8 + $0xc08] sm:$0xff]  ;;  %v1240_v60 = vld [vmem:[#allocation8 + $0xc38] sm:$0xff]  ;;  %v646_v9 = vrot.slane %v3945_v5, 1 }
 0x127   : > { %2957 = vmatpush1.bf16.msra.mxu0 %v2956_v35  ;;  %2703 = vmatprep.subr.bf16.mxu1 %v2702_v3  ;;  %v969_v35 = vld [vmem:[#allocation8 + $0x3c0] sm:$0xff]  ;;  %v971_v3 = vld [vmem:[#allocation8 + $0x3d0] sm:$0xff] }
 0x128   : > { %2959 = vmatprep.subr.bf16.mxu0 %v2958_v27  ;;  %v976_v27 = vld [vmem:[#allocation8 + $0x3f8] sm:$0xff]  ;;  %v2712_v14 = vpack.c.bf16 %v971_v3, %v969_v35  ;;  %v1233_v3 = vld [vmem:[#allocation8 + $0xc00] sm:$0xff] }
 0x129   : > { %v2714_v22 = vpack.c.bf16 %v976_v27, %v974_v4  ;;  %v982_v4 = vld [vmem:[#allocation8 + $0x428] sm:$0xff] }
 0x12a   : > { %2705 = vmatpush1.bf16.msra.mxu1 %v2704_v12  ;;  %v2968_v12 = vpack.c.bf16 %v1227_v11, %v1225_v58  ;;  %v2974_v58 = vpack.c.bf16 %v1236_v37, %v1234_v36  ;;  %v1235_v11 = vld [vmem:[#allocation8 + $0xc10] sm:$0xff]  ;;  %v1238_v27 = vld [vmem:[#allocation8 + $0xc28] sm:$0xff]  ;;  %v1244_v36 = vld [vmem:[#allocation8 + $0xc58] sm:$0xff]  ;;  %v648_v37 = vrot.slane %v3969_v29, 1 }
 0x12b   : > { %2961 = vmatpush1.bf16.msra.mxu0 %v2960_v8  ;;  %2707 = vmatprep.subr.bf16.mxu1 %v2706_v23  ;;  %v973_v8 = vld [vmem:[#allocation8 + $0x3e0] sm:$0xff]  ;;  %v975_v23 = vld [vmem:[#allocation8 + $0x3f0] sm:$0xff]  ;;  %v992_v29 = vld [vmem:[#allocation8 + $0x478] sm:$0xff] }
 0x12c   : > { %2963 = vmatprep.subr.bf16.mxu0 %v2962_v34  ;;  %v980_v34 = vld [vmem:[#allocation8 + $0x418] sm:$0xff]  ;;  %v2716_v40 = vpack.c.bf16 %v975_v23, %v973_v8  ;;  %v983_v8 = vld [vmem:[#allocation8 + $0x430] sm:$0xff]  ;;  %v1237_v23 = vld [vmem:[#allocation8 + $0xc20] sm:$0xff] }
 0x12d   : > { %v2718_v35 = vpack.c.bf16 %v980_v34, %v978_v39  ;;  %v988_v39 = vld [vmem:[#allocation8 + $0x458] sm:$0xff]  ;;  %v1242_v34 = vld [vmem:[#allocation8 + $0xc48] sm:$0xff] }
 0x12e   : > { %2709 = vmatpush1.bf16.msra.mxu1 %v2708_v49  ;;  %v2972_v49 = vpack.c.bf16 %v1231_v54, %v1229_v21  ;;  %v2978_v21 = vpack.c.bf16 %v1240_v60, %v1238_v27  ;;  %v986_v54 = vld [vmem:[#allocation8 + $0x448] sm:$0xff] }
 0x12f   : > { %2965 = vmatpush1.bf16.msra.mxu0 %v2964_v51  ;;  %2711 = vmatprep.subr.bf16.mxu1 %v2710_v59  ;;  %v977_v51 = vld [vmem:[#allocation8 + $0x400] sm:$0xff]  ;;  %v979_v59 = vld [vmem:[#allocation8 + $0x410] sm:$0xff] }
 0x130   : > { %2967 = vmatprep.subr.bf16.mxu0 %v2966_v46  ;;  %v984_v46 = vld [vmem:[#allocation8 + $0x438] sm:$0xff]  ;;  %v2720_v50 = vpack.c.bf16 %v979_v59, %v977_v51  ;;  %v2726_v51 = vpack.c.bf16 %v988_v39, %v986_v54  ;;  %v985_v59 = vld [vmem:[#allocation8 + $0x440] sm:$0xff]  ;;  %v652_v39 = vrot.slane %v4020_v24, 1  ;;  %v1254_v24 = vld [vmem:[#allocation8 + $0xca8] sm:$0xff] }
 0x131   : > { %v2728_v27 = vpack.c.bf16 %v987_v13, %v985_v59  ;;  %v1251_v59 = vld [vmem:[#allocation8 + $0xc90] sm:$0xff]  ;;  %v998_v13 = vld [vmem:[#allocation8 + $0x4a8] sm:$0xff] }
 0x132   : > { %2713 = vmatpush1.bf16.msra.mxu1 %v2712_v14  ;;  %v2976_v14 = vpack.c.bf16 %v1235_v11, %v1233_v3  ;;  %v2982_v3 = vpack.c.bf16 %v1244_v36, %v1242_v34  ;;  %v990_v11 = vld [vmem:[#allocation8 + $0x468] sm:$0xff] }
 0x133   : > { %2969 = vmatpush1.bf16.msra.mxu0 %v2968_v12  ;;  %2715 = vmatprep.subr.bf16.mxu1 %v2714_v22  ;;  %v2722_v12 = vpack.c.bf16 %v984_v46, %v982_v4  ;;  %v981_v22 = vld [vmem:[#allocation8 + $0x420] sm:$0xff]  ;;  %v650_v46 = vrot.slane %v3996_v56, 1  ;;  %v1250_v56 = vld [vmem:[#allocation8 + $0xc88] sm:$0xff] }
 0x134   : > { %2971 = vmatprep.subr.bf16.mxu0 %v2970_v38  ;;  %v1239_v38 = vld [vmem:[#allocation8 + $0xc30] sm:$0xff] }
 0x135   : > { %v651_v36 = vsel %vm4534_vm8, %v648_v37, %v650_v46 }
 0x136   : > { %2717 = vmatpush1.bf16.msra.mxu1 %v2716_v40  ;;  %v2724_v40 = vpack.c.bf16 %v983_v8, %v981_v22  ;;  %v1245_v22 = vld [vmem:[#allocation8 + $0xc60] sm:$0xff]  ;;  %v1247_v8 = vld [vmem:[#allocation8 + $0xc70] sm:$0xff] }
 0x137   : > { %2973 = vmatpush1.bf16.msra.mxu0 %v2972_v49  ;;  %2719 = vmatprep.subr.bf16.mxu1 %v2718_v35  ;;  %v647_v49 = vsel %vm4534_vm8, %v644_v41, %v646_v9  ;;  %v2980_v35 = vpack.c.bf16 %v1239_v38, %v1237_v23  ;;  %v4589_v41 = vand.u32 7, %v3905_v31  ;;  %v994_v23 = vld [vmem:[#allocation8 + $0x488] sm:$0xff]  ;;  %v1252_v38 = vld [vmem:[#allocation8 + $0xc98] sm:$0xff] }
 0x138   : > { %2975 = vmatprep.subr.bf16.mxu0 %v2974_v58  ;;  %v1243_v58 = vld [vmem:[#allocation8 + $0xc50] sm:$0xff] }
 0x139   : > { %1551 = vmatmul.mubr.f32.vlgmr.msra.gmra.mrb[0].mxu1 %v3574_v0  ;;  %vm4123_vm12 = vcmp.le.s32.totalorder %v4589_v41, 6  ;;  %v2984_v60 = vpack.c.bf16 %v1243_v58, %v1241_v30  ;;  %v1000_v30 = vld [vmem:[#allocation8 + $0x4b8] sm:$0xff]  ;;  %v4596_v58 = vmov 0 }
 0x13a   : > { %2721 = vmatpush1.bf16.msra.mxu1 %v2720_v50  ;;  %2003 = vmatmul.mubr.f32.vlgmr.msra.gmra.mrb[0].mxu0 %v3883_v7  ;;  %v1246_v50 = vld [vmem:[#allocation8 + $0xc68] sm:$0xff]  ;;  %v2738_v41 = vpack.c.bf16 %v1000_v30, %v998_v13 }
 0x13b   : > { %2977 = vmatpush1.bf16.msra.mxu0 %v2976_v14  ;;  %2723 = vmatprep.subr.bf16.mxu1 %v2722_v12  ;;  %v2730_v14 = vpack.c.bf16 %v992_v29, %v990_v11  ;;  %v989_v12 = vld [vmem:[#allocation8 + $0x460] sm:$0xff]  ;;  %v2986_v31 = vpack.c.bf16 %v1248_v47, %v1246_v50  ;;  %v4156_v11 = vrot.slane %v4042_v63, 1  ;;  %v653_v50 = vsel %vm4534_vm8, %v650_v46, %v652_v39 }
 0x13c   : > { %2979 = vmatprep.subr.bf16.mxu0 %v2978_v21  ;;  %2524 = vmatprep.mubr.msk.f32.mxu1 %vm4106_vm11, %v4095_v18  ;;  %v649_v18 = vsel %vm4534_vm8, %v646_v9, %v648_v37  ;;  %v996_v21 = vld [vmem:[#allocation8 + $0x498] sm:$0xff]  ;;  %v4592_v9 = vand.u32 7, %v3913_v44  ;;  %v2990_v44 = vpack.c.bf16 %v1252_v38, %v1250_v56  ;;  %v4595_v37 = vand.u32 7, %v3939_v1  ;;  %v1253_v1 = vld [vmem:[#allocation8 + $0xca0] sm:$0xff] }
 0x13d   : > { %2556 = vmatprep.mubr.msk.f32.mxu0 %vm4106_vm11, %v647_v49  ;;  %1557 = vmatmul.mubr.f32.gmra.mrb[2].mxu1 %v3883_v7  ;;  %v991_v7 = vld [vmem:[#allocation8 + $0x470] sm:$0xff]  ;;  %v4598_v46 = vand.u32 7, %v3964_v25  ;;  %v1257_v25 = vld [vmem:[#allocation8 + $0xcc0] sm:$0xff] }
 0x13e   : > { %2725 = vmatpush1.bf16.msra.mxu1 %v2724_v40  ;;  %2009 = vmatmul.mubr.f32.gmra.mrb[2].mxu0 %v3931_v55  ;;  %vm4137_vm13 = vcmp.le.s32.totalorder %v4592_v9, 6  ;;  %v2732_v34 = vpack.c.bf16 %v991_v7, %v989_v12  ;;  %v2988_v40 = vpack.c.bf16 %v1247_v8, %v1245_v22  ;;  %vm4151_vm14 = vcmp.le.s32.totalorder %v4595_v37, 6  ;;  %v1004_v12 = vld [vmem:[#allocation8 + $0x4d8] sm:$0xff]  ;;  %v1258_v7 = vld [vmem:[#allocation8 + $0xcc8] sm:$0xff]  ;;  %v1003_v9 = vld [vmem:[#allocation8 + $0x4d0] sm:$0xff] }
 0x13f   : > { %2981 = vmatpush1.bf16.msra.mxu0 %v2980_v35  ;;  %2727 = vmatprep.subr.bf16.mxu1 %v2726_v51  ;;  %v993_v35 = vld [vmem:[#allocation8 + $0x480] sm:$0xff]  ;;  %v4597_v58 = vsel %vm4151_vm14, 4294967295, %v4596_v58  ;;  %v1260_v22 = vld [vmem:[#allocation8 + $0xcd8] sm:$0xff]  ;;  %vm4167_vm15 = vcmp.le.s32.totalorder %v4598_v46, 6  ;;  %v800_v8 = vrot.slane %v4068_v42, 1  ;;  %v1263_v37 = vld [vmem:[#allocation8 + $0xcf0] sm:$0xff] }
 0x140   : > { %2983 = vmatprep.subr.bf16.mxu0 %v2982_v3  ;;  %2525 = vmatprep.mubr.msk.f32.mxu1 %vm4123_vm12, %v647_v49  ;;  %v2734_v49 = vpack.c.bf16 %v996_v21, %v994_v23  ;;  %v1249_v51 = vld [vmem:[#allocation8 + $0xc80] sm:$0xff]  ;;  %v1256_v3 = vld [vmem:[#allocation8 + $0xcb8] sm:$0xff]  ;;  %v655_v21 = vsel %vm4534_vm8, %v652_v39, %v4156_v11  ;;  %v4601_v39 = vand.u32 7, %v3992_v53  ;;  %v1267_v46 = vld [vmem:[#allocation8 + $0xd10] sm:$0xff] }
 0x141   : > { %2557 = vmatprep.mubr.msk.f32.mxu0 %vm4123_vm12, %v649_v18  ;;  %1563 = vmatmul.mubr.f32.gmra.mrb[4].mxu1 %v3931_v55  ;;  %v995_v55 = vld [vmem:[#allocation8 + $0x490] sm:$0xff]  ;;  %v2992_v47 = vpack.c.bf16 %v1251_v59, %v1249_v51  ;;  %v801_v59 = vsel %vm4534_vm8, %v4156_v11, %v800_v8  ;;  %v1365_v51 = vsub.s32 0, %v3880_v61 }
 0x142   : > { %2729 = vmatpush1.bf16.msra.mxu1 %v2728_v27  ;;  %2015 = vmatmul.mubr.f32.gmra.mrb[4].mxu0 %v3955_v16  ;;  %v2736_v29 = vpack.c.bf16 %v995_v55, %v993_v35  ;;  %v999_v27 = vld [vmem:[#allocation8 + $0x4b0] sm:$0xff]  ;;  %v1262_v35 = vld [vmem:[#allocation8 + $0xce8] sm:$0xff]  ;;  %v1264_v55 = vld [vmem:[#allocation8 + $0xcf8] sm:$0xff]  ;;  %vm4182_vm0 = vcmp.le.s32.totalorder %v4601_v39, 6 }
 0x143   : > { %2985 = vmatpush1.bf16.msra.mxu0 %v2984_v60  ;;  %2731 = vmatprep.subr.bf16.mxu1 %v2730_v14  ;;  %v1255_v60 = vld [vmem:[#allocation8 + $0xcb0] sm:$0xff]  ;;  %v1002_v14 = vld [vmem:[#allocation8 + $0x4c8] sm:$0xff]  ;;  %v3002_v53 = vpack.c.bf16 %v1264_v55, %v1262_v35  ;;  %v1276_v55 = vld [vmem:[#allocation8 + $0xd58] sm:$0xff] }
 0x144   : > { %2987 = vmatprep.subr.bf16.mxu0 %v2986_v31  ;;  %2526 = vmatprep.mubr.msk.f32.mxu1 %vm4137_vm13, %v649_v18  ;;  %v2994_v18 = vpack.c.bf16 %v1256_v3, %v1254_v24  ;;  %v4599_v31 = vmov 0  ;;  %v2996_v56 = vpack.c.bf16 %v1255_v60, %v1253_v1  ;;  %v2742_v38 = vpack.c.bf16 %v1004_v12, %v1002_v14  ;;  %v1005_v24 = vld [vmem:[#allocation8 + $0x4e0] sm:$0xff]  ;;  %v1007_v3 = vld [vmem:[#allocation8 + $0x4f0] sm:$0xff]  ;;  %v1274_v35 = vld [vmem:[#allocation8 + $0xd48] sm:$0xff] }
 0x145   : > { %2558 = vmatprep.mubr.msk.f32.mxu0 %vm4137_vm13, %v651_v36  ;;  %1569 = vmatmul.mubr.f32.gmra.mrb[6].mxu1 %v3955_v16  ;;  %v997_v16 = vld [vmem:[#allocation8 + $0x4a0] sm:$0xff]  ;;  %v4600_v31 = vsel %vm4167_vm15, 4294967295, %v4599_v31  ;;  %v1011_v12 = vld [vmem:[#allocation8 + $0x510] sm:$0xff] }
 0x146   : > { %2733 = vmatpush1.bf16.msra.mxu1 %v2732_v34  ;;  %2021 = vmatmul.mubr.f32.gmra.mrb[6].mxu0 %v3978_v33  ;;  %v2740_v23 = vpack.c.bf16 %v999_v27, %v997_v16  ;;  %v2998_v34 = vpack.c.bf16 %v1260_v22, %v1258_v7  ;;  %v4604_v16 = vand.u32 7, %v4016_v20  ;;  %v1009_v14 = vld [vmem:[#allocation8 + $0x500] sm:$0xff] }
 0x147   : > { %2989 = vmatpush1.bf16.msra.mxu0 %v2988_v40  ;;  %2735 = vmatprep.subr.bf16.mxu1 %v2734_v49  ;;  %v1006_v40 = vld [vmem:[#allocation8 + $0x4e8] sm:$0xff]  ;;  %v1008_v49 = vld [vmem:[#allocation8 + $0x4f8] sm:$0xff]  ;;  %v1265_v7 = vld [vmem:[#allocation8 + $0xd00] sm:$0xff] }
 0x148   : > { %2991 = vmatprep.subr.bf16.mxu0 %v2990_v44  ;;  %2527 = vmatprep.mubr.msk.f32.mxu1 %vm4151_vm14, %v651_v36  ;;  %v1259_v36 = vld [vmem:[#allocation8 + $0xcd0] sm:$0xff]  ;;  %v2746_v30 = vpack.c.bf16 %v1008_v49, %v1006_v40  ;;  %vm4196_vm8 = vcmp.le.s32.totalorder %v4604_v16, 6  ;;  %v1018_v49 = vld [vmem:[#allocation8 + $0x548] sm:$0xff]  ;;  %v1021_v16 = vld [vmem:[#allocation8 + $0x560] sm:$0xff] }
 0x149   : > { %2559 = vmatprep.mubr.msk.f32.mxu0 %vm4151_vm14, %v653_v50  ;;  %1575 = vmatmul.mubr.f32.gmra.mrb[8].mxu1 %v3978_v33  ;;  %v1001_v33 = vld [vmem:[#allocation8 + $0x4c0] sm:$0xff]  ;;  %v3000_v13 = vpack.c.bf16 %v1259_v36, %v1257_v25  ;;  %v1015_v25 = vld [vmem:[#allocation8 + $0x530] sm:$0xff] }
 0x14a   : > { %2737 = vmatpush1.bf16.msra.mxu1 %v2736_v29  ;;  %2027 = vmatmul.mubr.f32.gmra.mrb[8].mxu0 %v3989_v52  ;;  %v2744_v44 = vpack.c.bf16 %v1003_v9, %v1001_v33  ;;  %v1010_v29 = vld [vmem:[#allocation8 + $0x508] sm:$0xff]  ;;  %v1013_v9 = vld [vmem:[#allocation8 + $0x520] sm:$0xff]  ;;  %v1271_v40 = vld [vmem:[#allocation8 + $0xd30] sm:$0xff] }
 0x14b   : > { %2993 = vmatpush1.bf16.msra.mxu0 %v2992_v47  ;;  %2739 = vmatprep.subr.bf16.mxu1 %v2738_v41  ;;  %v1266_v47 = vld [vmem:[#allocation8 + $0xd08] sm:$0xff]  ;;  %v1268_v41 = vld [vmem:[#allocation8 + $0xd18] sm:$0xff] }
 0x14c   : > { %2995 = vmatprep.subr.bf16.mxu0 %v2994_v18  ;;  %2528 = vmatprep.mubr.msk.f32.mxu1 %vm4167_vm15, %v653_v50  ;;  %v1012_v50 = vld [vmem:[#allocation8 + $0x518] sm:$0xff]  ;;  %v2748_v18 = vpack.c.bf16 %v1007_v3, %v1005_v24  ;;  %v3006_v22 = vpack.c.bf16 %v1268_v41, %v1266_v47  ;;  %v3014_v24 = vpack.c.bf16 %v1276_v55, %v1274_v35  ;;  %v1275_v3 = vld [vmem:[#allocation8 + $0xd50] sm:$0xff]  ;;  %v1285_v55 = vld [vmem:[#allocation8 + $0xda0] sm:$0xff] }
 0x14d   : > { %2560 = vmatprep.mubr.msk.f32.mxu0 %vm4167_vm15, %v655_v21  ;;  %1581 = vmatmul.mubr.f32.gmra.mrb[10].mxu1 %v3989_v52  ;;  %v1261_v52 = vld [vmem:[#allocation8 + $0xce0] sm:$0xff]  ;;  %vm4607_vm15 = vcmask 1046528   ;;  %v2750_v20 = vpack.c.bf16 %v1012_v50, %v1010_v29  ;;  %v1280_v29 = vld [vmem:[#allocation8 + $0xd78] sm:$0xff]  ;;  %v1031_v35 = vld [vmem:[#allocation8 + $0x5b0] sm:$0xff] }
 0x14e   : > { %2741 = vmatpush1.bf16.msra.mxu1 %v2740_v23  ;;  %2033 = vmatmul.mubr.f32.gmra.mrb[10].mxu0 %v4013_v19  ;;  %v664_v1 = vsel %vm4607_vm15, %v4156_v11, %v4042_v63  ;;  %vm4608_vm14 = vmmov %vm4607_vm15  ;;  %v1014_v63 = vld [vmem:[#allocation8 + $0x528] sm:$0xff]  ;;  %v1016_v11 = vld [vmem:[#allocation8 + $0x538] sm:$0xff] }
 0x14f   : > { %2997 = vmatpush1.bf16.msra.mxu0 %v2996_v56  ;;  %2743 = vmatprep.subr.bf16.mxu1 %v2742_v38  ;;  %v804_v60 = vsel %vm4608_vm14, %v800_v8, %v4068_v42  ;;  %v1270_v23 = vld [vmem:[#allocation8 + $0xd28] sm:$0xff]  ;;  %v4212_v42 = vld [vmem:[%s3860_s10] sm:$0xff]  ;;  %v2752_v8 = vpack.c.bf16 %v1011_v12, %v1009_v14  ;;  %v3008_v38 = vpack.c.bf16 %v1267_v46, %v1265_v7  ;;  %v1028_v14 = vld [vmem:[#allocation8 + $0x598] sm:$0xff]  ;;  %vm4609_vm14 = vcmask 1040384  }
 0x150   : > { %2999 = vmatprep.subr.bf16.mxu0 %v2998_v34  ;;  %2529 = vmatprep.mubr.msk.f32.mxu1 %vm4182_vm0, %v655_v21  ;;  %v1272_v21 = vld [vmem:[#allocation8 + $0xd38] sm:$0xff]  ;;  %v4216_v56 = vld [vmem:[%s3860_s10 + $0x20] sm:$0xff]  ;;  %v2754_v33 = vpack.c.bf16 %v1016_v11, %v1014_v63  ;;  %v1282_v12 = vld [vmem:[#allocation8 + $0xd88] sm:$0xff]  ;;  %v753_v26 = vrot.slane %v4212_v42, 1 }
 0x151   : > { %2561 = vmatprep.mubr.msk.f32.mxu0 %vm4182_vm0, %v801_v59  ;;  %1587 = vmatmul.mubr.f32.gmra.mrb[12].mxu1 %v4013_v19  ;;  %v3004_v19 = vpack.c.bf16 %v1263_v37, %v1261_v52  ;;  %v1269_v34 = vld [vmem:[#allocation8 + $0xd20] sm:$0xff]  ;;  %v3010_v36 = vpack.c.bf16 %v1272_v21, %v1270_v23  ;;  %v1022_v52 = vld [vmem:[#allocation8 + $0x568] sm:$0xff]  ;;  %v1284_v7 = vld [vmem:[#allocation8 + $0xd98] sm:$0xff] }
 0x152   : > { %2745 = vmatpush1.bf16.msra.mxu1 %v2744_v44  ;;  %2039 = vmatmul.mubr.f32.gmra.mrb[12].mxu0 %v4033_v45  ;;  %v3012_v39 = vpack.c.bf16 %v1271_v40, %v1269_v34  ;;  %v1017_v59 = vld [vmem:[#allocation8 + $0x540] sm:$0xff]  ;;  %v1278_v37 = vld [vmem:[#allocation8 + $0xd68] sm:$0xff]  ;;  %v1027_v23 = vld [vmem:[#allocation8 + $0x590] sm:$0xff] }
 0x153   : > { %3001 = vmatpush1.bf16.msra.mxu0 %v3000_v13  ;;  %2747 = vmatprep.subr.bf16.mxu1 %v2746_v30  ;;  %v1019_v13 = vld [vmem:[#allocation8 + $0x550] sm:$0xff]  ;;  %v1273_v30 = vld [vmem:[#allocation8 + $0xd40] sm:$0xff]  ;;  %v1288_v34 = vld [vmem:[#allocation8 + $0xdb8] sm:$0xff] }
 0x154   : > { %3003 = vmatprep.subr.bf16.mxu0 %v3002_v53  ;;  %2530 = vmatprep.mubr.msk.f32.mxu1 %vm4196_vm8, %v664_v1  ;;  %v1024_v53 = vld [vmem:[#allocation8 + $0x578] sm:$0xff]  ;;  %v2760_v50 = vpack.c.bf16 %v1019_v13, %v1017_v59  ;;  %v3016_v47 = vpack.c.bf16 %v1275_v3, %v1273_v30  ;;  %v1023_v1 = vld [vmem:[#allocation8 + $0x570] sm:$0xff]  ;;  %v1025_v11 = vld [vmem:[#allocation8 + $0x580] sm:$0xff] }
 0x155   : > { %2562 = vmatprep.mubr.msk.f32.mxu0 %vm4196_vm8, %v804_v60  ;;  %1593 = vmatmul.mubr.f32.gmra.mrb[14].mxu1 %v4033_v45  ;;  %v1020_v45 = vld [vmem:[#allocation8 + $0x558] sm:$0xff]  ;;  %v2762_v41 = vpack.c.bf16 %v1024_v53, %v1022_v52  ;;  %v3018_v60 = vpack.c.bf16 %v1280_v29, %v1278_v37  ;;  %v1281_v21 = vld [vmem:[#allocation8 + $0xd80] sm:$0xff]  ;;  %v1290_v13 = vld [vmem:[#allocation8 + $0xdc8] sm:$0xff] }
 0x156   : > { %2749 = vmatpush1.bf16.msra.mxu1 %v2748_v18  ;;  %2045 = vmatmul.mubr.f32.gmra.mrb[14].mxu0 %v4053_v15  ;;  %v2756_v15 = vpack.c.bf16 %v1015_v25, %v1013_v9  ;;  %v2758_v44 = vpack.c.bf16 %v1020_v45, %v1018_v49  ;;  %v1277_v18 = vld [vmem:[#allocation8 + $0xd60] sm:$0xff]  ;;  %v1032_v9 = vld [vmem:[#allocation8 + $0x5b8] sm:$0xff]  ;;  %v1286_v25 = vld [vmem:[#allocation8 + $0xda8] sm:$0xff] }
 0x157   : > { %3005 = vmatpush1.bf16.msra.mxu0 %v3004_v19  ;;  %2751 = vmatprep.subr.bf16.mxu1 %v2750_v20  ;;  %v1279_v19 = vld [vmem:[#allocation8 + $0xd70] sm:$0xff]  ;;  %v1026_v20 = vld [vmem:[#allocation8 + $0x588] sm:$0xff]  ;;  %v1029_v45 = vld [vmem:[#allocation8 + $0x5a0] sm:$0xff] }
 0x158   : > { %3007 = vmatprep.subr.bf16.mxu0 %v3006_v22  ;;  %1663 = vmatprep.mubr.f32.mxu1 %v4212_v42  ;;  %v2764_v22 = vpack.c.bf16 %v1023_v1, %v1021_v16  ;;  %v3020_v46 = vpack.c.bf16 %v1279_v19, %v1277_v18  ;;  %v2766_v63 = vpack.c.bf16 %v1028_v14, %v1026_v20  ;;  %v1036_v59 = vld [vmem:[#allocation8 + $0x5d8] sm:$0xff]  ;;  %v1033_v53 = vld [vmem:[#allocation8 + $0x5c0] sm:$0xff]  ;;  %v1035_v37 = vld [vmem:[#allocation8 + $0x5d0] sm:$0xff] }
 0x159   : > { %2115 = vmatprep.mubr.f32.mxu0 %v4216_v56  ;;  %v1292_v30 = vld [vmem:[#allocation8 + $0xdd8] sm:$0xff]  ;;  %v1289_v29 = vld [vmem:[#allocation8 + $0xdc0] sm:$0xff]  ;;  %v1294_v1 = vld [vmem:[#allocation8 + $0xde8] sm:$0xff] }
 0x15a   : > { %2753 = vmatpush1.bf16.msra.mxu1 %v2752_v8  ;;  %v3022_v8 = vpack.c.bf16 %v1284_v7, %v1282_v12  ;;  %v1040_v16 = vld [vmem:[#allocation8 + $0x5f8] sm:$0xff]  ;;  %v1037_v19 = vld [vmem:[#allocation8 + $0x5e0] sm:$0xff]  ;;  %v1039_v20 = vld [vmem:[#allocation8 + $0x5f0] sm:$0xff] }
 0x15b   : > { %3009 = vmatpush1.bf16.msra.mxu0 %v3008_v38  ;;  %2755 = vmatprep.subr.bf16.mxu1 %v2754_v33  ;;  %v1283_v38 = vld [vmem:[#allocation8 + $0xd90] sm:$0xff]  ;;  %v1030_v33 = vld [vmem:[#allocation8 + $0x5a8] sm:$0xff]  ;;  %v1296_v18 = vld [vmem:[#allocation8 + $0xdf8] sm:$0xff] }
 0x15c   : > { %3011 = vmatprep.subr.bf16.mxu0 %v3010_v36  ;;  %v2768_v36 = vpack.c.bf16 %v1027_v23, %v1025_v11  ;;  %v3024_v40 = vpack.c.bf16 %v1283_v38, %v1281_v21  ;;  %v2770_v49 = vpack.c.bf16 %v1032_v9, %v1030_v33  ;;  %v1293_v7 = vld [vmem:[#allocation8 + $0xde0] sm:$0xff]  ;;  %v1042_v11 = vld [vmem:[#allocation8 + $0x608] sm:$0xff]  ;;  %v1044_v23 = vld [vmem:[#allocation8 + $0x618] sm:$0xff]  ;;  %v2780_v33 = vpack.c.bf16 %v1039_v20, %v1037_v19 }
 0x15d   : > { %v4224_v21 = vld [vmem:[%s3860_s10 + $0x28] sm:$0xff]  ;;  %v1300_v38 = vld [vmem:[#allocation8 + $0xe18] sm:$0xff]  ;;  %vm4610_vm15 = vmmov %vm4609_vm14 }
 0x15e   : > { %2757 = vmatpush1.bf16.msra.mxu1 %v2756_v15  ;;  %v3026_v15 = vpack.c.bf16 %v1288_v34, %v1286_v25  ;;  %v1041_v25 = vld [vmem:[#allocation8 + $0x600] sm:$0xff]  ;;  %v1306_v19 = vld [vmem:[#allocation8 + $0xe48] sm:$0xff]  ;;  %v1308_v20 = vld [vmem:[#allocation8 + $0xe58] sm:$0xff] }
 0x15f   : > { %3013 = vmatpush1.bf16.msra.mxu0 %v3012_v39  ;;  %2759 = vmatprep.subr.bf16.mxu1 %v2758_v44  ;;  %v1287_v39 = vld [vmem:[#allocation8 + $0xdb0] sm:$0xff]  ;;  %v1034_v44 = vld [vmem:[#allocation8 + $0x5c8] sm:$0xff] }
 0x160   : > { %3015 = vmatprep.subr.bf16.mxu0 %v3014_v24  ;;  %v2772_v24 = vpack.c.bf16 %v1031_v35, %v1029_v45  ;;  %v3028_v3 = vpack.c.bf16 %v1287_v39, %v1285_v55  ;;  %v2774_v52 = vpack.c.bf16 %v1036_v59, %v1034_v44  ;;  %v1297_v45 = vld [vmem:[#allocation8 + $0xe00] sm:$0xff]  ;;  %v1299_v35 = vld [vmem:[#allocation8 + $0xe10] sm:$0xff]  ;;  %v1048_v39 = vld [vmem:[#allocation8 + $0x638] sm:$0xff] }
 0x161   : > { %v4229_v44 = vld [vmem:[%s3860_s10 + $0x48] sm:$0xff] }
 0x162   : > { %2761 = vmatpush1.bf16.msra.mxu1 %v2760_v50  ;;  %v3030_v50 = vpack.c.bf16 %v1292_v30, %v1290_v13  ;;  %v1302_v59 = vld [vmem:[#allocation8 + $0xe28] sm:$0xff]  ;;  %v1304_v13 = vld [vmem:[#allocation8 + $0xe38] sm:$0xff] }
 0x163   : > { %3017 = vmatpush1.bf16.msra.mxu0 %v3016_v47  ;;  %2763 = vmatprep.subr.bf16.mxu1 %v2762_v41  ;;  %v1291_v47 = vld [vmem:[#allocation8 + $0xdd0] sm:$0xff]  ;;  %v1038_v41 = vld [vmem:[#allocation8 + $0x5e8] sm:$0xff] }
 0x164   : > { %3019 = vmatprep.subr.bf16.mxu0 %v3018_v60  ;;  %v2776_v60 = vpack.c.bf16 %v1035_v37, %v1033_v53  ;;  %v3032_v14 = vpack.c.bf16 %v1291_v47, %v1289_v29  ;;  %v2778_v12 = vpack.c.bf16 %v1040_v16, %v1038_v41  ;;  %v3040_v53 = vpack.c.bf16 %v1299_v35, %v1297_v45  ;;  %v1047_v29 = vld [vmem:[#allocation8 + $0x630] sm:$0xff]  ;;  %v1312_v45 = vld [vmem:[#allocation8 + $0xe78] sm:$0xff]  ;;  %v1053_v35 = vld [vmem:[#allocation8 + $0x660] sm:$0xff] }
 0x165   : > { %v1303_v47 = vld [vmem:[#allocation8 + $0xe30] sm:$0xff]  ;;  %v724_v41 = vrot.slane %v4229_v44, 7  ;;  %v3042_v16 = vpack.c.bf16 %v1304_v13, %v1302_v59  ;;  %v1309_v13 = vld [vmem:[#allocation8 + $0xe60] sm:$0xff] }
 0x166   : > { %2765 = vmatpush1.bf16.msra.mxu1 %v2764_v22  ;;  %v1295_v22 = vld [vmem:[#allocation8 + $0xdf0] sm:$0xff] }
 0x167   : > { %3021 = vmatpush1.bf16.msra.mxu0 %v3020_v46  ;;  %2767 = vmatprep.subr.bf16.mxu1 %v2766_v63  ;;  %v4221_v46 = vld [vmem:[%s3860_s10 + $0x8] sm:$0xff]  ;;  %v3034_v63 = vpack.c.bf16 %v1296_v18, %v1294_v1  ;;  %v3036_v34 = vpack.c.bf16 %v1295_v22, %v1293_v7  ;;  %v1052_v18 = vld [vmem:[#allocation8 + $0x658] sm:$0xff]  ;;  %v4244_v7 = vld [vmem:[%s3860_s10 + $0x40] sm:$0xff] }
 0x168   : > { %3023 = vmatprep.subr.bf16.mxu0 %v3022_v8  ;;  %v1298_v8 = vld [vmem:[#allocation8 + $0xe08] sm:$0xff]  ;;  %v721_v9 = vrot.slane %v4221_v46, 7  ;;  %v1055_v59 = vld [vmem:[#allocation8 + $0x670] sm:$0xff] }
 0x169   : > { %v3038_v55 = vpack.c.bf16 %v1300_v38, %v1298_v8  ;;  %v1050_v1 = vld [vmem:[#allocation8 + $0x648] sm:$0xff]  ;;  %v1305_v8 = vld [vmem:[#allocation8 + $0xe40] sm:$0xff]  ;;  %v1307_v38 = vld [vmem:[#allocation8 + $0xe50] sm:$0xff] }
 0x16a   : > { %2769 = vmatpush1.bf16.msra.mxu1 %v2768_v36  ;;  %v2782_v36 = vpack.c.bf16 %v1044_v23, %v1042_v11  ;;  %v744_v30 = vsel %vm4609_vm14, %v4221_v46, %v721_v9  ;;  %v2790_v11 = vpack.c.bf16 %v1052_v18, %v1050_v1  ;;  %v1051_v23 = vld [vmem:[#allocation8 + $0x650] sm:$0xff] }
 0x16b   : > { %3025 = vmatpush1.bf16.msra.mxu0 %v3024_v40  ;;  %2771 = vmatprep.subr.bf16.mxu1 %v2770_v49  ;;  %v1043_v40 = vld [vmem:[#allocation8 + $0x610] sm:$0xff]  ;;  %v722_v49 = vrot.slane %v4224_v21, 7 }
 0x16c   : > { %3027 = vmatprep.subr.bf16.mxu0 %v3026_v15  ;;  %v1046_v15 = vld [vmem:[#allocation8 + $0x628] sm:$0xff] }
 0x16d   : > { %v2786_v37 = vpack.c.bf16 %v1048_v39, %v1046_v15  ;;  %v723_v22 = vsel %vm4609_vm14, %v721_v9, %v722_v49  ;;  %v1310_v9 = vld [vmem:[#allocation8 + $0xe68] sm:$0xff]  ;;  %v3048_v15 = vpack.c.bf16 %v1307_v38, %v1305_v8  ;;  %v1320_v38 = vld [vmem:[#allocation8 + $0xeb8] sm:$0xff] }
 0x16e   : > { %2773 = vmatpush1.bf16.msra.mxu1 %v2772_v24  ;;  %v2784_v24 = vpack.c.bf16 %v1043_v40, %v1041_v25  ;;  %v3046_v25 = vpack.c.bf16 %v1308_v20, %v1306_v19  ;;  %v4251_v40 = vld [vmem:[%s3860_s10 + $0x88] sm:$0xff]  ;;  %v1059_v19 = vld [vmem:[#allocation8 + $0x690] sm:$0xff]  ;;  %v1313_v20 = vld [vmem:[#allocation8 + $0xe80] sm:$0xff] }
 0x16f   : > { %3029 = vmatpush1.bf16.msra.mxu0 %v3028_v3  ;;  %2775 = vmatprep.subr.bf16.mxu1 %v2774_v52  ;;  %v1045_v3 = vld [vmem:[#allocation8 + $0x620] sm:$0xff]  ;;  %v826_v52 = vsel %vm4610_vm15, %v4224_v21, %v722_v49  ;;  %vm4611_vm15 = vmmov %vm4609_vm14  ;;  %v1318_v8 = vld [vmem:[#allocation8 + $0xea8] sm:$0xff] }
 0x170   : > { %3031 = vmatprep.subr.bf16.mxu0 %v3030_v50  ;;  %v1301_v50 = vld [vmem:[#allocation8 + $0xe20] sm:$0xff] }
 0x172   : > { %2777 = vmatpush1.bf16.msra.mxu1 %v2776_v60  ;;  %v4237_v60 = vld [vmem:[%s3860_s10 + $0x68] sm:$0xff] }
 0x173   : > { %3033 = vmatpush1.bf16.msra.mxu0 %v3032_v14  ;;  %2779 = vmatprep.subr.bf16.mxu1 %v2778_v12  ;;  %v2788_v14 = vpack.c.bf16 %v1047_v29, %v1045_v3  ;;  %v1049_v12 = vld [vmem:[#allocation8 + $0x640] sm:$0xff]  ;;  %v726_v28 = vrot.slane %v4237_v60, 7  ;;  %v728_v3 = vrot.slane %v4251_v40, 7  ;;  %v1314_v29 = vld [vmem:[#allocation8 + $0xe88] sm:$0xff] }
 0x174   : > { %3035 = vmatprep.subr.bf16.mxu0 %v3034_v63  ;;  %v3044_v63 = vpack.c.bf16 %v1303_v47, %v1301_v50  ;;  %v1316_v50 = vld [vmem:[#allocation8 + $0xe98] sm:$0xff]  ;;  %v2796_v47 = vpack.c.bf16 %v1055_v59, %v1053_v35  ;;  %v1066_v59 = vld [vmem:[#allocation8 + $0x6c8] sm:$0xff] }
 0x176   : > { %2781 = vmatpush1.bf16.msra.mxu1 %v2780_v33  ;;  %v725_v33 = vsel %vm4611_vm15, %v722_v49, %v724_v41  ;;  %v2792_v49 = vpack.c.bf16 %v1051_v23, %v1049_v12  ;;  %v4279_v23 = vld [vmem:[%s3860_s10 + $0xc8] sm:$0xff] }
 0x177   : > { %3037 = vmatpush1.bf16.msra.mxu0 %v3036_v34  ;;  %2783 = vmatprep.subr.bf16.mxu1 %v2782_v36  ;;  %v1054_v34 = vld [vmem:[#allocation8 + $0x668] sm:$0xff]  ;;  %v1056_v36 = vld [vmem:[#allocation8 + $0x678] sm:$0xff] }
 0x178   : > { %3039 = vmatprep.subr.bf16.mxu0 %v3038_v55  ;;  %v4259_v55 = vld [vmem:[%s3860_s10 + $0x60] sm:$0xff]  ;;  %v2794_v39 = vpack.c.bf16 %v1056_v36, %v1054_v34 }
 0x179   : > { %2531 = vmatmul.mubr.msk.f32.vlgmr.msra.gmra.mrb[0].mxu1 %vm3899_vm1, %v744_v30  ;;  %v1311_v30 = vld [vmem:[#allocation8 + $0xe70] sm:$0xff] }
 0x17a   : > { %2785 = vmatpush1.bf16.msra.mxu1 %v2784_v24  ;;  %2563 = vmatmul.mubr.msk.f32.vlgmr.msra.gmra.mrb[0].mxu0 %vm3899_vm1, %v826_v52  ;;  %vm4612_vm1 = vmmov %vm4609_vm14  ;;  %v3050_v52 = vpack.c.bf16 %v1312_v45, %v1310_v9  ;;  %v3052_v1 = vpack.c.bf16 %v1311_v30, %v1309_v13  ;;  %v1063_v9 = vld [vmem:[#allocation8 + $0x6b0] sm:$0xff]  ;;  %v1317_v45 = vld [vmem:[#allocation8 + $0xea0] sm:$0xff] }
 0x17b   : > { %3041 = vmatpush1.bf16.msra.mxu0 %v3040_v53  ;;  %2787 = vmatprep.subr.bf16.mxu1 %v2786_v37  ;;  %v727_v24 = vsel %vm4612_vm1, %v724_v41, %v726_v28  ;;  %v1058_v53 = vld [vmem:[#allocation8 + $0x688] sm:$0xff]  ;;  %v1057_v41 = vld [vmem:[#allocation8 + $0x680] sm:$0xff] }
 0x17c   : > { %3043 = vmatprep.subr.bf16.mxu0 %v3042_v16  ;;  %1669 = vmatprep.mubr.f32.mxu1 %v4216_v56  ;;  %v4265_v37 = vld [vmem:[%s3860_s10 + $0xa8] sm:$0xff]  ;;  %v4273_v16 = vld [vmem:[%s3860_s10 + $0x80] sm:$0xff]  ;;  %v2798_v18 = vpack.c.bf16 %v1060_v48, %v1058_v53  ;;  %v2806_v48 = vpack.c.bf16 %v1068_v32, %v1066_v59  ;;  %v756_v59 = vrot.slane %v4244_v7, 1 }
 0x17d   : > { %2121 = vmatprep.mubr.f32.mxu0 %v4244_v7  ;;  %2532 = vmatmul.mubr.msk.f32.gmra.mrb[2].mxu1 %vm3922_vm2, %v723_v22  ;;  %v730_v22 = vrot.slane %v4265_v37, 7  ;;  %v4293_v13 = vld [vmem:[%s3860_s10 + $0xe8] sm:$0xff] }
 0x17e   : > { %2789 = vmatpush1.bf16.msra.mxu1 %v2788_v14  ;;  %2564 = vmatmul.mubr.msk.f32.gmra.mrb[2].mxu0 %vm3922_vm2, %v725_v33  ;;  %v1315_v14 = vld [vmem:[#allocation8 + $0xe90] sm:$0xff]  ;;  %vm4613_vm2 = vmmov %vm4612_vm1  ;;  %v1322_v30 = vld [vmem:[#allocation8 + $0xec8] sm:$0xff] }
 0x17f   : > { %3045 = vmatpush1.bf16.msra.mxu0 %v3044_v63  ;;  %2791 = vmatprep.subr.bf16.mxu1 %v2790_v11  ;;  %v729_v12 = vsel %vm4613_vm2, %v726_v28, %v728_v3  ;;  %v3054_v63 = vpack.c.bf16 %v1316_v50, %v1314_v29  ;;  %v1062_v11 = vld [vmem:[#allocation8 + $0x6a8] sm:$0xff]  ;;  %v1061_v28 = vld [vmem:[#allocation8 + $0x6a0] sm:$0xff]  ;;  %v3056_v34 = vpack.c.bf16 %v1315_v14, %v1313_v20  ;;  %v1067_v50 = vld [vmem:[#allocation8 + $0x6d0] sm:$0xff] }
 0x180   : > { %3047 = vmatprep.subr.bf16.mxu0 %v3046_v25  ;;  %1675 = vmatprep.mubr.f32.mxu1 %v4244_v7  ;;  %v4287_v25 = vld [vmem:[%s3860_s10 + $0xa0] sm:$0xff]  ;;  %v2802_v36 = vpack.c.bf16 %v1064_v6, %v1062_v11  ;;  %v1070_v20 = vld [vmem:[#allocation8 + $0x6e8] sm:$0xff] }
 0x181   : > { %2127 = vmatprep.mubr.f32.mxu0 %v4259_v55  ;;  %2533 = vmatmul.mubr.msk.f32.gmra.mrb[4].mxu1 %vm3949_vm3, %v725_v33  ;;  %v2800_v33 = vpack.c.bf16 %v1059_v19, %v1057_v41  ;;  %v1065_v29 = vld [vmem:[#allocation8 + $0x6c0] sm:$0xff]  ;;  %v1323_v19 = vld [vmem:[#allocation8 + $0xed0] sm:$0xff]  ;;  %v1326_v14 = vld [vmem:[#allocation8 + $0xee8] sm:$0xff]  ;;  %v2810_v6 = vpack.c.bf16 %v1072_v57, %v1070_v20 }
 0x182   : > { %2793 = vmatpush1.bf16.msra.mxu1 %v2792_v49  ;;  %2565 = vmatmul.mubr.msk.f32.gmra.mrb[4].mxu0 %vm3949_vm3, %v727_v24  ;;  %v1319_v49 = vld [vmem:[#allocation8 + $0xeb0] sm:$0xff]  ;;  %vm4614_vm3 = vmmov %vm4612_vm1  ;;  %v1077_v20 = vld [vmem:[#allocation8 + $0x720] sm:$0xff] }
 0x183   : > { %3049 = vmatpush1.bf16.msra.mxu0 %v3048_v15  ;;  %2795 = vmatprep.subr.bf16.mxu1 %v2794_v39  ;;  %v731_v35 = vsel %vm4614_vm3, %v728_v3, %v730_v22  ;;  %v732_v15 = vrot.slane %v4279_v23, 7  ;;  %v3058_v39 = vpack.c.bf16 %v1320_v38, %v1318_v8  ;;  %v4301_v3 = vld [vmem:[%s3860_s10 + $0xc0] sm:$0xff]  ;;  %v3060_v53 = vpack.c.bf16 %v1319_v49, %v1317_v45  ;;  %v1071_v38 = vld [vmem:[#allocation8 + $0x6f0] sm:$0xff]  ;;  %v1076_v45 = vld [vmem:[#allocation8 + $0x718] sm:$0xff] }
 0x184   : > { %3051 = vmatprep.subr.bf16.mxu0 %v3050_v52  ;;  %1681 = vmatprep.mubr.f32.mxu1 %v4259_v55  ;;  %v2804_v52 = vpack.c.bf16 %v1063_v9, %v1061_v28  ;;  %v1069_v8 = vld [vmem:[#allocation8 + $0x6e0] sm:$0xff]  ;;  %v1074_v9 = vld [vmem:[#allocation8 + $0x708] sm:$0xff]  ;;  %v754_v49 = vrot.slane %v4216_v56, 1  ;;  %v1075_v56 = vld [vmem:[#allocation8 + $0x710] sm:$0xff] }
 0x185   : > { %2133 = vmatprep.mubr.f32.mxu0 %v4273_v16  ;;  %2534 = vmatmul.mubr.msk.f32.gmra.mrb[6].mxu1 %vm3973_vm4, %v727_v24  ;;  %v1324_v24 = vld [vmem:[#allocation8 + $0xed8] sm:$0xff]  ;;  %v2814_v42 = vpack.c.bf16 %v1076_v45, %v1074_v9  ;;  %v1079_v57 = vld [vmem:[#allocation8 + $0x730] sm:$0xff]  ;;  %v1337_v9 = vld [vmem:[#allocation8 + $0xf40] sm:$0xff] }
 0x186   : > { %2797 = vmatpush1.bf16.msra.mxu1 %v2796_v47  ;;  %2566 = vmatmul.mubr.msk.f32.gmra.mrb[6].mxu0 %vm3973_vm4, %v729_v12  ;;  %v1321_v47 = vld [vmem:[#allocation8 + $0xec0] sm:$0xff]  ;;  %vm4615_vm4 = vmmov %vm4612_vm1 }
 0x187   : > { %3053 = vmatpush1.bf16.msra.mxu0 %v3052_v1  ;;  %2799 = vmatprep.subr.bf16.mxu1 %v2798_v18  ;;  %v733_v41 = vsel %vm4615_vm4, %v730_v22, %v732_v15  ;;  %v734_v1 = vrot.slane %v4293_v13, 7  ;;  %v3062_v18 = vpack.c.bf16 %v1324_v24, %v1322_v30  ;;  %v4312_v22 = vld [vmem:[%s3860_s10 + $0xe0] sm:$0xff]  ;;  %v3064_v11 = vpack.c.bf16 %v1323_v19, %v1321_v47  ;;  %v1334_v47 = vld [vmem:[#allocation8 + $0xf28] sm:$0xff] }
 0x188   : > { %3055 = vmatprep.subr.bf16.mxu0 %v3054_v63  ;;  %1687 = vmatprep.mubr.f32.mxu1 %v4273_v16  ;;  %v2808_v63 = vpack.c.bf16 %v1067_v50, %v1065_v29  ;;  %v1073_v30 = vld [vmem:[#allocation8 + $0x700] sm:$0xff]  ;;  %v1078_v29 = vld [vmem:[#allocation8 + $0x728] sm:$0xff]  ;;  %v1080_v50 = vld [vmem:[#allocation8 + $0x738] sm:$0xff]  ;;  %v766_v5 = vrot.slane %v4312_v22, 1 }
 0x189   : > { %2139 = vmatprep.mubr.f32.mxu0 %v4287_v25  ;;  %2535 = vmatmul.mubr.msk.f32.gmra.mrb[8].mxu1 %vm4000_vm5, %v729_v12  ;;  %v1328_v12 = vld [vmem:[#allocation8 + $0xef8] sm:$0xff]  ;;  %v1329_v24 = vld [vmem:[#allocation8 + $0xf00] sm:$0xff]  ;;  %v2818_v19 = vpack.c.bf16 %v1080_v50, %v1078_v29  ;;  %v1346_v50 = vld [vmem:[#allocation8 + $0xf88] sm:$0xff] }
 0x18a   : > { %2801 = vmatpush1.bf16.msra.mxu1 %v2800_v33  ;;  %2567 = vmatmul.mubr.msk.f32.gmra.mrb[8].mxu0 %vm4000_vm5, %v731_v35  ;;  %v1325_v33 = vld [vmem:[#allocation8 + $0xee0] sm:$0xff]  ;;  %vm4616_vm5 = vmmov %vm4612_vm1  ;;  %v1092_v29 = vld [vmem:[#allocation8 + $0x798] sm:$0xff] }
 0x18b   : > { %3057 = vmatpush1.bf16.msra.mxu0 %v3056_v34  ;;  %2803 = vmatprep.subr.bf16.mxu1 %v2802_v36  ;;  %v735_v28 = vsel %vm4616_vm5, %v732_v15, %v734_v1  ;;  %v3066_v34 = vpack.c.bf16 %v1328_v12, %v1326_v14  ;;  %v1327_v36 = vld [vmem:[#allocation8 + $0xef0] sm:$0xff]  ;;  %v2812_v15 = vpack.c.bf16 %v1071_v38, %v1069_v8  ;;  %v1333_v14 = vld [vmem:[#allocation8 + $0xf20] sm:$0xff]  ;;  %v1340_v8 = vld [vmem:[#allocation8 + $0xf58] sm:$0xff] }
 0x18c   : > { %3059 = vmatprep.subr.bf16.mxu0 %v3058_v39  ;;  %1693 = vmatprep.mubr.f32.mxu1 %v4287_v25  ;;  %v1332_v39 = vld [vmem:[#allocation8 + $0xf18] sm:$0xff]  ;;  %v3068_v32 = vpack.c.bf16 %v1327_v36, %v1325_v33  ;;  %v3074_v12 = vpack.c.bf16 %v1336_v2, %v1334_v47  ;;  %v2820_v38 = vpack.c.bf16 %v1079_v57, %v1077_v20  ;;  %v1083_v36 = vld [vmem:[#allocation8 + $0x750] sm:$0xff]  ;;  %v1345_v20 = vld [vmem:[#allocation8 + $0xf80] sm:$0xff] }
 0x18d   : > { %2145 = vmatprep.mubr.f32.mxu0 %v4301_v3  ;;  %2536 = vmatmul.mubr.msk.f32.gmra.mrb[10].mxu1 %vm4024_vm6, %v731_v35  ;;  %v1330_v35 = vld [vmem:[#allocation8 + $0xf08] sm:$0xff]  ;;  %v3078_v45 = vpack.c.bf16 %v1340_v8, %v1338_v43  ;;  %v1348_v47 = vld [vmem:[#allocation8 + $0xf98] sm:$0xff] }
 0x18e   : > { %2805 = vmatpush1.bf16.msra.mxu1 %v2804_v52  ;;  %2568 = vmatmul.mubr.msk.f32.gmra.mrb[10].mxu0 %vm4024_vm6, %v733_v41  ;;  %vm4617_vm6 = vmmov %vm4612_vm1  ;;  %v3086_v57 = vpack.c.bf16 %v1348_v47, %v1346_v50 }
 0x18f   : > { %3061 = vmatpush1.bf16.msra.mxu0 %v3060_v53  ;;  %2807 = vmatprep.subr.bf16.mxu1 %v2806_v48  ;;  %v823_v52 = vsel %vm4617_vm6, %v734_v1, %v3886_v10  ;;  %v3070_v53 = vpack.c.bf16 %v1332_v39, %v1330_v35  ;;  %v1331_v48 = vld [vmem:[#allocation8 + $0xf10] sm:$0xff]  ;;  %v1088_v35 = vld [vmem:[#allocation8 + $0x778] sm:$0xff]  ;;  %v1342_v39 = vld [vmem:[#allocation8 + $0xf68] sm:$0xff] }
 0x190   : > { %3063 = vmatprep.subr.bf16.mxu0 %v3062_v18  ;;  %1699 = vmatprep.mubr.f32.mxu1 %v4301_v3  ;;  %v2816_v18 = vpack.c.bf16 %v1075_v56, %v1073_v30  ;;  %v3072_v1 = vpack.c.bf16 %v1331_v48, %v1329_v24  ;;  %v1085_v30 = vld [vmem:[#allocation8 + $0x760] sm:$0xff]  ;;  %v1087_v56 = vld [vmem:[#allocation8 + $0x770] sm:$0xff]  ;;  %v1090_v48 = vld [vmem:[#allocation8 + $0x788] sm:$0xff] }
 0x191   : > { %2151 = vmatprep.mubr.f32.mxu0 %v4312_v22  ;;  %2537 = vmatmul.mubr.msk.f32.gmra.mrb[12].mxu1 %vm4046_vm7, %v733_v41  ;;  %v1341_v24 = vld [vmem:[#allocation8 + $0xf60] sm:$0xff]  ;;  %v2828_v2 = vpack.c.bf16 %v1087_v56, %v1085_v30 }
 0x192   : > { %2809 = vmatpush1.bf16.msra.mxu1 %v2808_v63  ;;  %2569 = vmatmul.mubr.msk.f32.gmra.mrb[12].mxu0 %vm4046_vm7, %v735_v28  ;;  %vm4618_vm7 = vcmask 1046528   ;;  %v1335_v63 = vld [vmem:[#allocation8 + $0xf30] sm:$0xff]  ;;  %v1353_v30 = vld [vmem:[#allocation8 + $0xfc0] sm:$0xff] }
 0x193   : > { %3065 = vmatpush1.bf16.msra.mxu0 %v3064_v11  ;;  %2811 = vmatprep.subr.bf16.mxu1 %v2810_v6  ;;  %v755_v41 = vsel %vm4618_vm7, %v753_v26, %v754_v49  ;;  %vm4619_vm14 = vmmov %vm4618_vm7  ;;  %v1082_v11 = vld [vmem:[#allocation8 + $0x748] sm:$0xff]  ;;  %v1084_v6 = vld [vmem:[#allocation8 + $0x758] sm:$0xff]  ;;  %v3076_v33 = vpack.c.bf16 %v1335_v63, %v1333_v14 }
 0x194   : > { %3067 = vmatprep.subr.bf16.mxu0 %v3066_v34  ;;  %1705 = vmatprep.mubr.f32.mxu1 %v4312_v22  ;;  %v4336_v10 = vsel %vm4619_vm14, %v754_v49, %v756_v59  ;;  %v1081_v34 = vld [vmem:[#allocation8 + $0x740] sm:$0xff]  ;;  %v1339_v26 = vld [vmem:[#allocation8 + $0xf50] sm:$0xff]  ;;  %v1086_v49 = vld [vmem:[#allocation8 + $0x768] sm:$0xff] }
 0x195   : > { %2157 = vmatprep.mubr.f32.mxu0 %v3574_v0  ;;  %2538 = vmatmul.mubr.msk.f32.gmra.mrb[14].mxu1 %vm4072_vm9, %v735_v28  ;;  %v2822_v28 = vpack.c.bf16 %v1084_v6, %v1082_v11  ;;  %v3080_v62 = vpack.c.bf16 %v1339_v26, %v1337_v9  ;;  %v1347_v14 = vld [vmem:[#allocation8 + $0xf90] sm:$0xff]  ;;  %v1096_v63 = vld [vmem:[#allocation8 + $0x7b8] sm:$0xff]  ;;  %v1350_v11 = vld [vmem:[#allocation8 + $0xfa8] sm:$0xff] }
 0x196   : > { %2813 = vmatpush1.bf16.msra.mxu1 %v2812_v15  ;;  %2570 = vmatmul.mubr.msk.f32.gmra.mrb[14].mxu0 %vm4072_vm9, %v823_v52  ;;  %v1344_v15 = vld [vmem:[#allocation8 + $0xf78] sm:$0xff]  ;;  %v3088_v8 = vpack.c.bf16 %v1347_v14, %v1345_v20  ;;  %v1351_v9 = vld [vmem:[#allocation8 + $0xfb0] sm:$0xff]  ;;  %vm4620_vm9 = vmmov %vm4618_vm7 }
 0x197   : > { %3069 = vmatpush1.bf16.msra.mxu0 %v3068_v32  ;;  %2815 = vmatprep.subr.bf16.mxu1 %v2814_v42  ;;  %v2824_v32 = vpack.c.bf16 %v1083_v36, %v1081_v34  ;;  %v2826_v42 = vpack.c.bf16 %v1088_v35, %v1086_v49  ;;  %v3082_v52 = vpack.c.bf16 %v1344_v15, %v1342_v39  ;;  %v1352_v6 = vld [vmem:[#allocation8 + $0xfb8] sm:$0xff]  ;;  %v1349_v34 = vld [vmem:[#allocation8 + $0xfa0] sm:$0xff]  ;;  %v1354_v49 = vld [vmem:[#allocation8 + $0xfc8] sm:$0xff] }
 0x198   : > { %3071 = vmatprep.subr.bf16.mxu0 %v3070_v53  ;;  %2539 = vmatprep.mubr.msk.f32.mxu1 %vm4078_vm10, %v755_v41  ;;  %v1343_v53 = vld [vmem:[#allocation8 + $0xf70] sm:$0xff]  ;;  %v3090_v36 = vpack.c.bf16 %v1352_v6, %v1350_v11  ;;  %v1100_v26 = vld [vmem:[#allocation8 + $0x7d8] sm:$0xff]  ;;  %v3092_v15 = vpack.c.bf16 %v1351_v9, %v1349_v34  ;;  %vm4622_vm15 = vmmov %vm4618_vm7 }
 0x199   : > { %2571 = vmatprep.mubr.msk.f32.mxu0 %vm4078_vm10, %v4336_v10  ;;  %v3084_v41 = vpack.c.bf16 %v1343_v53, %v1341_v24  ;;  %v1356_v35 = vld [vmem:[#allocation8 + $0xfd8] sm:$0xff]  ;;  %v1355_v24 = vld [vmem:[#allocation8 + $0xfd0] sm:$0xff]  ;;  %vm4621_vm10 = vmmov %vm4618_vm7 }
 0x19a   : > { %2817 = vmatpush1.bf16.msra.mxu1 %v2816_v18  ;;  %v2830_v18 = vpack.c.bf16 %v1092_v29, %v1090_v48  ;;  %v3094_v56 = vpack.c.bf16 %v1356_v35, %v1354_v49  ;;  %v1104_v53 = vld [vmem:[#allocation8 + $0x7f8] sm:$0xff]  ;;  %v1358_v48 = vld [vmem:[#allocation8 + $0xfe8] sm:$0xff]  ;;  %v3096_v47 = vpack.c.bf16 %v1355_v24, %v1353_v30  ;;  %v1359_v20 = vld [vmem:[#allocation8 + $0xff0] sm:$0xff] }
 0x19b   : > { %3073 = vmatpush1.bf16.msra.mxu0 %v3072_v1  ;;  %2819 = vmatprep.subr.bf16.mxu1 %v2818_v19  ;;  %v1089_v1 = vld [vmem:[#allocation8 + $0x780] sm:$0xff]  ;;  %v1091_v19 = vld [vmem:[#allocation8 + $0x790] sm:$0xff]  ;;  %v1360_v29 = vld [vmem:[#allocation8 + $0xff8] sm:$0xff] }
 0x19c   : > { %3075 = vmatprep.subr.bf16.mxu0 %v3074_v12  ;;  %v1094_v12 = vld [vmem:[#allocation8 + $0x7a8] sm:$0xff]  ;;  %v2832_v43 = vpack.c.bf16 %v1091_v19, %v1089_v1  ;;  %v3098_v1 = vpack.c.bf16 %v1360_v29, %v1358_v48  ;;  %v1357_v19 = vld [vmem:[#allocation8 + $0xfe0] sm:$0xff]  ;;  %vm4625_vm1 = vmmov %vm4618_vm7 }
 0x19d   : > { %v3100_v14 = vpack.c.bf16 %v1359_v20, %v1357_v19  ;;  %vm4627_vm2 = vmmov %vm4625_vm1 }
 0x19e   : > { %2821 = vmatpush1.bf16.msra.mxu1 %v2820_v38  ;;  %v2834_v38 = vpack.c.bf16 %v1096_v63, %v1094_v12  ;;  %v758_v12 = vrot.slane %v4259_v55, 1  ;;  %v760_v63 = vrot.slane %v4273_v16, 1  ;;  %v762_v55 = vrot.slane %v4287_v25, 1  ;;  %vm4628_vm3 = vmmov %vm4625_vm1 }
 0x19f   : > { %3077 = vmatpush1.bf16.msra.mxu0 %v3076_v33  ;;  %2823 = vmatprep.subr.bf16.mxu1 %v2822_v28  ;;  %v1093_v33 = vld [vmem:[#allocation8 + $0x7a0] sm:$0xff]  ;;  %v1095_v28 = vld [vmem:[#allocation8 + $0x7b0] sm:$0xff]  ;;  %v829_v54 = vsel %vm4627_vm2, %v766_v5, %v4056_v17  ;;  %vm4629_vm4 = vmmov %vm4625_vm1 }
 0x1a0   : > { %3079 = vmatprep.subr.bf16.mxu0 %v3078_v45  ;;  %v1098_v45 = vld [vmem:[#allocation8 + $0x7c8] sm:$0xff]  ;;  %v2836_v39 = vpack.c.bf16 %v1095_v28, %v1093_v33  ;;  %v759_v11 = vsel %vm4620_vm9, %v756_v59, %v758_v12  ;;  %v761_v6 = vsel %vm4621_vm10, %v758_v12, %v760_v63  ;;  %v763_v7 = vsel %vm4622_vm15, %v760_v63, %v762_v55 }
 0x1a2   : > { %2825 = vmatpush1.bf16.msra.mxu1 %v2824_v32  ;;  %v2838_v32 = vpack.c.bf16 %v1100_v26, %v1098_v45 }
 0x1a3   : > { %3081 = vmatpush1.bf16.msra.mxu0 %v3080_v62  ;;  %2827 = vmatprep.subr.bf16.mxu1 %v2826_v42  ;;  %v1097_v62 = vld [vmem:[#allocation8 + $0x7c0] sm:$0xff]  ;;  %v1099_v42 = vld [vmem:[#allocation8 + $0x7d0] sm:$0xff] }
 0x1a4   : > { %3083 = vmatprep.subr.bf16.mxu0 %v3082_v52  ;;  %v1102_v52 = vld [vmem:[#allocation8 + $0x7e8] sm:$0xff]  ;;  %v2840_v50 = vpack.c.bf16 %v1099_v42, %v1097_v62 }
 0x1a6   : > { %2829 = vmatpush1.bf16.msra.mxu1 %v2828_v2  ;;  %v2842_v2 = vpack.c.bf16 %v1104_v53, %v1102_v52 }
 0x1a7   : > { %3085 = vmatpush1.bf16.msra.mxu0 %v3084_v41  ;;  %2831 = vmatprep.subr.bf16.mxu1 %v2830_v18  ;;  %v1101_v41 = vld [vmem:[#allocation8 + $0x7e0] sm:$0xff]  ;;  %v1103_v18 = vld [vmem:[#allocation8 + $0x7f0] sm:$0xff] }
 0x1a8   : > { %3087 = vmatprep.subr.bf16.mxu0 %v3086_v57  ;;  %v2844_v57 = vpack.c.bf16 %v1103_v18, %v1101_v41 }
 0x1aa   : > { %2833 = vmatpush1.bf16.msra.mxu1 %v2832_v43 }
 0x1ab   : > { %3089 = vmatpush1.bf16.msra.mxu0 %v3088_v8  ;;  %2835 = vmatprep.subr.bf16.mxu1 %v2834_v38 }
 0x1ac   : > { %3091 = vmatprep.subr.bf16.mxu0 %v3090_v36 }
 0x1ae   : > { %2837 = vmatpush1.bf16.msra.mxu1 %v2836_v39 }
 0x1af   : > { %3093 = vmatpush1.bf16.msra.mxu0 %v3092_v15  ;;  %2839 = vmatprep.subr.bf16.mxu1 %v2838_v32 }
 0x1b0   : > { %3095 = vmatprep.subr.bf16.mxu0 %v3094_v56 }
 0x1b2   : > { %2841 = vmatpush1.bf16.msra.mxu1 %v2840_v50 }
 0x1b3   : > { %3097 = vmatpush1.bf16.msra.mxu0 %v3096_v47  ;;  %2843 = vmatprep.subr.bf16.mxu1 %v2842_v2 }
 0x1b4   : > { %3099 = vmatprep.subr.bf16.mxu0 %v3098_v1 }
 0x1b6   : > { %2845 = vmatpush1.bf16.msra.mxu1 %v2844_v57 }
 0x1b7   : > { %3101 = vmatpush1.bf16.msra.mxu0 %v3100_v14 }
 0x1b9   : > { %1777 = vmatmul.mubr.f32.vlgmr.msra.gmra.mrb[0].mxu1 %v4221_v46  ;;  %v764_v46 = vrot.slane %v4301_v3, 1 }
 0x1ba   : > { %2229 = vmatmul.mubr.f32.vlgmr.msra.gmra.mrb[0].mxu0 %v4224_v21  ;;  %2540 = vmatprep.mubr.msk.f32.mxu1 %vm4106_vm11, %v4336_v10 }
 0x1bb   : > { %2572 = vmatprep.mubr.msk.f32.mxu0 %vm4106_vm11, %v759_v11  ;;  %vm4623_vm11 = vmmov %vm4618_vm7  ;;  %v767_v4 = vsel %vm4625_vm1, %v764_v46, %v766_v5 }
 0x1bd   : > { %1783 = vmatmul.mubr.f32.gmra.mrb[2].mxu1 %v4224_v21  ;;  %v765_v21 = vsel %vm4623_vm11, %v762_v55, %v764_v46 }
 0x1be   : > { %2235 = vmatmul.mubr.f32.gmra.mrb[2].mxu0 %v4229_v44  ;;  %2541 = vmatprep.mubr.msk.f32.mxu1 %vm4123_vm12, %v759_v11 }
 0x1bf   : > { %2573 = vmatprep.mubr.msk.f32.mxu0 %vm4123_vm12, %v761_v6  ;;  %vm4624_vm12 = vnez %v4597_v58  ;;  %v776_v58 = vsel %vm4628_vm3, %v766_v5, %v4312_v22 }
 0x1c1   : > { %1789 = vmatmul.mubr.f32.gmra.mrb[4].mxu1 %v4229_v44  ;;  %v1361_v44 = vld [vmem:[#allocation10] sm:$0x3] }
 0x1c2   : > { %2241 = vmatmul.mubr.f32.gmra.mrb[4].mxu0 %v4237_v60  ;;  %2542 = vmatprep.mubr.msk.f32.mxu1 %vm4137_vm13, %v761_v6 }
 0x1c3   : > { %2574 = vmatprep.mubr.msk.f32.mxu0 %vm4137_vm13, %v763_v7  ;;  %vm4626_vm13 = vnez %v4600_v31  ;;  %v832_v31 = vsel %vm4629_vm4, %v4056_v17, 0.0  ;;  %v4408_v17 = vrot.slane %v1361_v44, %v1365_v51 }
 0x1c5   : > { %1795 = vmatmul.mubr.f32.gmra.mrb[6].mxu1 %v4237_v60  ;;  %v1369_v60 = vsub.s32 1, %v3880_v61 }
 0x1c6   : > { %2247 = vmatmul.mubr.f32.gmra.mrb[6].mxu0 %v4251_v40  ;;  %2543 = vmatprep.mubr.msk.f32.mxu1 %vm4624_vm12, %v763_v7 }
 0x1c7   : > { %2575 = vmatprep.mubr.msk.f32.mxu0 %vm4624_vm12, %v765_v21 }
 0x1c9   : > { %1801 = vmatmul.mubr.f32.gmra.mrb[8].mxu1 %v4251_v40  ;;  %v4410_v40 = vrot.slane %v1361_v44, %v1369_v60 }
 0x1ca   : > { %2253 = vmatmul.mubr.f32.gmra.mrb[8].mxu0 %v4265_v37  ;;  %2544 = vmatprep.mubr.msk.f32.mxu1 %vm4626_vm13, %v765_v21 }
 0x1cb   : > { %2576 = vmatprep.mubr.msk.f32.mxu0 %vm4626_vm13, %v767_v4 }
 0x1cd   : > { %1807 = vmatmul.mubr.f32.gmra.mrb[10].mxu1 %v4265_v37 }
 0x1ce   : > { %2259 = vmatmul.mubr.f32.gmra.mrb[10].mxu0 %v4279_v23  ;;  %2545 = vmatprep.mubr.msk.f32.mxu1 %vm4182_vm0, %v767_v4 }
 0x1cf   : > { %2577 = vmatprep.mubr.msk.f32.mxu0 %vm4182_vm0, %v829_v54 }
 0x1d1   : > { %1813 = vmatmul.mubr.f32.gmra.mrb[12].mxu1 %v4279_v23 }
 0x1d2   : > { %2265 = vmatmul.mubr.f32.gmra.mrb[12].mxu0 %v4293_v13  ;;  %2546 = vmatprep.mubr.msk.f32.mxu1 %vm4196_vm8, %v776_v58 }
 0x1d3   : > { %2578 = vmatprep.mubr.msk.f32.mxu0 %vm4196_vm8, %v832_v31 }
 0x1d5   : > { %1819 = vmatmul.mubr.f32.gmra.mrb[14].mxu1 %v4293_v13 }
 0x1d6   : > { %2271 = vmatmul.mubr.f32.gmra.mrb[14].mxu0 %v3574_v0 }
 0x28c   : > { %v1778_v37 = vpop.f32.mrb[0].mxu1 }
 0x28d   : > { %v3102_v16 = vadd.f32 %v1778_v37, %v4408_v17  ;;  %v2230_v23 = vpop.f32.mrb[0].mxu0  ;;  %v1780_v27 = vpop.f32.mrb[1].mxu1 }
 0x28e   : > { %v3104_v25 = vadd.f32 %v1780_v27, %v4410_v40  ;;  %v2232_v13 = vpop.f32.mrb[1].mxu0 }
 0x28f   : > { %v3103_v3 = vadd.f32 %v3102_v16, %v2230_v23 }
 0x290   : > { %v3105_v0 = vadd.f32 %v3104_v25, %v2232_v13  ;;  %v1784_v22 = vpop.f32.mrb[2].mxu1 }
 0x291   : > { %2277 = vst [vmem:[%s4415_s26] sm:$0xff] %v3103_v3  ;;  %v3106_v61 = vadd.f32 %v1784_v22, %v4408_v17  ;;  %v2236_v59 = vpop.f32.mrb[2].mxu0  ;;  %v1786_v10 = vpop.f32.mrb[3].mxu1 }
 0x292   : > { %2278 = vst [vmem:[%s4415_s26 + $0x8] sm:$0xff] %v3105_v0  ;;  %v3108_v43 = vadd.f32 %v1786_v10, %v4410_v40  ;;  %v2238_v8 = vpop.f32.mrb[3].mxu0 }
 0x293   : > { %v3107_v38 = vadd.f32 %v3106_v61, %v2236_v59 }
 0x294   : > { %v3109_v33 = vadd.f32 %v3108_v43, %v2238_v8  ;;  %v1790_v28 = vpop.f32.mrb[4].mxu1 }
 0x295   : > { %2279 = vst [vmem:[%s4415_s26 + $0x10] sm:$0xff] %v3107_v38  ;;  %v3110_v34 = vadd.f32 %v1790_v28, %v4408_v17  ;;  %v2242_v36 = vpop.f32.mrb[4].mxu0  ;;  %v1792_v9 = vpop.f32.mrb[5].mxu1 }
 0x296   : > { %2280 = vst [vmem:[%s4415_s26 + $0x18] sm:$0xff] %v3109_v33  ;;  %v3112_v45 = vadd.f32 %v1792_v9, %v4410_v40  ;;  %v2244_v26 = vpop.f32.mrb[5].mxu0 }
 0x297   : > { %v3111_v49 = vadd.f32 %v3110_v34, %v2242_v36 }
 0x298   : > { %v3113_v35 = vadd.f32 %v3112_v45, %v2244_v26  ;;  %v1796_v39 = vpop.f32.mrb[6].mxu1 }
 0x299   : > { %2281 = vst [vmem:[%s4415_s26 + $0x20] sm:$0xff] %v3111_v49  ;;  %v3114_v15 = vadd.f32 %v1796_v39, %v4408_v17  ;;  %v2248_v32 = vpop.f32.mrb[6].mxu0  ;;  %v1798_v62 = vpop.f32.mrb[7].mxu1 }
 0x29a   : > { %2282 = vst [vmem:[%s4415_s26 + $0x28] sm:$0xff] %v3113_v35  ;;  %v3116_v42 = vadd.f32 %v1798_v62, %v4410_v40  ;;  %v2250_v30 = vpop.f32.mrb[7].mxu0 }
 0x29b   : > { %v3115_v56 = vadd.f32 %v3114_v15, %v2248_v32 }
 0x29c   : > { %v3117_v24 = vadd.f32 %v3116_v42, %v2250_v30  ;;  %v1802_v52 = vpop.f32.mrb[8].mxu1 }
 0x29d   : > { %2283 = vst [vmem:[%s4415_s26 + $0x30] sm:$0xff] %v3115_v56  ;;  %v3118_v53 = vadd.f32 %v1802_v52, %v4408_v17  ;;  %v2254_v48 = vpop.f32.mrb[8].mxu0  ;;  %v1804_v29 = vpop.f32.mrb[9].mxu1 }
 0x29e   : > { %2284 = vst [vmem:[%s4415_s26 + $0x38] sm:$0xff] %v3117_v24  ;;  %v3120_v50 = vadd.f32 %v1804_v29, %v4410_v40  ;;  %v2256_v47 = vpop.f32.mrb[9].mxu0 }
 0x29f   : > { %v3119_v2 = vadd.f32 %v3118_v53, %v2254_v48 }
 0x2a0   : > { %v3121_v41 = vadd.f32 %v3120_v50, %v2256_v47  ;;  %v1808_v18 = vpop.f32.mrb[10].mxu1 }
 0x2a1   : > { %2285 = vst [vmem:[%s4415_s26 + $0x40] sm:$0xff] %v3119_v2  ;;  %v3122_v1 = vadd.f32 %v1808_v18, %v4408_v17  ;;  %v2260_v19 = vpop.f32.mrb[10].mxu0  ;;  %v1810_v20 = vpop.f32.mrb[11].mxu1 }
 0x2a2   : > { %2286 = vst [vmem:[%s4415_s26 + $0x48] sm:$0xff] %v3121_v41  ;;  %v3124_v57 = vadd.f32 %v1810_v20, %v4410_v40  ;;  %v2262_v14 = vpop.f32.mrb[11].mxu0 }
 0x2a3   : > { %v3123_v12 = vadd.f32 %v3122_v1, %v2260_v19 }
 0x2a4   : > { %v3125_v63 = vadd.f32 %v3124_v57, %v2262_v14  ;;  %v1814_v11 = vpop.f32.mrb[12].mxu1 }
 0x2a5   : > { %2287 = vst [vmem:[%s4415_s26 + $0x50] sm:$0xff] %v3123_v12  ;;  %v3126_v55 = vadd.f32 %v1814_v11, %v4408_v17  ;;  %v2266_v6 = vpop.f32.mrb[12].mxu0  ;;  %v1816_v46 = vpop.f32.mrb[13].mxu1 }
 0x2a6   : > { %2288 = vst [vmem:[%s4415_s26 + $0x58] sm:$0xff] %v3125_v63  ;;  %v3128_v7 = vadd.f32 %v1816_v46, %v4410_v40  ;;  %v2268_v5 = vpop.f32.mrb[13].mxu0 }
 0x2a7   : > { %v3127_v21 = vadd.f32 %v3126_v55, %v2266_v6 }
 0x2a8   : > { %v3129_v4 = vadd.f32 %v3128_v7, %v2268_v5  ;;  %v1820_v54 = vpop.f32.mrb[14].mxu1 }
 0x2a9   : > { %2289 = vst [vmem:[%s4415_s26 + $0x60] sm:$0xff] %v3127_v21  ;;  %v3130_v58 = vadd.f32 %v1820_v54, %v4408_v17  ;;  %v2272_v31 = vpop.f32.mrb[14].mxu0  ;;  %v1822_v51 = vpop.f32.mrb[15].mxu1 }
 0x2aa   : > { %2290 = vst [vmem:[%s4415_s26 + $0x68] sm:$0xff] %v3129_v4  ;;  %v3132_v44 = vadd.f32 %v1822_v51, %v4410_v40  ;;  %v2274_v60 = vpop.f32.mrb[15].mxu0 }
 0x2ab   : > { %v3131_v37 = vadd.f32 %v3130_v58, %v2272_v31 }
 0x2ac   : > { %v3133_v16 = vadd.f32 %v3132_v44, %v2274_v60 }
 0x2ad   : > { %2291 = vst [vmem:[%s4415_s26 + $0x70] sm:$0xff] %v3131_v37 }
 0x2ae   : > { %2292 = vst [vmem:[%s4415_s26 + $0x78] sm:$0xff] %v3133_v16 }
 0x2af   : > { %3488 = shalt.err (!%p3485_p8)
}
 0x2b0   : > { %s3489_s7 = scalar_lea.hbm %s4450_s16, 2048  ;;  %s3493_s13 = scalar_lea.hbm %s4508_s5, 4096 }
 0x2b1   : > { %p3490_p0 = scmp.ne.s32.totalorder %s4450_s16, %s3489_s7  ;;  %p3494_p7 = scmp.lt.u32.totalorder %s4450_s16, %s4508_s5 }
 0x2b2   : > { %p3495_p13 = scmp.lt.u32.totalorder %s3493_s13, %s3489_s7  ;;  %p3497_p2 = scmp.lt.u32.totalorder %s3489_s7, %s4450_s16 }
 0x2b3   : > { %p3491_p5 = pnand %p3490_p0, %p4630_p4 }
 0x2b4   : > { %p3496_p9 = por %p3495_p13, %p3494_p7 }
 0x2b5   : > { %p3492_p12 = pneg %p3491_p5 }
 0x2b6   : > { %p3498_p10 = por %p3497_p2, %p3496_p9 }
 0x2b8   : > { %p3499_p3 = pnand %p3498_p10, %p3492_p12 }
 0x2ba   : > { %3502 = shalt.err (!%p3499_p3)
}
 0x2bb   : > { %s3576_s30 = smov 256   ;;  %s3577_s10 = smov 16  }
 0x2bc   : > { %3244 = dma.vmem_to_hbm [thread:$0]  (%p4630_p4), %s4452_s3, 2048, %s4450_s16, %s2294_s21, %s3576_s30, %s3576_s30, %s3577_s10  }
 0x2bd PF: > { %s4631_s12 = sld [smem:[#allocation18_spill]]  ;;  %s2327_s28 = sand.u32 1, %s3545_s18  }
 0x2be   : > { %p4633_p1 = scmp.ge.s32.totalorder %s3565_s23, 2  ;;  %s2328_s24 = scalar_lea.sflag [#allocation4], %s2327_s28 }
 0x2c3   : > { %p4632_p11 = scmp.ne.s32.totalorder %s4631_s12, 0 }
 0x2c5   : > { %p3264_p6 = pnand %p4633_p1, %p4632_p11 }
 0x2c7   : > { %3540 = dma.done.wait (!%p3264_p6), %s2328_s24, 2048  }
 0x2c8   : > { %3542 = vsyncadd (!%p3264_p6), %s2328_s24, 4294965248  ;;  %s25_s23 = sadd.s32 1, %s3565_s23   ;;  %s4634_s26 = sld [smem:[#allocation16_spill]] }
 0x2c9   : > { %p22_p8 = scmp.ge.s32.totalorder %s25_s23, 4   ;;  %s4635_s20 = sld [smem:[#allocation20_spill]] }
 0x2ca   : > { %s4636_s21 = sld [smem:[#allocation17_spill]]  ;;  %s4637_s22 = sld [smem:[#allocation19_spill]] }
 0x2cb   : > { %s4638_s18 = smov %s3549_s19  ;;  %24 = sbr.rel (!%p22_p8) target bundleno = 12 (0xc), region = 120 }
 0x2ce   : > { %s4639_s19 = smov %s4634_s26 }
 0x2d2   :  { %2333 = vsyncpa [#allocation3], 1 }
 0x2d3   :  { %2335 = vsyncpa [#allocation3 + $0x1], 1 }
 0x2d4   :  { %2336 = vsyncpa [#allocation6], 1 }
 0x2d5   :  { %2338 = vsyncpa [#allocation6 + $0x1], 1 }
 0x2d6   :  { %2339 = vsyncpa [#allocation9], 1 }
 0x2d7   :  { %2340 = vsyncpa [#allocation4], 1 }
 0x2d8   :  { %2342 = vsyncpa [#allocation4 + $0x1], 1 }

</bundles_post_ra>
